<compile_context>
chip_gen: v7x
topology: tpu7x:2x2x1
jax: 0.10.0
libtpu: 0.0.40
codegen_flags: <defaults>
</compile_context>

<pallas_src>
import math
import numpy as np

import jax
import jax.numpy as jnp
from jax import lax
from jax.scipy.special import logsumexp
from jax.experimental import pallas as pl
from jax.experimental.pallas import tpu as pltpu

# ----------------------- small synthetic BERT dims -----------------------
B = 2            # batch
S = 8            # sequence length
H = 32           # hidden size
NUM_HEADS = 4
HEAD_DIM = H // NUM_HEADS
FFN = 64         # intermediate size
V = 100          # vocab size
NUM_LABELS = 5   # CRF tags
NUM_LAYERS = 2
LN_EPS = 1e-12


def _layer_norm(x, g, b, eps=LN_EPS):
    mu = jnp.mean(x, axis=-1, keepdims=True)
    var = jnp.mean((x - mu) ** 2, axis=-1, keepdims=True)
    return (x - mu) * lax.rsqrt(var + eps) * g + b


# ======== single fused kernel: encoder stack + classifier + CRF NLL ========
def bert_crf_fused_kernel(
        mask_sref,                                      # SMEM (B, S) int32 (scalar prefetch)
        x_ref, bias_ref, tags_ref, maskf_ref,           # per-batch blocks
        wqkv_ref, bqkv_ref, wo_ref, bo_ref,
        ln1g_ref, ln1b_ref, w1_ref, b1_ref,
        w2_ref, b2_ref, ln2g_ref, ln2b_ref,             # stacked (NUM_LAYERS, ...) weights
        wc_ref, bc_ref, start_ref, end_ref, trans_ref,  # classifier + CRF params
        nll_ref,                                        # out (1, 1, 1)
        em_ref):                                        # VMEM scratch (S, L) emissions
    b = pl.program_id(0)
    L = NUM_LABELS
    scale = 1.0 / math.sqrt(HEAD_DIM)

    h = x_ref[0]          # (S, H)
    bias = bias_ref[0]    # (1, S) additive attention mask

    # -------------- BERT encoder: all layers inside one launch --------------
    for l in range(NUM_LAYERS):
        qkv = jnp.dot(h, wqkv_ref[l], preferred_element_type=jnp.float32) + bqkv_ref[l]
        heads = []
        for hd in range(NUM_HEADS):
            qs = hd * HEAD_DIM
            qh = qkv[:, qs:qs + HEAD_DIM]
            kh = qkv[:, H + qs:H + qs + HEAD_DIM]
            vh = qkv[:, 2 * H + qs:2 * H + qs + HEAD_DIM]
            s = lax.dot_general(qh, kh, (((1,), (1,)), ((), ())),
                                preferred_element_type=jnp.float32) * scale
            s = s + bias
            m = jnp.max(s, axis=-1, keepdims=True)
            p = jnp.exp(s - m)
            p = p / jnp.sum(p, axis=-1, keepdims=True)
            # per-head context stays in registers (no masked VMEM stores)
            heads.append(jnp.dot(p, vh, preferred_element_type=jnp.float32))
        ctx = jnp.concatenate(heads, axis=-1)                               # (S, H)
        attn = jnp.dot(ctx, wo_ref[l], preferred_element_type=jnp.float32) + bo_ref[l]
        h1 = _layer_norm(h + attn, ln1g_ref[l], ln1b_ref[l])
        f = jnp.dot(h1, w1_ref[l], preferred_element_type=jnp.float32) + b1_ref[l]
        f = jax.nn.gelu(f, approximate=True)
        f = jnp.dot(f, w2_ref[l], preferred_element_type=jnp.float32) + b2_ref[l]
        h = _layer_norm(h1 + f, ln2g_ref[l], ln2b_ref[l])

    # -------- classifier (dropout(0.1) == identity) -> emissions (S, L) -----
    em = jnp.dot(h, wc_ref[...], preferred_element_type=jnp.float32) + bc_ref[...]
    em_ref[...] = em          # ref copy for dynamic row reads in the recursion

    start = start_ref[...]    # (1, L)
    end = end_ref[...]        # (1, L)
    trans = trans_ref[...]    # (L, L)   trans[i, j] = score(i -> j)
    tags = tags_ref[0]        # (S, 1) int32
    maskf = maskf_ref[0]      # (S, 1) float32 (contiguous-prefix mask, mask[0] == 1)

    # ----------- gold-path score: fully vectorized over time ----------------
    lane = lax.broadcasted_iota(jnp.int32, (S, L), 1)
    oh = (lane == tags).astype(jnp.float32)                                 # (S, L)

    em_gold = jnp.sum(em * oh * maskf)                                      # sum_t m_t*em[t,tag_t]
    trans_rows = jnp.dot(oh, trans, preferred_element_type=jnp.float32)     # row t = trans[tag_t, :]
    trans_gold = jnp.sum(trans_rows[:S - 1] * oh[1:] * maskf[1:])           # sum m_t*trans[tag_{t-1},tag_t]
    start_sc = jnp.sum(start * oh[0:1, :])
    row = lax.broadcasted_iota(jnp.int32, (S, 1), 0)
    seq_last = jnp.sum(maskf).astype(jnp.int32) - 1
    oh_last = jnp.sum(oh * (row == seq_last).astype(jnp.float32),
                      axis=0, keepdims=True)                                # (1, L)
    end_sc = jnp.sum(end * oh_last)
    gold = start_sc + em_gold + trans_gold + end_sc

    # ------ forward algorithm (log partition), alpha replicated on sublanes -
    # new_alpha[j] = LSE_i(alpha[i] + trans[i, j]) + em[t, j]
    #             = max(alpha) + log( exp(alpha - max) @ exp(trans) )[j] + em[t, j]
    exp_trans = jnp.exp(trans)                                              # (L, L), hoisted
    # replicate alpha across S sublanes so the per-step vector-matrix product
    # is a plain (S, L) x (L, L) tile matmul (all rows stay identical).
    alpha = start + em[0:1, :] + jnp.zeros((S, 1), jnp.float32)             # (S, L)

    def body(t, alpha):
        on = mask_sref[b, t] > 0                                            # scalar gate (SMEM)
        e_t = em_ref[pl.ds(t, 1), :]                                        # (1, L)
        m = jnp.max(alpha)
        na = m + jnp.log(jnp.dot(jnp.exp(alpha - m), exp_trans,
                                 preferred_element_type=jnp.float32)) + e_t
        return jnp.where(on, na, alpha)

    alpha = lax.fori_loop(1, S, body, alpha, unroll=True)

    v = alpha[0:1, :] + end
    m = jnp.max(v)
    log_z = m + jnp.log(jnp.sum(jnp.exp(v - m)))
    nll_ref[...] = (log_z - gold) * jnp.ones((1, 1, 1), jnp.float32)


def bert_crf_pallas(x, attn_bias, tags_col, maskf_col, mask_i32, params):
    L = NUM_LABELS
    lw = params["layers"]

    def full(shape):
        return pl.BlockSpec(shape, lambda b, *_, _n=len(shape): (0,) * _n)

    def per_batch(shape):
        return pl.BlockSpec(shape, lambda b, *_: (b, 0, 0))

    in_specs = [
        per_batch((1, S, H)),        # embedded activations
        per_batch((1, 1, S)),        # additive attention bias
        per_batch((1, S, 1)),        # tags column (int32)
        per_batch((1, S, 1)),        # mask column (f32)
        full((NUM_LAYERS, H, 3 * H)), full((NUM_LAYERS, 1, 3 * H)),
        full((NUM_LAYERS, H, H)), full((NUM_LAYERS, 1, H)),
        full((NUM_LAYERS, 1, H)), full((NUM_LAYERS, 1, H)),
        full((NUM_LAYERS, H, FFN)), full((NUM_LAYERS, 1, FFN)),
        full((NUM_LAYERS, FFN, H)), full((NUM_LAYERS, 1, H)),
        full((NUM_LAYERS, 1, H)), full((NUM_LAYERS, 1, H)),
        full((H, L)), full((1, L)),
        full((1, L)), full((1, L)), full((L, L)),
    ]
    nll = pl.pallas_call(
        bert_crf_fused_kernel,
        out_shape=jax.ShapeDtypeStruct((B, 1, 1), jnp.float32),
        grid_spec=pltpu.PrefetchScalarGridSpec(
            num_scalar_prefetch=1,
            grid=(B,),
            in_specs=in_specs,
            out_specs=pl.BlockSpec((1, 1, 1), lambda b, *_: (b, 0, 0)),
            scratch_shapes=[pltpu.VMEM((S, NUM_LABELS), jnp.float32)]),
        compiler_params=pltpu.CompilerParams(dimension_semantics=("parallel",)),
    )(mask_i32, x, attn_bias, tags_col, maskf_col,
      lw["wqkv"], lw["bqkv"], lw["wo"], lw["bo"],
      lw["ln1g"], lw["ln1b"], lw["w1"], lw["b1"],
      lw["w2"], lw["b2"], lw["ln2g"], lw["ln2b"],
      params["wc"], params["bc"], params["start"], params["end"], params["trans"])
    return nll[:, 0, 0]


# ============================ model wrapper ==============================
def embed(params, input_ids):
    x = (params["word_emb"][input_ids]
         + params["pos_emb"][None]
         + params["type_emb"][None])
    return _layer_norm(x, params["emb_lng"], params["emb_lnb"])


def bert_crf_loss(params, input_ids, attention_mask, labels):
    # dropout(0.1) == identity (deterministic)
    x = embed(params, input_ids)
    maskf = attention_mask.astype(jnp.float32)
    attn_bias = ((1.0 - maskf) * -1e9)[:, None, :]            # (B, 1, S)
    tags_col = labels.astype(jnp.int32)[:, :, None]           # (B, S, 1)
    maskf_col = maskf[:, :, None]                             # (B, S, 1)
    nll = bert_crf_pallas(x, attn_bias, tags_col, maskf_col,
                          attention_mask.astype(jnp.int32), params)
    # torchcrf default reduction='sum' -> loss already scalar; .mean() is a no-op
    return jnp.sum(nll)


# ===================== pure-JAX reference (for checking) =================
def encoder_layer_ref(x, attn_bias, lp):
    qkv = x @ lp["wqkv"] + lp["bqkv"]
    q, k, v = qkv[..., :H], qkv[..., H:2 * H], qkv[..., 2 * H:]
    q = q.reshape(B, S, NUM_HEADS, HEAD_DIM)
    k = k.reshape(B, S, NUM_HEADS, HEAD_DIM)
    v = v.reshape(B, S, NUM_HEADS, HEAD_DIM)
    s = jnp.einsum("bqhd,bkhd->bhqk", q, k) / math.sqrt(HEAD_DIM)
    s = s + attn_bias[:, :, None, :]
    p = jax.nn.softmax(s, axis=-1)
    ctx = jnp.einsum("bhqk,bkhd->bqhd", p, v).reshape(B, S, H)
    attn = ctx @ lp["wo"] + lp["bo"]
    h1 = _layer_norm(x + attn, lp["ln1g"], lp["ln1b"])
    f = jax.nn.gelu(h1 @ lp["w1"] + lp["b1"], approximate=True)
    f = f @ lp["w2"] + lp["b2"]
    return _layer_norm(h1 + f, lp["ln2g"], lp["ln2b"])


def crf_nll_ref(em, tags, mask, start, end, trans):
    maskf = mask.astype(jnp.float32)
    bidx = jnp.arange(B)
    score = start[0, tags[:, 0]] + em[bidx, 0, tags[:, 0]]
    for t in range(1, S):
        sc = trans[tags[:, t - 1], tags[:, t]] + em[bidx, t, tags[:, t]]
        score = score + sc * maskf[:, t]
    seq_end = jnp.sum(mask, axis=1).astype(jnp.int32) - 1
    score = score + end[0, tags[bidx, seq_end]]
    alpha = start + em[:, 0]
    for t in range(1, S):
        na = logsumexp(alpha[:, :, None] + trans[None], axis=1) + em[:, t]
        alpha = jnp.where(maskf[:, t:t + 1] > 0, na, alpha)
    log_z = logsumexp(alpha + end, axis=1)
    return log_z - score


def bert_crf_loss_ref(params, input_ids, attention_mask, labels):
    x = embed(params, input_ids)
    maskf = attention_mask.astype(jnp.float32)
    attn_bias = ((1.0 - maskf) * -1e9)[:, None, :]
    for l in range(NUM_LAYERS):
        lp = {k: v[l] for k, v in params["layers"].items()}
        x = encoder_layer_ref(x, attn_bias, lp)
    em = x @ params["wc"] + params["bc"]
    nll = crf_nll_ref(em, labels, attention_mask,
                      params["start"], params["end"], params["trans"])
    return jnp.sum(nll)


# ============================== init =====================================
def init_params(key):
    keys = iter(jax.random.split(key, 32))

    def nrm(shape, scale=0.02):
        return (scale * jax.random.normal(next(keys), shape)).astype(jnp.float32)

    def uni(shape):
        return jax.random.uniform(next(keys), shape, minval=-0.1,
                                  maxval=0.1).astype(jnp.float32)

    p = {
        "word_emb": nrm((V, H)),
        "pos_emb": nrm((S, H)),
        "type_emb": nrm((1, H)),
        "emb_lng": jnp.ones((1, H), jnp.float32),
        "emb_lnb": jnp.zeros((1, H), jnp.float32),
        "wc": nrm((H, NUM_LABELS)),
        "bc": jnp.zeros((1, NUM_LABELS), jnp.float32),
        "start": uni((1, NUM_LABELS)),
        "end": uni((1, NUM_LABELS)),
        "trans": uni((NUM_LABELS, NUM_LABELS)),
        "layers": {   # stacked per-layer parameters, leading dim = NUM_LAYERS
            "wqkv": nrm((NUM_LAYERS, H, 3 * H)),
            "bqkv": jnp.zeros((NUM_LAYERS, 1, 3 * H), jnp.float32),
            "wo": nrm((NUM_LAYERS, H, H)),
            "bo": jnp.zeros((NUM_LAYERS, 1, H), jnp.float32),
            "ln1g": jnp.ones((NUM_LAYERS, 1, H), jnp.float32),
            "ln1b": jnp.zeros((NUM_LAYERS, 1, H), jnp.float32),
            "w1": nrm((NUM_LAYERS, H, FFN)),
            "b1": jnp.zeros((NUM_LAYERS, 1, FFN), jnp.float32),
            "w2": nrm((NUM_LAYERS, FFN, H)),
            "b2": jnp.zeros((NUM_LAYERS, 1, H), jnp.float32),
            "ln2g": jnp.ones((NUM_LAYERS, 1, H), jnp.float32),
            "ln2b": jnp.zeros((NUM_LAYERS, 1, H), jnp.float32),
        },
    }
    return p


if __name__ == "__main__":
    key = jax.random.PRNGKey(0)
    kp, ki, kl = jax.random.split(key, 3)
    params = init_params(kp)

    input_ids = jax.random.randint(ki, (B, S), 0, V, dtype=jnp.int32)
    labels = jax.random.randint(kl, (B, S), 0, NUM_LABELS, dtype=jnp.int32)
    lengths = jnp.array([S, S - 2], dtype=jnp.int32)
    attention_mask = (jnp.arange(S)[None, :] < lengths[:, None]).astype(jnp.int32)

    loss = jax.jit(bert_crf_loss)(params, input_ids, attention_mask, labels)
    loss = jax.block_until_ready(loss)

    loss_ref = bert_crf_loss_ref(params, input_ids, attention_mask, labels)
    np.testing.assert_allclose(np.asarray(loss), np.asarray(loss_ref),
                               rtol=2e-2, atol=2e-2)
    print("KERNEL_OK")
</pallas_src>

<mosaic_0001>
module attributes {stable_mosaic.version = 11 : i64} {
  func.func @bert_crf_fused_kernel(%arg0: i32, %arg1: memref<2x8xi32, #tpu.memory_space<smem>>, %arg2: memref<1x8x32xf32, #tpu.memory_space<vmem>>, %arg3: memref<1x1x8xf32, #tpu.memory_space<vmem>>, %arg4: memref<1x8x1xi32, #tpu.memory_space<vmem>>, %arg5: memref<1x8x1xf32, #tpu.memory_space<vmem>>, %arg6: memref<2x32x96xf32, #tpu.memory_space<vmem>>, %arg7: memref<2x1x96xf32, #tpu.memory_space<vmem>>, %arg8: memref<2x32x32xf32, #tpu.memory_space<vmem>>, %arg9: memref<2x1x32xf32, #tpu.memory_space<vmem>>, %arg10: memref<2x1x32xf32, #tpu.memory_space<vmem>>, %arg11: memref<2x1x32xf32, #tpu.memory_space<vmem>>, %arg12: memref<2x32x64xf32, #tpu.memory_space<vmem>>, %arg13: memref<2x1x64xf32, #tpu.memory_space<vmem>>, %arg14: memref<2x64x32xf32, #tpu.memory_space<vmem>>, %arg15: memref<2x1x32xf32, #tpu.memory_space<vmem>>, %arg16: memref<2x1x32xf32, #tpu.memory_space<vmem>>, %arg17: memref<2x1x32xf32, #tpu.memory_space<vmem>>, %arg18: memref<32x5xf32, #tpu.memory_space<vmem>>, %arg19: memref<1x5xf32, #tpu.memory_space<vmem>>, %arg20: memref<1x5xf32, #tpu.memory_space<vmem>>, %arg21: memref<1x5xf32, #tpu.memory_space<vmem>>, %arg22: memref<5x5xf32, #tpu.memory_space<vmem>>, %arg23: memref<1x1x1xf32, #tpu.memory_space<vmem>>, %arg24: memref<8x5xf32, #tpu.memory_space<vmem>>) attributes {dimension_semantics = [#tpu.dimension_semantics<parallel>], iteration_bounds = array<i64: 2>, scalar_prefetch = 1 : i64, scratch_operands = 1 : i64, tpu.core_type = #tpu.core_type<tc>, window_params = [{transform_indices = @transform_0, window_bounds = array<i64: 1, 8, 32>}, {transform_indices = @transform_1, window_bounds = array<i64: 1, 1, 8>}, {transform_indices = @transform_2, window_bounds = array<i64: 1, 8, 1>}, {transform_indices = @transform_3, window_bounds = array<i64: 1, 8, 1>}, {pipeline_mode = #tpu.pipeline_mode<synchronous>, transform_indices = @transform_4, window_bounds = array<i64: 2, 32, 96>}, {pipeline_mode = #tpu.pipeline_mode<synchronous>, transform_indices = @transform_5, window_bounds = array<i64: 2, 1, 96>}, {pipeline_mode = #tpu.pipeline_mode<synchronous>, transform_indices = @transform_6, window_bounds = array<i64: 2, 32, 32>}, {pipeline_mode = #tpu.pipeline_mode<synchronous>, transform_indices = @transform_7, window_bounds = array<i64: 2, 1, 32>}, {pipeline_mode = #tpu.pipeline_mode<synchronous>, transform_indices = @transform_8, window_bounds = array<i64: 2, 1, 32>}, {pipeline_mode = #tpu.pipeline_mode<synchronous>, transform_indices = @transform_9, window_bounds = array<i64: 2, 1, 32>}, {pipeline_mode = #tpu.pipeline_mode<synchronous>, transform_indices = @transform_10, window_bounds = array<i64: 2, 32, 64>}, {pipeline_mode = #tpu.pipeline_mode<synchronous>, transform_indices = @transform_11, window_bounds = array<i64: 2, 1, 64>}, {pipeline_mode = #tpu.pipeline_mode<synchronous>, transform_indices = @transform_12, window_bounds = array<i64: 2, 64, 32>}, {pipeline_mode = #tpu.pipeline_mode<synchronous>, transform_indices = @transform_13, window_bounds = array<i64: 2, 1, 32>}, {pipeline_mode = #tpu.pipeline_mode<synchronous>, transform_indices = @transform_14, window_bounds = array<i64: 2, 1, 32>}, {pipeline_mode = #tpu.pipeline_mode<synchronous>, transform_indices = @transform_15, window_bounds = array<i64: 2, 1, 32>}, {pipeline_mode = #tpu.pipeline_mode<synchronous>, transform_indices = @transform_16, window_bounds = array<i64: 32, 5>}, {pipeline_mode = #tpu.pipeline_mode<synchronous>, transform_indices = @transform_17, window_bounds = array<i64: 1, 5>}, {pipeline_mode = #tpu.pipeline_mode<synchronous>, transform_indices = @transform_18, window_bounds = array<i64: 1, 5>}, {pipeline_mode = #tpu.pipeline_mode<synchronous>, transform_indices = @transform_19, window_bounds = array<i64: 1, 5>}, {pipeline_mode = #tpu.pipeline_mode<synchronous>, transform_indices = @transform_20, window_bounds = array<i64: 5, 5>}, {transform_indices = @transform_21, window_bounds = array<i64: 1, 1, 1>}]} {
    %c0 = arith.constant 0 : index
    %c0_0 = arith.constant 0 : index
    %c0_1 = arith.constant 0 : index
    %0 = vector.load %arg2[%c0, %c0_0, %c0_1] : memref<1x8x32xf32, #tpu.memory_space<vmem>>, vector<1x8x32xf32>
    %1 = vector.shape_cast %0 : vector<1x8x32xf32> to vector<8x32xf32>
    %c0_2 = arith.constant 0 : index
    %c0_3 = arith.constant 0 : index
    %c0_4 = arith.constant 0 : index
    %2 = vector.load %arg3[%c0_2, %c0_3, %c0_4] : memref<1x1x8xf32, #tpu.memory_space<vmem>>, vector<1x1x8xf32>
    %3 = vector.shape_cast %2 : vector<1x1x8xf32> to vector<1x8xf32>
    %c0_5 = arith.constant 0 : index
    %c0_6 = arith.constant 0 : index
    %c0_7 = arith.constant 0 : index
    %4 = vector.load %arg6[%c0_5, %c0_6, %c0_7] : memref<2x32x96xf32, #tpu.memory_space<vmem>>, vector<1x32x96xf32>
    %5 = vector.shape_cast %4 : vector<1x32x96xf32> to vector<32x96xf32>
    %cst = arith.constant dense<0.000000e+00> : vector<8x96xf32>
    %6 = tpu.matmul %1, %5, %cst {dimension_numbers = #tpu.dot_dimension_numbers<[1], [0], [0], [1], [0, 0, 1, 1], [], []>} : vector<8x32xf32>, vector<32x96xf32>, vector<8x96xf32> -> vector<8x96xf32>
    %c0_8 = arith.constant 0 : index
    %c0_9 = arith.constant 0 : index
    %c0_10 = arith.constant 0 : index
    %7 = vector.load %arg7[%c0_8, %c0_9, %c0_10] : memref<2x1x96xf32, #tpu.memory_space<vmem>>, vector<1x1x96xf32>
    %8 = vector.shape_cast %7 : vector<1x1x96xf32> to vector<1x96xf32>
    %9 = vector.broadcast %8 : vector<1x96xf32> to vector<8x96xf32>
    %10 = arith.addf %6, %9 : vector<8x96xf32>
    %11 = vector.extract_strided_slice %10 {offsets = [0, 0], sizes = [8, 8], strides = [1, 1]} : vector<8x96xf32> to vector<8x8xf32>
    %12 = vector.extract_strided_slice %10 {offsets = [0, 32], sizes = [8, 8], strides = [1, 1]} : vector<8x96xf32> to vector<8x8xf32>
    %13 = vector.extract_strided_slice %10 {offsets = [0, 64], sizes = [8, 8], strides = [1, 1]} : vector<8x96xf32> to vector<8x8xf32>
    %cst_11 = arith.constant dense<0.000000e+00> : vector<8x8xf32>
    %14 = tpu.matmul %11, %12, %cst_11 {dimension_numbers = #tpu.dot_dimension_numbers<[1], [1], [0], [0], [0, 0, 1, 0], [], []>} : vector<8x8xf32>, vector<8x8xf32>, vector<8x8xf32> -> vector<8x8xf32>
    %cst_12 = arith.constant 0.353553385 : f32
    %15 = vector.broadcast %cst_12 : f32 to vector<8x8xf32>
    %16 = arith.mulf %14, %15 : vector<8x8xf32>
    %17 = vector.broadcast %3 : vector<1x8xf32> to vector<8x8xf32>
    %18 = arith.addf %16, %17 : vector<8x8xf32>
    %cst_13 = arith.constant dense<0xFF800000> : vector<8xf32>
    %19 = vector.multi_reduction <maximumf>, %18, %cst_13 [1] : vector<8x8xf32> to vector<8xf32>
    %20 = vector.shape_cast %19 : vector<8xf32> to vector<8x1xf32>
    %21 = vector.broadcast %20 : vector<8x1xf32> to vector<8x8xf32>
    %22 = arith.subf %18, %21 : vector<8x8xf32>
    %23 = math.exp %22 : vector<8x8xf32>
    %cst_14 = arith.constant dense<0.000000e+00> : vector<8xf32>
    %24 = vector.multi_reduction <add>, %23, %cst_14 [1] : vector<8x8xf32> to vector<8xf32>
    %25 = vector.shape_cast %24 : vector<8xf32> to vector<8x1xf32>
    %26 = vector.broadcast %25 : vector<8x1xf32> to vector<8x8xf32>
    %27 = arith.divf %23, %26 : vector<8x8xf32>
    %cst_15 = arith.constant dense<0.000000e+00> : vector<8x8xf32>
    %28 = tpu.matmul %27, %13, %cst_15 {dimension_numbers = #tpu.dot_dimension_numbers<[1], [0], [0], [1], [0, 0, 1, 1], [], []>} : vector<8x8xf32>, vector<8x8xf32>, vector<8x8xf32> -> vector<8x8xf32>
    %29 = vector.extract_strided_slice %10 {offsets = [0, 8], sizes = [8, 8], strides = [1, 1]} : vector<8x96xf32> to vector<8x8xf32>
    %30 = vector.extract_strided_slice %10 {offsets = [0, 40], sizes = [8, 8], strides = [1, 1]} : vector<8x96xf32> to vector<8x8xf32>
    %31 = vector.extract_strided_slice %10 {offsets = [0, 72], sizes = [8, 8], strides = [1, 1]} : vector<8x96xf32> to vector<8x8xf32>
    %cst_16 = arith.constant dense<0.000000e+00> : vector<8x8xf32>
    %32 = tpu.matmul %29, %30, %cst_16 {dimension_numbers = #tpu.dot_dimension_numbers<[1], [1], [0], [0], [0, 0, 1, 0], [], []>} : vector<8x8xf32>, vector<8x8xf32>, vector<8x8xf32> -> vector<8x8xf32>
    %cst_17 = arith.constant 0.353553385 : f32
    %33 = vector.broadcast %cst_17 : f32 to vector<8x8xf32>
    %34 = arith.mulf %32, %33 : vector<8x8xf32>
    %35 = vector.broadcast %3 : vector<1x8xf32> to vector<8x8xf32>
    %36 = arith.addf %34, %35 : vector<8x8xf32>
    %cst_18 = arith.constant dense<0xFF800000> : vector<8xf32>
    %37 = vector.multi_reduction <maximumf>, %36, %cst_18 [1] : vector<8x8xf32> to vector<8xf32>
    %38 = vector.shape_cast %37 : vector<8xf32> to vector<8x1xf32>
    %39 = vector.broadcast %38 : vector<8x1xf32> to vector<8x8xf32>
    %40 = arith.subf %36, %39 : vector<8x8xf32>
    %41 = math.exp %40 : vector<8x8xf32>
    %cst_19 = arith.constant dense<0.000000e+00> : vector<8xf32>
    %42 = vector.multi_reduction <add>, %41, %cst_19 [1] : vector<8x8xf32> to vector<8xf32>
    %43 = vector.shape_cast %42 : vector<8xf32> to vector<8x1xf32>
    %44 = vector.broadcast %43 : vector<8x1xf32> to vector<8x8xf32>
    %45 = arith.divf %41, %44 : vector<8x8xf32>
    %cst_20 = arith.constant dense<0.000000e+00> : vector<8x8xf32>
    %46 = tpu.matmul %45, %31, %cst_20 {dimension_numbers = #tpu.dot_dimension_numbers<[1], [0], [0], [1], [0, 0, 1, 1], [], []>} : vector<8x8xf32>, vector<8x8xf32>, vector<8x8xf32> -> vector<8x8xf32>
    %47 = vector.extract_strided_slice %10 {offsets = [0, 16], sizes = [8, 8], strides = [1, 1]} : vector<8x96xf32> to vector<8x8xf32>
    %48 = vector.extract_strided_slice %10 {offsets = [0, 48], sizes = [8, 8], strides = [1, 1]} : vector<8x96xf32> to vector<8x8xf32>
    %49 = vector.extract_strided_slice %10 {offsets = [0, 80], sizes = [8, 8], strides = [1, 1]} : vector<8x96xf32> to vector<8x8xf32>
    %cst_21 = arith.constant dense<0.000000e+00> : vector<8x8xf32>
    %50 = tpu.matmul %47, %48, %cst_21 {dimension_numbers = #tpu.dot_dimension_numbers<[1], [1], [0], [0], [0, 0, 1, 0], [], []>} : vector<8x8xf32>, vector<8x8xf32>, vector<8x8xf32> -> vector<8x8xf32>
    %cst_22 = arith.constant 0.353553385 : f32
    %51 = vector.broadcast %cst_22 : f32 to vector<8x8xf32>
    %52 = arith.mulf %50, %51 : vector<8x8xf32>
    %53 = vector.broadcast %3 : vector<1x8xf32> to vector<8x8xf32>
    %54 = arith.addf %52, %53 : vector<8x8xf32>
    %cst_23 = arith.constant dense<0xFF800000> : vector<8xf32>
    %55 = vector.multi_reduction <maximumf>, %54, %cst_23 [1] : vector<8x8xf32> to vector<8xf32>
    %56 = vector.shape_cast %55 : vector<8xf32> to vector<8x1xf32>
    %57 = vector.broadcast %56 : vector<8x1xf32> to vector<8x8xf32>
    %58 = arith.subf %54, %57 : vector<8x8xf32>
    %59 = math.exp %58 : vector<8x8xf32>
    %cst_24 = arith.constant dense<0.000000e+00> : vector<8xf32>
    %60 = vector.multi_reduction <add>, %59, %cst_24 [1] : vector<8x8xf32> to vector<8xf32>
    %61 = vector.shape_cast %60 : vector<8xf32> to vector<8x1xf32>
    %62 = vector.broadcast %61 : vector<8x1xf32> to vector<8x8xf32>
    %63 = arith.divf %59, %62 : vector<8x8xf32>
    %cst_25 = arith.constant dense<0.000000e+00> : vector<8x8xf32>
    %64 = tpu.matmul %63, %49, %cst_25 {dimension_numbers = #tpu.dot_dimension_numbers<[1], [0], [0], [1], [0, 0, 1, 1], [], []>} : vector<8x8xf32>, vector<8x8xf32>, vector<8x8xf32> -> vector<8x8xf32>
    %65 = vector.extract_strided_slice %10 {offsets = [0, 24], sizes = [8, 8], strides = [1, 1]} : vector<8x96xf32> to vector<8x8xf32>
    %66 = vector.extract_strided_slice %10 {offsets = [0, 56], sizes = [8, 8], strides = [1, 1]} : vector<8x96xf32> to vector<8x8xf32>
    %67 = vector.extract_strided_slice %10 {offsets = [0, 88], sizes = [8, 8], strides = [1, 1]} : vector<8x96xf32> to vector<8x8xf32>
    %cst_26 = arith.constant dense<0.000000e+00> : vector<8x8xf32>
    %68 = tpu.matmul %65, %66, %cst_26 {dimension_numbers = #tpu.dot_dimension_numbers<[1], [1], [0], [0], [0, 0, 1, 0], [], []>} : vector<8x8xf32>, vector<8x8xf32>, vector<8x8xf32> -> vector<8x8xf32>
    %cst_27 = arith.constant 0.353553385 : f32
    %69 = vector.broadcast %cst_27 : f32 to vector<8x8xf32>
    %70 = arith.mulf %68, %69 : vector<8x8xf32>
    %71 = vector.broadcast %3 : vector<1x8xf32> to vector<8x8xf32>
    %72 = arith.addf %70, %71 : vector<8x8xf32>
    %cst_28 = arith.constant dense<0xFF800000> : vector<8xf32>
    %73 = vector.multi_reduction <maximumf>, %72, %cst_28 [1] : vector<8x8xf32> to vector<8xf32>
    %74 = vector.shape_cast %73 : vector<8xf32> to vector<8x1xf32>
    %75 = vector.broadcast %74 : vector<8x1xf32> to vector<8x8xf32>
    %76 = arith.subf %72, %75 : vector<8x8xf32>
    %77 = math.exp %76 : vector<8x8xf32>
    %cst_29 = arith.constant dense<0.000000e+00> : vector<8xf32>
    %78 = vector.multi_reduction <add>, %77, %cst_29 [1] : vector<8x8xf32> to vector<8xf32>
    %79 = vector.shape_cast %78 : vector<8xf32> to vector<8x1xf32>
    %80 = vector.broadcast %79 : vector<8x1xf32> to vector<8x8xf32>
    %81 = arith.divf %77, %80 : vector<8x8xf32>
    %cst_30 = arith.constant dense<0.000000e+00> : vector<8x8xf32>
    %82 = tpu.matmul %81, %67, %cst_30 {dimension_numbers = #tpu.dot_dimension_numbers<[1], [0], [0], [1], [0, 0, 1, 1], [], []>} : vector<8x8xf32>, vector<8x8xf32>, vector<8x8xf32> -> vector<8x8xf32>
    %83 = tpu.concatenate %28, %46, %64, %82 in 1 : vector<8x8xf32>, vector<8x8xf32>, vector<8x8xf32>, vector<8x8xf32> -> vector<8x32xf32>
    %c0_31 = arith.constant 0 : index
    %c0_32 = arith.constant 0 : index
    %c0_33 = arith.constant 0 : index
    %84 = vector.load %arg8[%c0_31, %c0_32, %c0_33] : memref<2x32x32xf32, #tpu.memory_space<vmem>>, vector<1x32x32xf32>
    %85 = vector.shape_cast %84 : vector<1x32x32xf32> to vector<32x32xf32>
    %cst_34 = arith.constant dense<0.000000e+00> : vector<8x32xf32>
    %86 = tpu.matmul %83, %85, %cst_34 {dimension_numbers = #tpu.dot_dimension_numbers<[1], [0], [0], [1], [0, 0, 1, 1], [], []>} : vector<8x32xf32>, vector<32x32xf32>, vector<8x32xf32> -> vector<8x32xf32>
    %c0_35 = arith.constant 0 : index
    %c0_36 = arith.constant 0 : index
    %c0_37 = arith.constant 0 : index
    %87 = vector.load %arg9[%c0_35, %c0_36, %c0_37] : memref<2x1x32xf32, #tpu.memory_space<vmem>>, vector<1x1x32xf32>
    %88 = vector.shape_cast %87 : vector<1x1x32xf32> to vector<1x32xf32>
    %89 = vector.broadcast %88 : vector<1x32xf32> to vector<8x32xf32>
    %90 = arith.addf %86, %89 : vector<8x32xf32>
    %91 = arith.addf %1, %90 : vector<8x32xf32>
    %c0_38 = arith.constant 0 : index
    %c0_39 = arith.constant 0 : index
    %c0_40 = arith.constant 0 : index
    %92 = vector.load %arg10[%c0_38, %c0_39, %c0_40] : memref<2x1x32xf32, #tpu.memory_space<vmem>>, vector<1x1x32xf32>
    %93 = vector.shape_cast %92 : vector<1x1x32xf32> to vector<1x32xf32>
    %c0_41 = arith.constant 0 : index
    %c0_42 = arith.constant 0 : index
    %c0_43 = arith.constant 0 : index
    %94 = vector.load %arg11[%c0_41, %c0_42, %c0_43] : memref<2x1x32xf32, #tpu.memory_space<vmem>>, vector<1x1x32xf32>
    %95 = vector.shape_cast %94 : vector<1x1x32xf32> to vector<1x32xf32>
    %cst_44 = arith.constant dense<0.000000e+00> : vector<8xf32>
    %96 = vector.multi_reduction <add>, %91, %cst_44 [1] : vector<8x32xf32> to vector<8xf32>
    %97 = vector.shape_cast %96 : vector<8xf32> to vector<8x1xf32>
    %cst_45 = arith.constant 3.200000e+01 : f32
    %98 = vector.broadcast %cst_45 : f32 to vector<8x1xf32>
    %99 = arith.divf %97, %98 : vector<8x1xf32>
    %100 = vector.broadcast %99 : vector<8x1xf32> to vector<8x32xf32>
    %101 = arith.subf %91, %100 : vector<8x32xf32>
    %102 = arith.mulf %101, %101 : vector<8x32xf32>
    %cst_46 = arith.constant dense<0.000000e+00> : vector<8xf32>
    %103 = vector.multi_reduction <add>, %102, %cst_46 [1] : vector<8x32xf32> to vector<8xf32>
    %104 = vector.shape_cast %103 : vector<8xf32> to vector<8x1xf32>
    %cst_47 = arith.constant 3.200000e+01 : f32
    %105 = vector.broadcast %cst_47 : f32 to vector<8x1xf32>
    %106 = arith.divf %104, %105 : vector<8x1xf32>
    %107 = vector.broadcast %99 : vector<8x1xf32> to vector<8x32xf32>
    %108 = arith.subf %91, %107 : vector<8x32xf32>
    %cst_48 = arith.constant 9.99999996E-13 : f32
    %109 = vector.broadcast %cst_48 : f32 to vector<8x1xf32>
    %110 = arith.addf %106, %109 : vector<8x1xf32>
    %111 = math.rsqrt %110 : vector<8x1xf32>
    %112 = vector.broadcast %111 : vector<8x1xf32> to vector<8x32xf32>
    %113 = arith.mulf %108, %112 : vector<8x32xf32>
    %114 = vector.broadcast %93 : vector<1x32xf32> to vector<8x32xf32>
    %115 = arith.mulf %113, %114 : vector<8x32xf32>
    %116 = vector.broadcast %95 : vector<1x32xf32> to vector<8x32xf32>
    %117 = arith.addf %115, %116 : vector<8x32xf32>
    %c0_49 = arith.constant 0 : index
    %c0_50 = arith.constant 0 : index
    %c0_51 = arith.constant 0 : index
    %118 = vector.load %arg12[%c0_49, %c0_50, %c0_51] : memref<2x32x64xf32, #tpu.memory_space<vmem>>, vector<1x32x64xf32>
    %119 = vector.shape_cast %118 : vector<1x32x64xf32> to vector<32x64xf32>
    %cst_52 = arith.constant dense<0.000000e+00> : vector<8x64xf32>
    %120 = tpu.matmul %117, %119, %cst_52 {dimension_numbers = #tpu.dot_dimension_numbers<[1], [0], [0], [1], [0, 0, 1, 1], [], []>} : vector<8x32xf32>, vector<32x64xf32>, vector<8x64xf32> -> vector<8x64xf32>
    %c0_53 = arith.constant 0 : index
    %c0_54 = arith.constant 0 : index
    %c0_55 = arith.constant 0 : index
    %121 = vector.load %arg13[%c0_53, %c0_54, %c0_55] : memref<2x1x64xf32, #tpu.memory_space<vmem>>, vector<1x1x64xf32>
    %122 = vector.shape_cast %121 : vector<1x1x64xf32> to vector<1x64xf32>
    %123 = vector.broadcast %122 : vector<1x64xf32> to vector<8x64xf32>
    %124 = arith.addf %120, %123 : vector<8x64xf32>
    %125 = arith.mulf %124, %124 : vector<8x64xf32>
    %126 = arith.mulf %124, %125 : vector<8x64xf32>
    %cst_56 = arith.constant 4.471500e-02 : f32
    %127 = vector.broadcast %cst_56 : f32 to vector<8x64xf32>
    %128 = arith.mulf %127, %126 : vector<8x64xf32>
    %129 = arith.addf %124, %128 : vector<8x64xf32>
    %cst_57 = arith.constant 0.797884583 : f32
    %130 = vector.broadcast %cst_57 : f32 to vector<8x64xf32>
    %131 = arith.mulf %130, %129 : vector<8x64xf32>
    %132 = math.tanh %131 : vector<8x64xf32>
    %cst_58 = arith.constant 1.000000e+00 : f32
    %133 = vector.broadcast %cst_58 : f32 to vector<8x64xf32>
    %134 = arith.addf %133, %132 : vector<8x64xf32>
    %cst_59 = arith.constant 5.000000e-01 : f32
    %135 = vector.broadcast %cst_59 : f32 to vector<8x64xf32>
    %136 = arith.mulf %135, %134 : vector<8x64xf32>
    %137 = arith.mulf %124, %136 : vector<8x64xf32>
    %c0_60 = arith.constant 0 : index
    %c0_61 = arith.constant 0 : index
    %c0_62 = arith.constant 0 : index
    %138 = vector.load %arg14[%c0_60, %c0_61, %c0_62] : memref<2x64x32xf32, #tpu.memory_space<vmem>>, vector<1x64x32xf32>
    %139 = vector.shape_cast %138 : vector<1x64x32xf32> to vector<64x32xf32>
    %cst_63 = arith.constant dense<0.000000e+00> : vector<8x32xf32>
    %140 = tpu.matmul %137, %139, %cst_63 {dimension_numbers = #tpu.dot_dimension_numbers<[1], [0], [0], [1], [0, 0, 1, 1], [], []>} : vector<8x64xf32>, vector<64x32xf32>, vector<8x32xf32> -> vector<8x32xf32>
    %c0_64 = arith.constant 0 : index
    %c0_65 = arith.constant 0 : index
    %c0_66 = arith.constant 0 : index
    %141 = vector.load %arg15[%c0_64, %c0_65, %c0_66] : memref<2x1x32xf32, #tpu.memory_space<vmem>>, vector<1x1x32xf32>
    %142 = vector.shape_cast %141 : vector<1x1x32xf32> to vector<1x32xf32>
    %143 = vector.broadcast %142 : vector<1x32xf32> to vector<8x32xf32>
    %144 = arith.addf %140, %143 : vector<8x32xf32>
    %145 = arith.addf %117, %144 : vector<8x32xf32>
    %c0_67 = arith.constant 0 : index
    %c0_68 = arith.constant 0 : index
    %c0_69 = arith.constant 0 : index
    %146 = vector.load %arg16[%c0_67, %c0_68, %c0_69] : memref<2x1x32xf32, #tpu.memory_space<vmem>>, vector<1x1x32xf32>
    %147 = vector.shape_cast %146 : vector<1x1x32xf32> to vector<1x32xf32>
    %c0_70 = arith.constant 0 : index
    %c0_71 = arith.constant 0 : index
    %c0_72 = arith.constant 0 : index
    %148 = vector.load %arg17[%c0_70, %c0_71, %c0_72] : memref<2x1x32xf32, #tpu.memory_space<vmem>>, vector<1x1x32xf32>
    %149 = vector.shape_cast %148 : vector<1x1x32xf32> to vector<1x32xf32>
    %cst_73 = arith.constant dense<0.000000e+00> : vector<8xf32>
    %150 = vector.multi_reduction <add>, %145, %cst_73 [1] : vector<8x32xf32> to vector<8xf32>
    %151 = vector.shape_cast %150 : vector<8xf32> to vector<8x1xf32>
    %cst_74 = arith.constant 3.200000e+01 : f32
    %152 = vector.broadcast %cst_74 : f32 to vector<8x1xf32>
    %153 = arith.divf %151, %152 : vector<8x1xf32>
    %154 = vector.broadcast %153 : vector<8x1xf32> to vector<8x32xf32>
    %155 = arith.subf %145, %154 : vector<8x32xf32>
    %156 = arith.mulf %155, %155 : vector<8x32xf32>
    %cst_75 = arith.constant dense<0.000000e+00> : vector<8xf32>
    %157 = vector.multi_reduction <add>, %156, %cst_75 [1] : vector<8x32xf32> to vector<8xf32>
    %158 = vector.shape_cast %157 : vector<8xf32> to vector<8x1xf32>
    %cst_76 = arith.constant 3.200000e+01 : f32
    %159 = vector.broadcast %cst_76 : f32 to vector<8x1xf32>
    %160 = arith.divf %158, %159 : vector<8x1xf32>
    %161 = vector.broadcast %153 : vector<8x1xf32> to vector<8x32xf32>
    %162 = arith.subf %145, %161 : vector<8x32xf32>
    %cst_77 = arith.constant 9.99999996E-13 : f32
    %163 = vector.broadcast %cst_77 : f32 to vector<8x1xf32>
    %164 = arith.addf %160, %163 : vector<8x1xf32>
    %165 = math.rsqrt %164 : vector<8x1xf32>
    %166 = vector.broadcast %165 : vector<8x1xf32> to vector<8x32xf32>
    %167 = arith.mulf %162, %166 : vector<8x32xf32>
    %168 = vector.broadcast %147 : vector<1x32xf32> to vector<8x32xf32>
    %169 = arith.mulf %167, %168 : vector<8x32xf32>
    %170 = vector.broadcast %149 : vector<1x32xf32> to vector<8x32xf32>
    %171 = arith.addf %169, %170 : vector<8x32xf32>
    %c1 = arith.constant 1 : index
    %c0_78 = arith.constant 0 : index
    %c0_79 = arith.constant 0 : index
    %172 = vector.load %arg6[%c1, %c0_78, %c0_79] : memref<2x32x96xf32, #tpu.memory_space<vmem>>, vector<1x32x96xf32>
    %173 = vector.shape_cast %172 : vector<1x32x96xf32> to vector<32x96xf32>
    %cst_80 = arith.constant dense<0.000000e+00> : vector<8x96xf32>
    %174 = tpu.matmul %171, %173, %cst_80 {dimension_numbers = #tpu.dot_dimension_numbers<[1], [0], [0], [1], [0, 0, 1, 1], [], []>} : vector<8x32xf32>, vector<32x96xf32>, vector<8x96xf32> -> vector<8x96xf32>
    %c1_81 = arith.constant 1 : index
    %c0_82 = arith.constant 0 : index
    %c0_83 = arith.constant 0 : index
    %175 = vector.load %arg7[%c1_81, %c0_82, %c0_83] : memref<2x1x96xf32, #tpu.memory_space<vmem>>, vector<1x1x96xf32>
    %176 = vector.shape_cast %175 : vector<1x1x96xf32> to vector<1x96xf32>
    %177 = vector.broadcast %176 : vector<1x96xf32> to vector<8x96xf32>
    %178 = arith.addf %174, %177 : vector<8x96xf32>
    %179 = vector.extract_strided_slice %178 {offsets = [0, 0], sizes = [8, 8], strides = [1, 1]} : vector<8x96xf32> to vector<8x8xf32>
    %180 = vector.extract_strided_slice %178 {offsets = [0, 32], sizes = [8, 8], strides = [1, 1]} : vector<8x96xf32> to vector<8x8xf32>
    %181 = vector.extract_strided_slice %178 {offsets = [0, 64], sizes = [8, 8], strides = [1, 1]} : vector<8x96xf32> to vector<8x8xf32>
    %cst_84 = arith.constant dense<0.000000e+00> : vector<8x8xf32>
    %182 = tpu.matmul %179, %180, %cst_84 {dimension_numbers = #tpu.dot_dimension_numbers<[1], [1], [0], [0], [0, 0, 1, 0], [], []>} : vector<8x8xf32>, vector<8x8xf32>, vector<8x8xf32> -> vector<8x8xf32>
    %cst_85 = arith.constant 0.353553385 : f32
    %183 = vector.broadcast %cst_85 : f32 to vector<8x8xf32>
    %184 = arith.mulf %182, %183 : vector<8x8xf32>
    %185 = vector.broadcast %3 : vector<1x8xf32> to vector<8x8xf32>
    %186 = arith.addf %184, %185 : vector<8x8xf32>
    %cst_86 = arith.constant dense<0xFF800000> : vector<8xf32>
    %187 = vector.multi_reduction <maximumf>, %186, %cst_86 [1] : vector<8x8xf32> to vector<8xf32>
    %188 = vector.shape_cast %187 : vector<8xf32> to vector<8x1xf32>
    %189 = vector.broadcast %188 : vector<8x1xf32> to vector<8x8xf32>
    %190 = arith.subf %186, %189 : vector<8x8xf32>
    %191 = math.exp %190 : vector<8x8xf32>
    %cst_87 = arith.constant dense<0.000000e+00> : vector<8xf32>
    %192 = vector.multi_reduction <add>, %191, %cst_87 [1] : vector<8x8xf32> to vector<8xf32>
    %193 = vector.shape_cast %192 : vector<8xf32> to vector<8x1xf32>
    %194 = vector.broadcast %193 : vector<8x1xf32> to vector<8x8xf32>
    %195 = arith.divf %191, %194 : vector<8x8xf32>
    %cst_88 = arith.constant dense<0.000000e+00> : vector<8x8xf32>
    %196 = tpu.matmul %195, %181, %cst_88 {dimension_numbers = #tpu.dot_dimension_numbers<[1], [0], [0], [1], [0, 0, 1, 1], [], []>} : vector<8x8xf32>, vector<8x8xf32>, vector<8x8xf32> -> vector<8x8xf32>
    %197 = vector.extract_strided_slice %178 {offsets = [0, 8], sizes = [8, 8], strides = [1, 1]} : vector<8x96xf32> to vector<8x8xf32>
    %198 = vector.extract_strided_slice %178 {offsets = [0, 40], sizes = [8, 8], strides = [1, 1]} : vector<8x96xf32> to vector<8x8xf32>
    %199 = vector.extract_strided_slice %178 {offsets = [0, 72], sizes = [8, 8], strides = [1, 1]} : vector<8x96xf32> to vector<8x8xf32>
    %cst_89 = arith.constant dense<0.000000e+00> : vector<8x8xf32>
    %200 = tpu.matmul %197, %198, %cst_89 {dimension_numbers = #tpu.dot_dimension_numbers<[1], [1], [0], [0], [0, 0, 1, 0], [], []>} : vector<8x8xf32>, vector<8x8xf32>, vector<8x8xf32> -> vector<8x8xf32>
    %cst_90 = arith.constant 0.353553385 : f32
    %201 = vector.broadcast %cst_90 : f32 to vector<8x8xf32>
    %202 = arith.mulf %200, %201 : vector<8x8xf32>
    %203 = vector.broadcast %3 : vector<1x8xf32> to vector<8x8xf32>
    %204 = arith.addf %202, %203 : vector<8x8xf32>
    %cst_91 = arith.constant dense<0xFF800000> : vector<8xf32>
    %205 = vector.multi_reduction <maximumf>, %204, %cst_91 [1] : vector<8x8xf32> to vector<8xf32>
    %206 = vector.shape_cast %205 : vector<8xf32> to vector<8x1xf32>
    %207 = vector.broadcast %206 : vector<8x1xf32> to vector<8x8xf32>
    %208 = arith.subf %204, %207 : vector<8x8xf32>
    %209 = math.exp %208 : vector<8x8xf32>
    %cst_92 = arith.constant dense<0.000000e+00> : vector<8xf32>
    %210 = vector.multi_reduction <add>, %209, %cst_92 [1] : vector<8x8xf32> to vector<8xf32>
    %211 = vector.shape_cast %210 : vector<8xf32> to vector<8x1xf32>
    %212 = vector.broadcast %211 : vector<8x1xf32> to vector<8x8xf32>
    %213 = arith.divf %209, %212 : vector<8x8xf32>
    %cst_93 = arith.constant dense<0.000000e+00> : vector<8x8xf32>
    %214 = tpu.matmul %213, %199, %cst_93 {dimension_numbers = #tpu.dot_dimension_numbers<[1], [0], [0], [1], [0, 0, 1, 1], [], []>} : vector<8x8xf32>, vector<8x8xf32>, vector<8x8xf32> -> vector<8x8xf32>
    %215 = vector.extract_strided_slice %178 {offsets = [0, 16], sizes = [8, 8], strides = [1, 1]} : vector<8x96xf32> to vector<8x8xf32>
    %216 = vector.extract_strided_slice %178 {offsets = [0, 48], sizes = [8, 8], strides = [1, 1]} : vector<8x96xf32> to vector<8x8xf32>
    %217 = vector.extract_strided_slice %178 {offsets = [0, 80], sizes = [8, 8], strides = [1, 1]} : vector<8x96xf32> to vector<8x8xf32>
    %cst_94 = arith.constant dense<0.000000e+00> : vector<8x8xf32>
    %218 = tpu.matmul %215, %216, %cst_94 {dimension_numbers = #tpu.dot_dimension_numbers<[1], [1], [0], [0], [0, 0, 1, 0], [], []>} : vector<8x8xf32>, vector<8x8xf32>, vector<8x8xf32> -> vector<8x8xf32>
    %cst_95 = arith.constant 0.353553385 : f32
    %219 = vector.broadcast %cst_95 : f32 to vector<8x8xf32>
    %220 = arith.mulf %218, %219 : vector<8x8xf32>
    %221 = vector.broadcast %3 : vector<1x8xf32> to vector<8x8xf32>
    %222 = arith.addf %220, %221 : vector<8x8xf32>
    %cst_96 = arith.constant dense<0xFF800000> : vector<8xf32>
    %223 = vector.multi_reduction <maximumf>, %222, %cst_96 [1] : vector<8x8xf32> to vector<8xf32>
    %224 = vector.shape_cast %223 : vector<8xf32> to vector<8x1xf32>
    %225 = vector.broadcast %224 : vector<8x1xf32> to vector<8x8xf32>
    %226 = arith.subf %222, %225 : vector<8x8xf32>
    %227 = math.exp %226 : vector<8x8xf32>
    %cst_97 = arith.constant dense<0.000000e+00> : vector<8xf32>
    %228 = vector.multi_reduction <add>, %227, %cst_97 [1] : vector<8x8xf32> to vector<8xf32>
    %229 = vector.shape_cast %228 : vector<8xf32> to vector<8x1xf32>
    %230 = vector.broadcast %229 : vector<8x1xf32> to vector<8x8xf32>
    %231 = arith.divf %227, %230 : vector<8x8xf32>
    %cst_98 = arith.constant dense<0.000000e+00> : vector<8x8xf32>
    %232 = tpu.matmul %231, %217, %cst_98 {dimension_numbers = #tpu.dot_dimension_numbers<[1], [0], [0], [1], [0, 0, 1, 1], [], []>} : vector<8x8xf32>, vector<8x8xf32>, vector<8x8xf32> -> vector<8x8xf32>
    %233 = vector.extract_strided_slice %178 {offsets = [0, 24], sizes = [8, 8], strides = [1, 1]} : vector<8x96xf32> to vector<8x8xf32>
    %234 = vector.extract_strided_slice %178 {offsets = [0, 56], sizes = [8, 8], strides = [1, 1]} : vector<8x96xf32> to vector<8x8xf32>
    %235 = vector.extract_strided_slice %178 {offsets = [0, 88], sizes = [8, 8], strides = [1, 1]} : vector<8x96xf32> to vector<8x8xf32>
    %cst_99 = arith.constant dense<0.000000e+00> : vector<8x8xf32>
    %236 = tpu.matmul %233, %234, %cst_99 {dimension_numbers = #tpu.dot_dimension_numbers<[1], [1], [0], [0], [0, 0, 1, 0], [], []>} : vector<8x8xf32>, vector<8x8xf32>, vector<8x8xf32> -> vector<8x8xf32>
    %cst_100 = arith.constant 0.353553385 : f32
    %237 = vector.broadcast %cst_100 : f32 to vector<8x8xf32>
    %238 = arith.mulf %236, %237 : vector<8x8xf32>
    %239 = vector.broadcast %3 : vector<1x8xf32> to vector<8x8xf32>
    %240 = arith.addf %238, %239 : vector<8x8xf32>
    %cst_101 = arith.constant dense<0xFF800000> : vector<8xf32>
    %241 = vector.multi_reduction <maximumf>, %240, %cst_101 [1] : vector<8x8xf32> to vector<8xf32>
    %242 = vector.shape_cast %241 : vector<8xf32> to vector<8x1xf32>
    %243 = vector.broadcast %242 : vector<8x1xf32> to vector<8x8xf32>
    %244 = arith.subf %240, %243 : vector<8x8xf32>
    %245 = math.exp %244 : vector<8x8xf32>
    %cst_102 = arith.constant dense<0.000000e+00> : vector<8xf32>
    %246 = vector.multi_reduction <add>, %245, %cst_102 [1] : vector<8x8xf32> to vector<8xf32>
    %247 = vector.shape_cast %246 : vector<8xf32> to vector<8x1xf32>
    %248 = vector.broadcast %247 : vector<8x1xf32> to vector<8x8xf32>
    %249 = arith.divf %245, %248 : vector<8x8xf32>
    %cst_103 = arith.constant dense<0.000000e+00> : vector<8x8xf32>
    %250 = tpu.matmul %249, %235, %cst_103 {dimension_numbers = #tpu.dot_dimension_numbers<[1], [0], [0], [1], [0, 0, 1, 1], [], []>} : vector<8x8xf32>, vector<8x8xf32>, vector<8x8xf32> -> vector<8x8xf32>
    %251 = tpu.concatenate %196, %214, %232, %250 in 1 : vector<8x8xf32>, vector<8x8xf32>, vector<8x8xf32>, vector<8x8xf32> -> vector<8x32xf32>
    %c1_104 = arith.constant 1 : index
    %c0_105 = arith.constant 0 : index
    %c0_106 = arith.constant 0 : index
    %252 = vector.load %arg8[%c1_104, %c0_105, %c0_106] : memref<2x32x32xf32, #tpu.memory_space<vmem>>, vector<1x32x32xf32>
    %253 = vector.shape_cast %252 : vector<1x32x32xf32> to vector<32x32xf32>
    %cst_107 = arith.constant dense<0.000000e+00> : vector<8x32xf32>
    %254 = tpu.matmul %251, %253, %cst_107 {dimension_numbers = #tpu.dot_dimension_numbers<[1], [0], [0], [1], [0, 0, 1, 1], [], []>} : vector<8x32xf32>, vector<32x32xf32>, vector<8x32xf32> -> vector<8x32xf32>
    %c1_108 = arith.constant 1 : index
    %c0_109 = arith.constant 0 : index
    %c0_110 = arith.constant 0 : index
    %255 = vector.load %arg9[%c1_108, %c0_109, %c0_110] : memref<2x1x32xf32, #tpu.memory_space<vmem>>, vector<1x1x32xf32>
    %256 = vector.shape_cast %255 : vector<1x1x32xf32> to vector<1x32xf32>
    %257 = vector.broadcast %256 : vector<1x32xf32> to vector<8x32xf32>
    %258 = arith.addf %254, %257 : vector<8x32xf32>
    %259 = arith.addf %171, %258 : vector<8x32xf32>
    %c1_111 = arith.constant 1 : index
    %c0_112 = arith.constant 0 : index
    %c0_113 = arith.constant 0 : index
    %260 = vector.load %arg10[%c1_111, %c0_112, %c0_113] : memref<2x1x32xf32, #tpu.memory_space<vmem>>, vector<1x1x32xf32>
    %261 = vector.shape_cast %260 : vector<1x1x32xf32> to vector<1x32xf32>
    %c1_114 = arith.constant 1 : index
    %c0_115 = arith.constant 0 : index
    %c0_116 = arith.constant 0 : index
    %262 = vector.load %arg11[%c1_114, %c0_115, %c0_116] : memref<2x1x32xf32, #tpu.memory_space<vmem>>, vector<1x1x32xf32>
    %263 = vector.shape_cast %262 : vector<1x1x32xf32> to vector<1x32xf32>
    %cst_117 = arith.constant dense<0.000000e+00> : vector<8xf32>
    %264 = vector.multi_reduction <add>, %259, %cst_117 [1] : vector<8x32xf32> to vector<8xf32>
    %265 = vector.shape_cast %264 : vector<8xf32> to vector<8x1xf32>
    %cst_118 = arith.constant 3.200000e+01 : f32
    %266 = vector.broadcast %cst_118 : f32 to vector<8x1xf32>
    %267 = arith.divf %265, %266 : vector<8x1xf32>
    %268 = vector.broadcast %267 : vector<8x1xf32> to vector<8x32xf32>
    %269 = arith.subf %259, %268 : vector<8x32xf32>
    %270 = arith.mulf %269, %269 : vector<8x32xf32>
    %cst_119 = arith.constant dense<0.000000e+00> : vector<8xf32>
    %271 = vector.multi_reduction <add>, %270, %cst_119 [1] : vector<8x32xf32> to vector<8xf32>
    %272 = vector.shape_cast %271 : vector<8xf32> to vector<8x1xf32>
    %cst_120 = arith.constant 3.200000e+01 : f32
    %273 = vector.broadcast %cst_120 : f32 to vector<8x1xf32>
    %274 = arith.divf %272, %273 : vector<8x1xf32>
    %275 = vector.broadcast %267 : vector<8x1xf32> to vector<8x32xf32>
    %276 = arith.subf %259, %275 : vector<8x32xf32>
    %cst_121 = arith.constant 9.99999996E-13 : f32
    %277 = vector.broadcast %cst_121 : f32 to vector<8x1xf32>
    %278 = arith.addf %274, %277 : vector<8x1xf32>
    %279 = math.rsqrt %278 : vector<8x1xf32>
    %280 = vector.broadcast %279 : vector<8x1xf32> to vector<8x32xf32>
    %281 = arith.mulf %276, %280 : vector<8x32xf32>
    %282 = vector.broadcast %261 : vector<1x32xf32> to vector<8x32xf32>
    %283 = arith.mulf %281, %282 : vector<8x32xf32>
    %284 = vector.broadcast %263 : vector<1x32xf32> to vector<8x32xf32>
    %285 = arith.addf %283, %284 : vector<8x32xf32>
    %c1_122 = arith.constant 1 : index
    %c0_123 = arith.constant 0 : index
    %c0_124 = arith.constant 0 : index
    %286 = vector.load %arg12[%c1_122, %c0_123, %c0_124] : memref<2x32x64xf32, #tpu.memory_space<vmem>>, vector<1x32x64xf32>
    %287 = vector.shape_cast %286 : vector<1x32x64xf32> to vector<32x64xf32>
    %cst_125 = arith.constant dense<0.000000e+00> : vector<8x64xf32>
    %288 = tpu.matmul %285, %287, %cst_125 {dimension_numbers = #tpu.dot_dimension_numbers<[1], [0], [0], [1], [0, 0, 1, 1], [], []>} : vector<8x32xf32>, vector<32x64xf32>, vector<8x64xf32> -> vector<8x64xf32>
    %c1_126 = arith.constant 1 : index
    %c0_127 = arith.constant 0 : index
    %c0_128 = arith.constant 0 : index
    %289 = vector.load %arg13[%c1_126, %c0_127, %c0_128] : memref<2x1x64xf32, #tpu.memory_space<vmem>>, vector<1x1x64xf32>
    %290 = vector.shape_cast %289 : vector<1x1x64xf32> to vector<1x64xf32>
    %291 = vector.broadcast %290 : vector<1x64xf32> to vector<8x64xf32>
    %292 = arith.addf %288, %291 : vector<8x64xf32>
    %293 = arith.mulf %292, %292 : vector<8x64xf32>
    %294 = arith.mulf %292, %293 : vector<8x64xf32>
    %cst_129 = arith.constant 4.471500e-02 : f32
    %295 = vector.broadcast %cst_129 : f32 to vector<8x64xf32>
    %296 = arith.mulf %295, %294 : vector<8x64xf32>
    %297 = arith.addf %292, %296 : vector<8x64xf32>
    %cst_130 = arith.constant 0.797884583 : f32
    %298 = vector.broadcast %cst_130 : f32 to vector<8x64xf32>
    %299 = arith.mulf %298, %297 : vector<8x64xf32>
    %300 = math.tanh %299 : vector<8x64xf32>
    %cst_131 = arith.constant 1.000000e+00 : f32
    %301 = vector.broadcast %cst_131 : f32 to vector<8x64xf32>
    %302 = arith.addf %301, %300 : vector<8x64xf32>
    %cst_132 = arith.constant 5.000000e-01 : f32
    %303 = vector.broadcast %cst_132 : f32 to vector<8x64xf32>
    %304 = arith.mulf %303, %302 : vector<8x64xf32>
    %305 = arith.mulf %292, %304 : vector<8x64xf32>
    %c1_133 = arith.constant 1 : index
    %c0_134 = arith.constant 0 : index
    %c0_135 = arith.constant 0 : index
    %306 = vector.load %arg14[%c1_133, %c0_134, %c0_135] : memref<2x64x32xf32, #tpu.memory_space<vmem>>, vector<1x64x32xf32>
    %307 = vector.shape_cast %306 : vector<1x64x32xf32> to vector<64x32xf32>
    %cst_136 = arith.constant dense<0.000000e+00> : vector<8x32xf32>
    %308 = tpu.matmul %305, %307, %cst_136 {dimension_numbers = #tpu.dot_dimension_numbers<[1], [0], [0], [1], [0, 0, 1, 1], [], []>} : vector<8x64xf32>, vector<64x32xf32>, vector<8x32xf32> -> vector<8x32xf32>
    %c1_137 = arith.constant 1 : index
    %c0_138 = arith.constant 0 : index
    %c0_139 = arith.constant 0 : index
    %309 = vector.load %arg15[%c1_137, %c0_138, %c0_139] : memref<2x1x32xf32, #tpu.memory_space<vmem>>, vector<1x1x32xf32>
    %310 = vector.shape_cast %309 : vector<1x1x32xf32> to vector<1x32xf32>
    %311 = vector.broadcast %310 : vector<1x32xf32> to vector<8x32xf32>
    %312 = arith.addf %308, %311 : vector<8x32xf32>
    %313 = arith.addf %285, %312 : vector<8x32xf32>
    %c1_140 = arith.constant 1 : index
    %c0_141 = arith.constant 0 : index
    %c0_142 = arith.constant 0 : index
    %314 = vector.load %arg16[%c1_140, %c0_141, %c0_142] : memref<2x1x32xf32, #tpu.memory_space<vmem>>, vector<1x1x32xf32>
    %315 = vector.shape_cast %314 : vector<1x1x32xf32> to vector<1x32xf32>
    %c1_143 = arith.constant 1 : index
    %c0_144 = arith.constant 0 : index
    %c0_145 = arith.constant 0 : index
    %316 = vector.load %arg17[%c1_143, %c0_144, %c0_145] : memref<2x1x32xf32, #tpu.memory_space<vmem>>, vector<1x1x32xf32>
    %317 = vector.shape_cast %316 : vector<1x1x32xf32> to vector<1x32xf32>
    %cst_146 = arith.constant dense<0.000000e+00> : vector<8xf32>
    %318 = vector.multi_reduction <add>, %313, %cst_146 [1] : vector<8x32xf32> to vector<8xf32>
    %319 = vector.shape_cast %318 : vector<8xf32> to vector<8x1xf32>
    %cst_147 = arith.constant 3.200000e+01 : f32
    %320 = vector.broadcast %cst_147 : f32 to vector<8x1xf32>
    %321 = arith.divf %319, %320 : vector<8x1xf32>
    %322 = vector.broadcast %321 : vector<8x1xf32> to vector<8x32xf32>
    %323 = arith.subf %313, %322 : vector<8x32xf32>
    %324 = arith.mulf %323, %323 : vector<8x32xf32>
    %cst_148 = arith.constant dense<0.000000e+00> : vector<8xf32>
    %325 = vector.multi_reduction <add>, %324, %cst_148 [1] : vector<8x32xf32> to vector<8xf32>
    %326 = vector.shape_cast %325 : vector<8xf32> to vector<8x1xf32>
    %cst_149 = arith.constant 3.200000e+01 : f32
    %327 = vector.broadcast %cst_149 : f32 to vector<8x1xf32>
    %328 = arith.divf %326, %327 : vector<8x1xf32>
    %329 = vector.broadcast %321 : vector<8x1xf32> to vector<8x32xf32>
    %330 = arith.subf %313, %329 : vector<8x32xf32>
    %cst_150 = arith.constant 9.99999996E-13 : f32
    %331 = vector.broadcast %cst_150 : f32 to vector<8x1xf32>
    %332 = arith.addf %328, %331 : vector<8x1xf32>
    %333 = math.rsqrt %332 : vector<8x1xf32>
    %334 = vector.broadcast %333 : vector<8x1xf32> to vector<8x32xf32>
    %335 = arith.mulf %330, %334 : vector<8x32xf32>
    %336 = vector.broadcast %315 : vector<1x32xf32> to vector<8x32xf32>
    %337 = arith.mulf %335, %336 : vector<8x32xf32>
    %338 = vector.broadcast %317 : vector<1x32xf32> to vector<8x32xf32>
    %339 = arith.addf %337, %338 : vector<8x32xf32>
    %c0_151 = arith.constant 0 : index
    %c0_152 = arith.constant 0 : index
    %340 = vector.load %arg18[%c0_151, %c0_152] : memref<32x5xf32, #tpu.memory_space<vmem>>, vector<32x5xf32>
    %cst_153 = arith.constant dense<0.000000e+00> : vector<8x5xf32>
    %341 = tpu.matmul %339, %340, %cst_153 {dimension_numbers = #tpu.dot_dimension_numbers<[1], [0], [0], [1], [0, 0, 1, 1], [], []>} : vector<8x32xf32>, vector<32x5xf32>, vector<8x5xf32> -> vector<8x5xf32>
    %c0_154 = arith.constant 0 : index
    %c0_155 = arith.constant 0 : index
    %342 = vector.load %arg19[%c0_154, %c0_155] : memref<1x5xf32, #tpu.memory_space<vmem>>, vector<1x5xf32>
    %343 = vector.broadcast %342 : vector<1x5xf32> to vector<8x5xf32>
    %344 = arith.addf %341, %343 : vector<8x5xf32>
    %c0_156 = arith.constant 0 : index
    %c0_157 = arith.constant 0 : index
    %345 = vector.load %arg24[%c0_156, %c0_157] : memref<8x5xf32, #tpu.memory_space<vmem>>, vector<8x5xf32>
    tpu.vector_store %arg24[%c0_156, %c0_157], %344 {strides = array<i32>} : memref<8x5xf32, #tpu.memory_space<vmem>>, vector<8x5xf32>,
    %c0_158 = arith.constant 0 : index
    %c0_159 = arith.constant 0 : index
    %346 = vector.load %arg20[%c0_158, %c0_159] : memref<1x5xf32, #tpu.memory_space<vmem>>, vector<1x5xf32>
    %c0_160 = arith.constant 0 : index
    %c0_161 = arith.constant 0 : index
    %347 = vector.load %arg21[%c0_160, %c0_161] : memref<1x5xf32, #tpu.memory_space<vmem>>, vector<1x5xf32>
    %c0_162 = arith.constant 0 : index
    %c0_163 = arith.constant 0 : index
    %348 = vector.load %arg22[%c0_162, %c0_163] : memref<5x5xf32, #tpu.memory_space<vmem>>, vector<5x5xf32>
    %c0_164 = arith.constant 0 : index
    %c0_165 = arith.constant 0 : index
    %c0_166 = arith.constant 0 : index
    %349 = vector.load %arg4[%c0_164, %c0_165, %c0_166] : memref<1x8x1xi32, #tpu.memory_space<vmem>>, vector<1x8x1xi32>
    %350 = vector.shape_cast %349 : vector<1x8x1xi32> to vector<8x1xi32>
    %c0_167 = arith.constant 0 : index
    %c0_168 = arith.constant 0 : index
    %c0_169 = arith.constant 0 : index
    %351 = vector.load %arg5[%c0_167, %c0_168, %c0_169] : memref<1x8x1xf32, #tpu.memory_space<vmem>>, vector<1x8x1xf32>
    %352 = vector.shape_cast %351 : vector<1x8x1xf32> to vector<8x1xf32>
    %353 = tpu.iota {dimensions = array<i32: 1>} : vector<8x5xi32>
    %354 = vector.broadcast %350 : vector<8x1xi32> to vector<8x5xi32>
    %355 = arith.cmpi eq, %353, %354 : vector<8x5xi32>
    %356 = arith.extui %355 : vector<8x5xi1> to vector<8x5xi32>
    %357 = arith.sitofp %356 : vector<8x5xi32> to vector<8x5xf32>
    %358 = arith.mulf %344, %357 : vector<8x5xf32>
    %359 = vector.broadcast %352 : vector<8x1xf32> to vector<8x5xf32>
    %360 = arith.mulf %358, %359 : vector<8x5xf32>
    %361 = vector.shape_cast %360 : vector<8x5xf32> to vector<1x8x5xf32>
    %cst_170 = arith.constant dense<0.000000e+00> : vector<1xf32>
    %362 = vector.multi_reduction <add>, %361, %cst_170 [1, 2] : vector<1x8x5xf32> to vector<1xf32>
    %363 = vector.shape_cast %362 : vector<1xf32> to vector<1x1x1xf32>
    %364 = vector.extract %363[0, 0, 0] : f32 from vector<1x1x1xf32>
    %cst_171 = arith.constant dense<0.000000e+00> : vector<8x5xf32>
    %365 = tpu.matmul %357, %348, %cst_171 {dimension_numbers = #tpu.dot_dimension_numbers<[1], [0], [0], [1], [0, 0, 1, 1], [], []>} : vector<8x5xf32>, vector<5x5xf32>, vector<8x5xf32> -> vector<8x5xf32>
    %366 = vector.extract_strided_slice %365 {offsets = [0, 0], sizes = [7, 5], strides = [1, 1]} : vector<8x5xf32> to vector<7x5xf32>
    %367 = vector.extract_strided_slice %357 {offsets = [1, 0], sizes = [7, 5], strides = [1, 1]} : vector<8x5xf32> to vector<7x5xf32>
    %368 = arith.mulf %366, %367 : vector<7x5xf32>
    %369 = vector.extract_strided_slice %352 {offsets = [1, 0], sizes = [7, 1], strides = [1, 1]} : vector<8x1xf32> to vector<7x1xf32>
    %370 = vector.broadcast %369 : vector<7x1xf32> to vector<7x5xf32>
    %371 = arith.mulf %368, %370 : vector<7x5xf32>
    %372 = vector.shape_cast %371 : vector<7x5xf32> to vector<1x7x5xf32>
    %cst_172 = arith.constant dense<0.000000e+00> : vector<1xf32>
    %373 = vector.multi_reduction <add>, %372, %cst_172 [1, 2] : vector<1x7x5xf32> to vector<1xf32>
    %374 = vector.shape_cast %373 : vector<1xf32> to vector<1x1x1xf32>
    %375 = vector.extract %374[0, 0, 0] : f32 from vector<1x1x1xf32>
    %376 = vector.extract_strided_slice %357 {offsets = [0, 0], sizes = [1, 5], strides = [1, 1]} : vector<8x5xf32> to vector<1x5xf32>
    %377 = arith.mulf %346, %376 : vector<1x5xf32>
    %378 = vector.shape_cast %377 : vector<1x5xf32> to vector<1x1x5xf32>
    %cst_173 = arith.constant dense<0.000000e+00> : vector<1xf32>
    %379 = vector.multi_reduction <add>, %378, %cst_173 [1, 2] : vector<1x1x5xf32> to vector<1xf32>
    %380 = vector.shape_cast %379 : vector<1xf32> to vector<1x1x1xf32>
    %381 = vector.extract %380[0, 0, 0] : f32 from vector<1x1x1xf32>
    %382 = tpu.iota {dimensions = array<i32: 0>} : vector<8x1xi32>
    %383 = vector.shape_cast %352 : vector<8x1xf32> to vector<1x8x1xf32>
    %cst_174 = arith.constant dense<0.000000e+00> : vector<1xf32>
    %384 = vector.multi_reduction <add>, %383, %cst_174 [1, 2] : vector<1x8x1xf32> to vector<1xf32>
    %385 = vector.shape_cast %384 : vector<1xf32> to vector<1x1x1xf32>
    %386 = vector.extract %385[0, 0, 0] : f32 from vector<1x1x1xf32>
    %387 = arith.fptosi %386 : f32 to i32
    %c1_i32 = arith.constant 1 : i32
    %388 = arith.subi %387, %c1_i32 : i32
    %389 = vector.broadcast %388 : i32 to vector<8x1xi32>
    %390 = arith.cmpi eq, %382, %389 : vector<8x1xi32>
    %391 = arith.extui %390 : vector<8x1xi1> to vector<8x1xi32>
    %392 = arith.sitofp %391 : vector<8x1xi32> to vector<8x1xf32>
    %393 = vector.broadcast %392 : vector<8x1xf32> to vector<8x5xf32>
    %394 = arith.mulf %357, %393 : vector<8x5xf32>
    %cst_175 = arith.constant dense<0.000000e+00> : vector<5xf32>
    %395 = vector.multi_reduction <add>, %394, %cst_175 [0] : vector<8x5xf32> to vector<5xf32>
    %396 = vector.shape_cast %395 : vector<5xf32> to vector<1x5xf32>
    %397 = arith.mulf %347, %396 : vector<1x5xf32>
    %398 = vector.shape_cast %397 : vector<1x5xf32> to vector<1x1x5xf32>
    %cst_176 = arith.constant dense<0.000000e+00> : vector<1xf32>
    %399 = vector.multi_reduction <add>, %398, %cst_176 [1, 2] : vector<1x1x5xf32> to vector<1xf32>
    %400 = vector.shape_cast %399 : vector<1xf32> to vector<1x1x1xf32>
    %401 = vector.extract %400[0, 0, 0] : f32 from vector<1x1x1xf32>
    %402 = arith.addf %381, %364 : f32
    %403 = arith.addf %402, %375 : f32
    %404 = arith.addf %403, %401 : f32
    %405 = math.exp %348 : vector<5x5xf32>
    %406 = vector.extract_strided_slice %344 {offsets = [0, 0], sizes = [1, 5], strides = [1, 1]} : vector<8x5xf32> to vector<1x5xf32>
    %407 = arith.addf %346, %406 : vector<1x5xf32>
    %cst_177 = arith.constant 0.000000e+00 : f32
    %408 = vector.broadcast %cst_177 : f32 to vector<8x1xf32>
    %409 = vector.broadcast %407 : vector<1x5xf32> to vector<8x5xf32>
    %410 = vector.broadcast %408 : vector<8x1xf32> to vector<8x5xf32>
    %411 = arith.addf %409, %410 : vector<8x5xf32>
    %c1_i32_178 = arith.constant 1 : i32
    %412 = arith.index_cast %arg0 : i32 to index
    %413 = arith.index_cast %c1_i32_178 : i32 to index
    %414 = memref.load %arg1[%412, %413] : memref<2x8xi32, #tpu.memory_space<smem>>
    %c0_i32 = arith.constant 0 : i32
    %415 = arith.cmpi sgt, %414, %c0_i32 : i32
    %416 = arith.index_cast %c1_i32_178 : i32 to index
    %c0_179 = arith.constant 0 : index
    %417 = vector.load %arg24[%416, %c0_179] : memref<8x5xf32, #tpu.memory_space<vmem>>, vector<1x5xf32>
    %418 = vector.shape_cast %411 : vector<8x5xf32> to vector<1x8x5xf32>
    %cst_180 = arith.constant dense<0xFF800000> : vector<1xf32>
    %419 = vector.multi_reduction <maximumf>, %418, %cst_180 [1, 2] : vector<1x8x5xf32> to vector<1xf32>
    %420 = vector.shape_cast %419 : vector<1xf32> to vector<1x1x1xf32>
    %421 = vector.extract %420[0, 0, 0] : f32 from vector<1x1x1xf32>
    %422 = vector.broadcast %421 : f32 to vector<8x5xf32>
    %423 = arith.subf %411, %422 : vector<8x5xf32>
    %424 = math.exp %423 : vector<8x5xf32>
    %cst_181 = arith.constant dense<0.000000e+00> : vector<8x5xf32>
    %425 = tpu.matmul %424, %405, %cst_181 {dimension_numbers = #tpu.dot_dimension_numbers<[1], [0], [0], [1], [0, 0, 1, 1], [], []>} : vector<8x5xf32>, vector<5x5xf32>, vector<8x5xf32> -> vector<8x5xf32>
    %426 = math.log %425 : vector<8x5xf32>
    %427 = vector.broadcast %421 : f32 to vector<8x5xf32>
    %428 = arith.addf %427, %426 : vector<8x5xf32>
    %429 = vector.broadcast %417 : vector<1x5xf32> to vector<8x5xf32>
    %430 = arith.addf %428, %429 : vector<8x5xf32>
    %431 = arith.select %415, %430, %411 : vector<8x5xf32>
    %c2_i32 = arith.constant 2 : i32
    %432 = arith.index_cast %arg0 : i32 to index
    %433 = arith.index_cast %c2_i32 : i32 to index
    %434 = memref.load %arg1[%432, %433] : memref<2x8xi32, #tpu.memory_space<smem>>
    %c0_i32_182 = arith.constant 0 : i32
    %435 = arith.cmpi sgt, %434, %c0_i32_182 : i32
    %436 = arith.index_cast %c2_i32 : i32 to index
    %c0_183 = arith.constant 0 : index
    %437 = vector.load %arg24[%436, %c0_183] : memref<8x5xf32, #tpu.memory_space<vmem>>, vector<1x5xf32>
    %438 = vector.shape_cast %431 : vector<8x5xf32> to vector<1x8x5xf32>
    %cst_184 = arith.constant dense<0xFF800000> : vector<1xf32>
    %439 = vector.multi_reduction <maximumf>, %438, %cst_184 [1, 2] : vector<1x8x5xf32> to vector<1xf32>
    %440 = vector.shape_cast %439 : vector<1xf32> to vector<1x1x1xf32>
    %441 = vector.extract %440[0, 0, 0] : f32 from vector<1x1x1xf32>
    %442 = vector.broadcast %441 : f32 to vector<8x5xf32>
    %443 = arith.subf %431, %442 : vector<8x5xf32>
    %444 = math.exp %443 : vector<8x5xf32>
    %cst_185 = arith.constant dense<0.000000e+00> : vector<8x5xf32>
    %445 = tpu.matmul %444, %405, %cst_185 {dimension_numbers = #tpu.dot_dimension_numbers<[1], [0], [0], [1], [0, 0, 1, 1], [], []>} : vector<8x5xf32>, vector<5x5xf32>, vector<8x5xf32> -> vector<8x5xf32>
    %446 = math.log %445 : vector<8x5xf32>
    %447 = vector.broadcast %441 : f32 to vector<8x5xf32>
    %448 = arith.addf %447, %446 : vector<8x5xf32>
    %449 = vector.broadcast %437 : vector<1x5xf32> to vector<8x5xf32>
    %450 = arith.addf %448, %449 : vector<8x5xf32>
    %451 = arith.select %435, %450, %431 : vector<8x5xf32>
    %c3_i32 = arith.constant 3 : i32
    %452 = arith.index_cast %arg0 : i32 to index
    %453 = arith.index_cast %c3_i32 : i32 to index
    %454 = memref.load %arg1[%452, %453] : memref<2x8xi32, #tpu.memory_space<smem>>
    %c0_i32_186 = arith.constant 0 : i32
    %455 = arith.cmpi sgt, %454, %c0_i32_186 : i32
    %456 = arith.index_cast %c3_i32 : i32 to index
    %c0_187 = arith.constant 0 : index
    %457 = vector.load %arg24[%456, %c0_187] : memref<8x5xf32, #tpu.memory_space<vmem>>, vector<1x5xf32>
    %458 = vector.shape_cast %451 : vector<8x5xf32> to vector<1x8x5xf32>
    %cst_188 = arith.constant dense<0xFF800000> : vector<1xf32>
    %459 = vector.multi_reduction <maximumf>, %458, %cst_188 [1, 2] : vector<1x8x5xf32> to vector<1xf32>
    %460 = vector.shape_cast %459 : vector<1xf32> to vector<1x1x1xf32>
    %461 = vector.extract %460[0, 0, 0] : f32 from vector<1x1x1xf32>
    %462 = vector.broadcast %461 : f32 to vector<8x5xf32>
    %463 = arith.subf %451, %462 : vector<8x5xf32>
    %464 = math.exp %463 : vector<8x5xf32>
    %cst_189 = arith.constant dense<0.000000e+00> : vector<8x5xf32>
    %465 = tpu.matmul %464, %405, %cst_189 {dimension_numbers = #tpu.dot_dimension_numbers<[1], [0], [0], [1], [0, 0, 1, 1], [], []>} : vector<8x5xf32>, vector<5x5xf32>, vector<8x5xf32> -> vector<8x5xf32>
    %466 = math.log %465 : vector<8x5xf32>
    %467 = vector.broadcast %461 : f32 to vector<8x5xf32>
    %468 = arith.addf %467, %466 : vector<8x5xf32>
    %469 = vector.broadcast %457 : vector<1x5xf32> to vector<8x5xf32>
    %470 = arith.addf %468, %469 : vector<8x5xf32>
    %471 = arith.select %455, %470, %451 : vector<8x5xf32>
    %c4_i32 = arith.constant 4 : i32
    %472 = arith.index_cast %arg0 : i32 to index
    %473 = arith.index_cast %c4_i32 : i32 to index
    %474 = memref.load %arg1[%472, %473] : memref<2x8xi32, #tpu.memory_space<smem>>
    %c0_i32_190 = arith.constant 0 : i32
    %475 = arith.cmpi sgt, %474, %c0_i32_190 : i32
    %476 = arith.index_cast %c4_i32 : i32 to index
    %c0_191 = arith.constant 0 : index
    %477 = vector.load %arg24[%476, %c0_191] : memref<8x5xf32, #tpu.memory_space<vmem>>, vector<1x5xf32>
    %478 = vector.shape_cast %471 : vector<8x5xf32> to vector<1x8x5xf32>
    %cst_192 = arith.constant dense<0xFF800000> : vector<1xf32>
    %479 = vector.multi_reduction <maximumf>, %478, %cst_192 [1, 2] : vector<1x8x5xf32> to vector<1xf32>
    %480 = vector.shape_cast %479 : vector<1xf32> to vector<1x1x1xf32>
    %481 = vector.extract %480[0, 0, 0] : f32 from vector<1x1x1xf32>
    %482 = vector.broadcast %481 : f32 to vector<8x5xf32>
    %483 = arith.subf %471, %482 : vector<8x5xf32>
    %484 = math.exp %483 : vector<8x5xf32>
    %cst_193 = arith.constant dense<0.000000e+00> : vector<8x5xf32>
    %485 = tpu.matmul %484, %405, %cst_193 {dimension_numbers = #tpu.dot_dimension_numbers<[1], [0], [0], [1], [0, 0, 1, 1], [], []>} : vector<8x5xf32>, vector<5x5xf32>, vector<8x5xf32> -> vector<8x5xf32>
    %486 = math.log %485 : vector<8x5xf32>
    %487 = vector.broadcast %481 : f32 to vector<8x5xf32>
    %488 = arith.addf %487, %486 : vector<8x5xf32>
    %489 = vector.broadcast %477 : vector<1x5xf32> to vector<8x5xf32>
    %490 = arith.addf %488, %489 : vector<8x5xf32>
    %491 = arith.select %475, %490, %471 : vector<8x5xf32>
    %c5_i32 = arith.constant 5 : i32
    %492 = arith.index_cast %arg0 : i32 to index
    %493 = arith.index_cast %c5_i32 : i32 to index
    %494 = memref.load %arg1[%492, %493] : memref<2x8xi32, #tpu.memory_space<smem>>
    %c0_i32_194 = arith.constant 0 : i32
    %495 = arith.cmpi sgt, %494, %c0_i32_194 : i32
    %496 = arith.index_cast %c5_i32 : i32 to index
    %c0_195 = arith.constant 0 : index
    %497 = vector.load %arg24[%496, %c0_195] : memref<8x5xf32, #tpu.memory_space<vmem>>, vector<1x5xf32>
    %498 = vector.shape_cast %491 : vector<8x5xf32> to vector<1x8x5xf32>
    %cst_196 = arith.constant dense<0xFF800000> : vector<1xf32>
    %499 = vector.multi_reduction <maximumf>, %498, %cst_196 [1, 2] : vector<1x8x5xf32> to vector<1xf32>
    %500 = vector.shape_cast %499 : vector<1xf32> to vector<1x1x1xf32>
    %501 = vector.extract %500[0, 0, 0] : f32 from vector<1x1x1xf32>
    %502 = vector.broadcast %501 : f32 to vector<8x5xf32>
    %503 = arith.subf %491, %502 : vector<8x5xf32>
    %504 = math.exp %503 : vector<8x5xf32>
    %cst_197 = arith.constant dense<0.000000e+00> : vector<8x5xf32>
    %505 = tpu.matmul %504, %405, %cst_197 {dimension_numbers = #tpu.dot_dimension_numbers<[1], [0], [0], [1], [0, 0, 1, 1], [], []>} : vector<8x5xf32>, vector<5x5xf32>, vector<8x5xf32> -> vector<8x5xf32>
    %506 = math.log %505 : vector<8x5xf32>
    %507 = vector.broadcast %501 : f32 to vector<8x5xf32>
    %508 = arith.addf %507, %506 : vector<8x5xf32>
    %509 = vector.broadcast %497 : vector<1x5xf32> to vector<8x5xf32>
    %510 = arith.addf %508, %509 : vector<8x5xf32>
    %511 = arith.select %495, %510, %491 : vector<8x5xf32>
    %c6_i32 = arith.constant 6 : i32
    %512 = arith.index_cast %arg0 : i32 to index
    %513 = arith.index_cast %c6_i32 : i32 to index
    %514 = memref.load %arg1[%512, %513] : memref<2x8xi32, #tpu.memory_space<smem>>
    %c0_i32_198 = arith.constant 0 : i32
    %515 = arith.cmpi sgt, %514, %c0_i32_198 : i32
    %516 = arith.index_cast %c6_i32 : i32 to index
    %c0_199 = arith.constant 0 : index
    %517 = vector.load %arg24[%516, %c0_199] : memref<8x5xf32, #tpu.memory_space<vmem>>, vector<1x5xf32>
    %518 = vector.shape_cast %511 : vector<8x5xf32> to vector<1x8x5xf32>
    %cst_200 = arith.constant dense<0xFF800000> : vector<1xf32>
    %519 = vector.multi_reduction <maximumf>, %518, %cst_200 [1, 2] : vector<1x8x5xf32> to vector<1xf32>
    %520 = vector.shape_cast %519 : vector<1xf32> to vector<1x1x1xf32>
    %521 = vector.extract %520[0, 0, 0] : f32 from vector<1x1x1xf32>
    %522 = vector.broadcast %521 : f32 to vector<8x5xf32>
    %523 = arith.subf %511, %522 : vector<8x5xf32>
    %524 = math.exp %523 : vector<8x5xf32>
    %cst_201 = arith.constant dense<0.000000e+00> : vector<8x5xf32>
    %525 = tpu.matmul %524, %405, %cst_201 {dimension_numbers = #tpu.dot_dimension_numbers<[1], [0], [0], [1], [0, 0, 1, 1], [], []>} : vector<8x5xf32>, vector<5x5xf32>, vector<8x5xf32> -> vector<8x5xf32>
    %526 = math.log %525 : vector<8x5xf32>
    %527 = vector.broadcast %521 : f32 to vector<8x5xf32>
    %528 = arith.addf %527, %526 : vector<8x5xf32>
    %529 = vector.broadcast %517 : vector<1x5xf32> to vector<8x5xf32>
    %530 = arith.addf %528, %529 : vector<8x5xf32>
    %531 = arith.select %515, %530, %511 : vector<8x5xf32>
    %c7_i32 = arith.constant 7 : i32
    %532 = arith.index_cast %arg0 : i32 to index
    %533 = arith.index_cast %c7_i32 : i32 to index
    %534 = memref.load %arg1[%532, %533] : memref<2x8xi32, #tpu.memory_space<smem>>
    %c0_i32_202 = arith.constant 0 : i32
    %535 = arith.cmpi sgt, %534, %c0_i32_202 : i32
    %536 = arith.index_cast %c7_i32 : i32 to index
    %c0_203 = arith.constant 0 : index
    %537 = vector.load %arg24[%536, %c0_203] : memref<8x5xf32, #tpu.memory_space<vmem>>, vector<1x5xf32>
    %538 = vector.shape_cast %531 : vector<8x5xf32> to vector<1x8x5xf32>
    %cst_204 = arith.constant dense<0xFF800000> : vector<1xf32>
    %539 = vector.multi_reduction <maximumf>, %538, %cst_204 [1, 2] : vector<1x8x5xf32> to vector<1xf32>
    %540 = vector.shape_cast %539 : vector<1xf32> to vector<1x1x1xf32>
    %541 = vector.extract %540[0, 0, 0] : f32 from vector<1x1x1xf32>
    %542 = vector.broadcast %541 : f32 to vector<8x5xf32>
    %543 = arith.subf %531, %542 : vector<8x5xf32>
    %544 = math.exp %543 : vector<8x5xf32>
    %cst_205 = arith.constant dense<0.000000e+00> : vector<8x5xf32>
    %545 = tpu.matmul %544, %405, %cst_205 {dimension_numbers = #tpu.dot_dimension_numbers<[1], [0], [0], [1], [0, 0, 1, 1], [], []>} : vector<8x5xf32>, vector<5x5xf32>, vector<8x5xf32> -> vector<8x5xf32>
    %546 = math.log %545 : vector<8x5xf32>
    %547 = vector.broadcast %541 : f32 to vector<8x5xf32>
    %548 = arith.addf %547, %546 : vector<8x5xf32>
    %549 = vector.broadcast %537 : vector<1x5xf32> to vector<8x5xf32>
    %550 = arith.addf %548, %549 : vector<8x5xf32>
    %551 = arith.select %535, %550, %531 : vector<8x5xf32>
    %c7_i32_206 = arith.constant 7 : i32
    %552 = vector.extract_strided_slice %551 {offsets = [0, 0], sizes = [1, 5], strides = [1, 1]} : vector<8x5xf32> to vector<1x5xf32>
    %553 = arith.addf %552, %347 : vector<1x5xf32>
    %554 = vector.shape_cast %553 : vector<1x5xf32> to vector<1x1x5xf32>
    %cst_207 = arith.constant dense<0xFF800000> : vector<1xf32>
    %555 = vector.multi_reduction <maximumf>, %554, %cst_207 [1, 2] : vector<1x1x5xf32> to vector<1xf32>
    %556 = vector.shape_cast %555 : vector<1xf32> to vector<1x1x1xf32>
    %557 = vector.extract %556[0, 0, 0] : f32 from vector<1x1x1xf32>
    %558 = vector.broadcast %557 : f32 to vector<1x5xf32>
    %559 = arith.subf %553, %558 : vector<1x5xf32>
    %560 = math.exp %559 : vector<1x5xf32>
    %561 = vector.shape_cast %560 : vector<1x5xf32> to vector<1x1x5xf32>
    %cst_208 = arith.constant dense<0.000000e+00> : vector<1xf32>
    %562 = vector.multi_reduction <add>, %561, %cst_208 [1, 2] : vector<1x1x5xf32> to vector<1xf32>
    %563 = vector.shape_cast %562 : vector<1xf32> to vector<1x1x1xf32>
    %564 = vector.extract %563[0, 0, 0] : f32 from vector<1x1x1xf32>
    %565 = math.log %564 : f32
    %566 = arith.addf %557, %565 : f32
    %567 = arith.subf %566, %404 : f32
    %cst_209 = arith.constant 1.000000e+00 : f32
    %568 = vector.broadcast %cst_209 : f32 to vector<1x1x1xf32>
    %569 = vector.broadcast %567 : f32 to vector<1x1x1xf32>
    %570 = arith.mulf %569, %568 : vector<1x1x1xf32>
    %c0_210 = arith.constant 0 : index
    %c0_211 = arith.constant 0 : index
    %c0_212 = arith.constant 0 : index
    %571 = vector.load %arg23[%c0_210, %c0_211, %c0_212] : memref<1x1x1xf32, #tpu.memory_space<vmem>>, vector<1x1x1xf32>
    tpu.vector_store %arg23[%c0_210, %c0_211, %c0_212], %570 {strides = array<i32>} : memref<1x1x1xf32, #tpu.memory_space<vmem>>, vector<1x1x1xf32>,
    return
  }
  func.func @transform_0(%arg0: i32, %arg1: memref<2x8xi32, #tpu.memory_space<smem>>) -> (i32, i32, i32) {
    %c0_i32 = arith.constant 0 : i32
    %c0_i32_0 = arith.constant 0 : i32
    %c0_i32_1 = arith.constant 0 : i32
    return %arg0, %c0_i32, %c0_i32_0 : i32, i32, i32
  }
  func.func @transform_1(%arg0: i32, %arg1: memref<2x8xi32, #tpu.memory_space<smem>>) -> (i32, i32, i32) {
    %c0_i32 = arith.constant 0 : i32
    %c0_i32_0 = arith.constant 0 : i32
    %c0_i32_1 = arith.constant 0 : i32
    return %arg0, %c0_i32, %c0_i32_0 : i32, i32, i32
  }
  func.func @transform_2(%arg0: i32, %arg1: memref<2x8xi32, #tpu.memory_space<smem>>) -> (i32, i32, i32) {
    %c0_i32 = arith.constant 0 : i32
    %c0_i32_0 = arith.constant 0 : i32
    %c0_i32_1 = arith.constant 0 : i32
    return %arg0, %c0_i32, %c0_i32_0 : i32, i32, i32
  }
  func.func @transform_3(%arg0: i32, %arg1: memref<2x8xi32, #tpu.memory_space<smem>>) -> (i32, i32, i32) {
    %c0_i32 = arith.constant 0 : i32
    %c0_i32_0 = arith.constant 0 : i32
    %c0_i32_1 = arith.constant 0 : i32
    return %arg0, %c0_i32, %c0_i32_0 : i32, i32, i32
  }
  func.func @transform_4(%arg0: i32, %arg1: memref<2x8xi32, #tpu.memory_space<smem>>) -> (i32, i32, i32) {
    %c0_i32 = arith.constant 0 : i32
    %c0_i32_0 = arith.constant 0 : i32
    %c0_i32_1 = arith.constant 0 : i32
    %c0_i32_2 = arith.constant 0 : i32
    return %c0_i32, %c0_i32_0, %c0_i32_1 : i32, i32, i32
  }
  func.func @transform_5(%arg0: i32, %arg1: memref<2x8xi32, #tpu.memory_space<smem>>) -> (i32, i32, i32) {
    %c0_i32 = arith.constant 0 : i32
    %c0_i32_0 = arith.constant 0 : i32
    %c0_i32_1 = arith.constant 0 : i32
    %c0_i32_2 = arith.constant 0 : i32
    return %c0_i32, %c0_i32_0, %c0_i32_1 : i32, i32, i32
  }
  func.func @transform_6(%arg0: i32, %arg1: memref<2x8xi32, #tpu.memory_space<smem>>) -> (i32, i32, i32) {
    %c0_i32 = arith.constant 0 : i32
    %c0_i32_0 = arith.constant 0 : i32
    %c0_i32_1 = arith.constant 0 : i32
    %c0_i32_2 = arith.constant 0 : i32
    return %c0_i32, %c0_i32_0, %c0_i32_1 : i32, i32, i32
  }
  func.func @transform_7(%arg0: i32, %arg1: memref<2x8xi32, #tpu.memory_space<smem>>) -> (i32, i32, i32) {
    %c0_i32 = arith.constant 0 : i32
    %c0_i32_0 = arith.constant 0 : i32
    %c0_i32_1 = arith.constant 0 : i32
    %c0_i32_2 = arith.constant 0 : i32
    return %c0_i32, %c0_i32_0, %c0_i32_1 : i32, i32, i32
  }
  func.func @transform_8(%arg0: i32, %arg1: memref<2x8xi32, #tpu.memory_space<smem>>) -> (i32, i32, i32) {
    %c0_i32 = arith.constant 0 : i32
    %c0_i32_0 = arith.constant 0 : i32
    %c0_i32_1 = arith.constant 0 : i32
    %c0_i32_2 = arith.constant 0 : i32
    return %c0_i32, %c0_i32_0, %c0_i32_1 : i32, i32, i32
  }
  func.func @transform_9(%arg0: i32, %arg1: memref<2x8xi32, #tpu.memory_space<smem>>) -> (i32, i32, i32) {
    %c0_i32 = arith.constant 0 : i32
    %c0_i32_0 = arith.constant 0 : i32
    %c0_i32_1 = arith.constant 0 : i32
    %c0_i32_2 = arith.constant 0 : i32
    return %c0_i32, %c0_i32_0, %c0_i32_1 : i32, i32, i32
  }
  func.func @transform_10(%arg0: i32, %arg1: memref<2x8xi32, #tpu.memory_space<smem>>) -> (i32, i32, i32) {
    %c0_i32 = arith.constant 0 : i32
    %c0_i32_0 = arith.constant 0 : i32
    %c0_i32_1 = arith.constant 0 : i32
    %c0_i32_2 = arith.constant 0 : i32
    return %c0_i32, %c0_i32_0, %c0_i32_1 : i32, i32, i32
  }
  func.func @transform_11(%arg0: i32, %arg1: memref<2x8xi32, #tpu.memory_space<smem>>) -> (i32, i32, i32) {
    %c0_i32 = arith.constant 0 : i32
    %c0_i32_0 = arith.constant 0 : i32
    %c0_i32_1 = arith.constant 0 : i32
    %c0_i32_2 = arith.constant 0 : i32
    return %c0_i32, %c0_i32_0, %c0_i32_1 : i32, i32, i32
  }
  func.func @transform_12(%arg0: i32, %arg1: memref<2x8xi32, #tpu.memory_space<smem>>) -> (i32, i32, i32) {
    %c0_i32 = arith.constant 0 : i32
    %c0_i32_0 = arith.constant 0 : i32
    %c0_i32_1 = arith.constant 0 : i32
    %c0_i32_2 = arith.constant 0 : i32
    return %c0_i32, %c0_i32_0, %c0_i32_1 : i32, i32, i32
  }
  func.func @transform_13(%arg0: i32, %arg1: memref<2x8xi32, #tpu.memory_space<smem>>) -> (i32, i32, i32) {
    %c0_i32 = arith.constant 0 : i32
    %c0_i32_0 = arith.constant 0 : i32
    %c0_i32_1 = arith.constant 0 : i32
    %c0_i32_2 = arith.constant 0 : i32
    return %c0_i32, %c0_i32_0, %c0_i32_1 : i32, i32, i32
  }
  func.func @transform_14(%arg0: i32, %arg1: memref<2x8xi32, #tpu.memory_space<smem>>) -> (i32, i32, i32) {
    %c0_i32 = arith.constant 0 : i32
    %c0_i32_0 = arith.constant 0 : i32
    %c0_i32_1 = arith.constant 0 : i32
    %c0_i32_2 = arith.constant 0 : i32
    return %c0_i32, %c0_i32_0, %c0_i32_1 : i32, i32, i32
  }
  func.func @transform_15(%arg0: i32, %arg1: memref<2x8xi32, #tpu.memory_space<smem>>) -> (i32, i32, i32) {
    %c0_i32 = arith.constant 0 : i32
    %c0_i32_0 = arith.constant 0 : i32
    %c0_i32_1 = arith.constant 0 : i32
    %c0_i32_2 = arith.constant 0 : i32
    return %c0_i32, %c0_i32_0, %c0_i32_1 : i32, i32, i32
  }
  func.func @transform_16(%arg0: i32, %arg1: memref<2x8xi32, #tpu.memory_space<smem>>) -> (i32, i32) {
    %c0_i32 = arith.constant 0 : i32
    %c0_i32_0 = arith.constant 0 : i32
    %c0_i32_1 = arith.constant 0 : i32
    return %c0_i32, %c0_i32_0 : i32, i32
  }
  func.func @transform_17(%arg0: i32, %arg1: memref<2x8xi32, #tpu.memory_space<smem>>) -> (i32, i32) {
    %c0_i32 = arith.constant 0 : i32
    %c0_i32_0 = arith.constant 0 : i32
    %c0_i32_1 = arith.constant 0 : i32
    return %c0_i32, %c0_i32_0 : i32, i32
  }
  func.func @transform_18(%arg0: i32, %arg1: memref<2x8xi32, #tpu.memory_space<smem>>) -> (i32, i32) {
    %c0_i32 = arith.constant 0 : i32
    %c0_i32_0 = arith.constant 0 : i32
    %c0_i32_1 = arith.constant 0 : i32
    return %c0_i32, %c0_i32_0 : i32, i32
  }
  func.func @transform_19(%arg0: i32, %arg1: memref<2x8xi32, #tpu.memory_space<smem>>) -> (i32, i32) {
    %c0_i32 = arith.constant 0 : i32
    %c0_i32_0 = arith.constant 0 : i32
    %c0_i32_1 = arith.constant 0 : i32
    return %c0_i32, %c0_i32_0 : i32, i32
  }
  func.func @transform_20(%arg0: i32, %arg1: memref<2x8xi32, #tpu.memory_space<smem>>) -> (i32, i32) {
    %c0_i32 = arith.constant 0 : i32
    %c0_i32_0 = arith.constant 0 : i32
    %c0_i32_1 = arith.constant 0 : i32
    return %c0_i32, %c0_i32_0 : i32, i32
  }
  func.func @transform_21(%arg0: i32, %arg1: memref<2x8xi32, #tpu.memory_space<smem>>) -> (i32, i32, i32) {
    %c0_i32 = arith.constant 0 : i32
    %c0_i32_0 = arith.constant 0 : i32
    %c0_i32_1 = arith.constant 0 : i32
    return %arg0, %c0_i32, %c0_i32_0 : i32, i32, i32
  }
}

</mosaic_0001>

<bundles_post_ra>
// kernel: bert_crf_loss.1
= control target key start
LH: loop header
LB: loop body
LE: loop exit
PB: predicated region body
PF: predicated region fallthrough
CT: control target
= control target key end

     0   :  { %s5399_s0 = inlined_call_operand.vmem [shape: s32[2,8], index: 0, kind: input, shape index: {}]   ;;  %s5400_s1 = inlined_call_operand.vmem [shape: f32[2,8,32], index: 1, kind: input, shape index: {}]   ;;  %s5401_s2 = inlined_call_operand.vmem [shape: f32[2,1,8], index: 2, kind: input, shape index: {}]   ;;  %s5402_s3 = inlined_call_operand.vmem [shape: s32[2,8,1], index: 3, kind: input, shape index: {}]   ;;  %s5403_s4 = inlined_call_operand.vmem [shape: f32[2,8,1], index: 4, kind: input, shape index: {}]   ;;  %s5404_s5 = inlined_call_operand.vmem [shape: f32[2,32,96], index: 5, kind: input, shape index: {}]   ;;  %s5405_s6 = inlined_call_operand.vmem [shape: f32[2,1,96], index: 6, kind: input, shape index: {}]   ;;  %s5406_s7 = inlined_call_operand.vmem [shape: f32[2,32,32], index: 7, kind: input, shape index: {}]   ;;  %s5407_s8 = inlined_call_operand.vmem [shape: f32[2,1,32], index: 8, kind: input, shape index: {}]   ;;  %s5408_s9 = inlined_call_operand.vmem [shape: f32[2,1,32], index: 9, kind: input, shape index: {}]   ;;  %s5409_s10 = inlined_call_operand.vmem [shape: f32[2,1,32], index: 10, kind: input, shape index: {}]   ;;  %s5410_s11 = inlined_call_operand.vmem [shape: f32[2,32,64], index: 11, kind: input, shape index: {}]   ;;  %s5411_s12 = inlined_call_operand.vmem [shape: f32[2,1,64], index: 12, kind: input, shape index: {}]   ;;  %s5412_s13 = inlined_call_operand.vmem [shape: f32[2,64,32], index: 13, kind: input, shape index: {}]   ;;  %s5413_s14 = inlined_call_operand.vmem [shape: f32[2,1,32], index: 14, kind: input, shape index: {}]   ;;  %s5414_s15 = inlined_call_operand.vmem [shape: f32[2,1,32], index: 15, kind: input, shape index: {}]   ;;  %s5415_s16 = inlined_call_operand.vmem [shape: f32[2,1,32], index: 16, kind: input, shape index: {}]   ;;  %s5416_s17 = inlined_call_operand.vmem [shape: f32[32,5], index: 17, kind: input, shape index: {}]   ;;  %s5417_s18 = inlined_call_operand.vmem [shape: f32[1,5], index: 18, kind: input, shape index: {}]   ;;  %s5418_s19 = inlined_call_operand.vmem [shape: f32[1,5], index: 19, kind: input, shape index: {}]   ;;  %s5419_s20 = inlined_call_operand.vmem [shape: f32[1,5], index: 20, kind: input, shape index: {}]   ;;  %s5420_s21 = inlined_call_operand.vmem [shape: f32[5,5], index: 21, kind: input, shape index: {}]   ;;  %s5421_s22 = inlined_call_operand.vmem [shape: f32[2,1,1], index: 22, kind: output, shape index: {}]  }
   0x1   :  { %5437 = sst [smem:[#allocation6_spill]] %s5399_s0 }
   0x2   :  { %5438 = sst [smem:[#allocation7_spill]] %s5400_s1  ;;  %s5445_s29 = sld [smem:[#allocation6_spill]] }
   0x3   :  { %5439 = sst [smem:[#allocation8_spill]] %s5401_s2 }
   0x4   :  { %5440 = sst [smem:[#allocation9_spill]] %s5402_s3 }
   0x5   :  { %5441 = sst [smem:[#allocation10_spill]] %s5403_s4 }
   0x6   :  { %5442 = sst [smem:[#allocation11_spill]] %s5404_s5 }
   0x7   :  { %5443 = sst [smem:[#allocation12_spill]] %s5405_s6 }
   0x8   :  { %5444 = sst [smem:[#allocation13_spill]] %s5415_s16  ;;  %s27_s16 = sshll.u32 %s5445_s29, 4  ;;  %s28_s16 = int_to_ptr.vmem [resolvable:$true] %s27_s16 }
   0x9   :  { %s4679_s30 = scalar_lea.vmem %s28_s16, 32  ;;  %p4684_p1 = scmp.lt.s32.totalorder %s28_s16, %s28_s16 }
   0xa   :  { %p4680_p0 = scmp.ne.s32.totalorder %s28_s16, %s4679_s30  ;;  %p4685_p2 = scmp.lt.s32.totalorder %s4679_s30, %s4679_s30 }
   0xc   :  { %p4686_p3 = por %p4685_p2, %p4684_p1 }
   0xe   :  { %p4687_p4 = pnand %p4686_p3, %p4680_p0 }
  0x10   :  { %4690 = shalt.err (!%p4687_p4)  }
  0x11   :  { %s4701_s4 = smov [#allocation4]  }
  0x12   :  { %30 = dma.vmem_to_smem %s28_s16, 32, %s4701_s4, [#allocation3] }
  0x13   :  { %4695 = dma.done.wait [#allocation3], 32 }
  0x14   :  { %4696 = vsyncadd [#allocation3], 4294967264 }
  0x15   :  { %32 = sfence }
  0x16   :  { %s4838_s0 = smov 0  }
  0x17 LB: > { %s4844_s23 = sadd.s32 4294967295, %s4699_s0   ;;  %p4023_p5 = scmp.ge.s32.totalorder %s4699_s0, 1  ;;  %s4699_s0 = sphi %s4838_s0, %s38_s0  }
  0x18   : > { %p619_p6 = scmp.lt.s32.totalorder %s4699_s0, 3 }
  0x1a   : > { %p620_p7 = pnand %p4023_p5, %p619_p6 }
  0x1b   : > { %s5446_s5 = sld [smem:[#allocation11_spill]] (!%p620_p7)  ;;  %v4702_v3 = vmov (!%p620_p7), 0.0|0.0   ;;  %vm4703_vm0 = vmmov (!%p620_p7), 0   ;;  %v4704_v6 = vmov (!%p620_p7), 0.0   ;;  %p687_p8 = scmp.lt.s32.totalorder (!%p620_p7), %s4844_s23, 1  ;;  %vm718_vm1 = vcmask (!%p620_p7), 261120  }
  0x1c   : > { %623 = sbr.rel (%p620_p7) target bundleno = 9248 (0x2420), region = 104  ;;  %4471 = vmatprep.subr.bf16.mxu0 (!%p620_p7), %v4702_v3  ;;  %4244 = vmatprep.mubr.msk.f32.mxu0 (!%p620_p7), %vm4703_vm0, %v4704_v6  ;;  %s5447_s4 = sld [smem:[#allocation7_spill]] (!%p620_p7)  ;;  %vm795_vm2 = vcmask (!%p620_p7), 64512   ;;  %vm1479_vm3 = vcmask (!%p620_p7), 130048   ;;  %vm1481_vm4 = vcmask (!%p620_p7), 195584   ;;  %vm1706_vm5 = vcmask (!%p620_p7), 523264  }
  0x1d   : > { %4247 = vmatprep.subr.mxu1 (!%p620_p7), %v4704_v6  ;;  %4249 = vmatprep.mubr.msk.f32.mxu1 (!%p620_p7), %vm4703_vm0, %v4704_v6  ;;  %s5448_s6 = sld [smem:[#allocation12_spill]] (!%p620_p7)  ;;  %s5432_s25 = smov (!%p620_p7), 120   ;;  %vm3032_vm6 = vcmask (!%p620_p7), 1044480   ;;  %vm2997_vm8 = vcmask (!%p620_p7), 39936   ;;  %vm3112_vm9 = vcmask (!%p620_p7), 38912   ;;  %vm3124_vm10 = vcmask (!%p620_p7), 32768  }
  0x1e   : > { %s4706_s26 = smov (!%p620_p7), 96   ;;  %s5430_s2 = smov (!%p620_p7), 80   ;;  %vm3137_vm11 = vcmask (!%p620_p7), 7168  }
  0x1f   : > { %s4708_s27 = smov (!%p620_p7), 88   ;;  %s5425_s29 = smov (!%p620_p7), 72  }
  0x20   : > { %s5436_s30 = smov (!%p620_p7), 112   ;;  %s5449_s24 = sld [smem:[#allocation8_spill]] (!%p620_p7) }
  0x21   : > { %v707_v0 = vld [vmem:[%s5446_s5] sm:$0xff] (!%p620_p7)  ;;  %v708_v1 = vld [vmem:[%s5446_s5 + $0x8] sm:$0xff] (!%p620_p7)  ;;  %v709_v2 = vld [vmem:[%s5446_s5 + $0x10] sm:$0xff] (!%p620_p7)  ;;  %s5427_s1 = smov (!%p620_p7), 48  }
  0x22   : > { %v4472_v4 = vpack.c.bf16 (!%p620_p7), %v708_v1, %v707_v0  ;;  %v710_v5 = vld [vmem:[%s5446_s5 + $0x18] sm:$0xff] (!%p620_p7) }
  0x23   : > { %v4475_v7 = vpack.c.bf16 %v710_v5, %v709_v2  ;;  %s4868_s3 = scalar_select %p687_p8, %s4844_s23, 1  ;;  %v4027_v9 = vld [vmem:[%s5448_s6] ss:$0 sm:$0xff] }
  0x24   : > { %4473 = vmatpush3.bf16.msra.mxu0 %v4472_v4 }
  0x25   : > { %4474 = vmatprep.subr.bf16.mxu0 %v4702_v3  ;;  %s4872_s28 = sshll.u32 %s4868_s3, 3 }
  0x26   : > { %s690_s16 = scalar_lea.vmem %s5447_s4, %s4872_s28  ;;  %s5431_s4 = smov 104  }
  0x27   : > { %v4878_v8 = vld [vmem:[%s690_s16] sm:$0xff]  ;;  %s5428_s16 = smov 64  }
  0x28   : > { %4476 = vmatpush3.bf16.msra.mxu0 %v4475_v7 }
  0x29   : > { %4257 = vmatprep.subr.mxu0 %v4704_v6 }
  0x2b   : > { %4245 = vmatmul.mubr.msk.f32.vlgmr.msra.gmra.mrb[0].mxu0 %vm718_vm1, %v4878_v8 }
  0x2c   : > { %4259 = vmatprep.mubr.msk.f32.mxu0 %vm4703_vm0, %v4704_v6 }
  0xfe   : > { %v788_v10 = vpop.f32.mrb[0].mxu0 }
  0xff   : > { %v4888_v11 = vadd.f32 %v4027_v9, %v788_v10  ;;  %v4246_v12 = vpop.f32.mrb[1].mxu0 }
 0x101   : > { %965 = vrot.lane.b32.xlu1 %v4888_v11, %s5432_s25  ;;  %793 = vrot.lane.b32.xlu0 %v4888_v11, %s4706_s26  ;;  %s5459_s25 = smov 40  }
 0x105   : > { %1134 = vrot.lane.b32.xlu1 %v4888_v11, %s5430_s2  ;;  %967 = vrot.lane.b32.xlu0 %v4888_v11, %s4708_s27  ;;  %s5435_s2 = smov 8  }
 0x109   : > { %1301 = vrot.lane.b32.xlu1 %v4888_v11, %s5425_s29  ;;  %1132 = vrot.lane.b32.xlu0 %v4888_v11, %s5436_s30  ;;  %s693_s29 = scalar_lea.vmem %s5449_s24, %s4868_s3  ;;  %s5426_s24 = smov 40  }
 0x10a   : > { %v4929_v20 = vld [vmem:[%s693_s29] ss:$0 sm:$0xff]  ;;  %s5429_s29 = smov 56   ;;  %s5458_s30 = smov 48  }
 0x10d   : > { %1299 = vrot.lane.b32.xlu0 %v4888_v11, %s5431_s4  ;;  %s5451_s4 = smov 112  }
 0x173   : > { %v966_v13 = vpop.permute.xlu1 %965  ;;  %v794_v14 = vpop.permute.xlu0 %793 }
 0x174   : > { %4248 = vmatpush3.xpose.msk.msra.mxu1 %vm795_vm2, %v794_v14 }
 0x175   : > { %4252 = vmatprep.subr.mxu1 %v4704_v6 }
 0x177   : > { %4250 = vmatmul.mubr.msk.f32.vlgmr.msra.gmra.mrb[0].mxu1 %vm795_vm2, %v4888_v11  ;;  %v968_v15 = vpop.permute.xlu0 %967  ;;  %v1135_v16 = vpop.permute.xlu1 %1134 }
 0x178   : > { %4258 = vmatpush3.xpose.msk.msra.mxu0 %vm795_vm2, %v968_v15  ;;  %4254 = vmatprep.mubr.msk.f32.mxu1 %vm4703_vm0, %v4704_v6 }
 0x179   : > { %4267 = vmatprep.subr.mxu0 %v4704_v6 }
 0x17b   : > { %4260 = vmatmul.mubr.msk.f32.vlgmr.msra.gmra.mrb[2].mxu0 %vm795_vm2, %v966_v13  ;;  %v1133_v17 = vpop.permute.xlu0 %1132  ;;  %v1302_v18 = vpop.permute.xlu1 %1301 }
 0x17c   : > { %4268 = vmatpush3.xpose.msk.msra.mxu0 %vm795_vm2, %v1135_v16  ;;  %4269 = vmatprep.mubr.msk.f32.mxu0 %vm4703_vm0, %v4704_v6  ;;  %v1483_v16 = vld [vmem:[%s5406_s7] sm:$0xff] }
 0x17d   : > { %4277 = vmatprep.subr.mxu0 %v4704_v6 }
 0x17f   : > { %4270 = vmatmul.mubr.msk.f32.vlgmr.msra.gmra.mrb[4].mxu0 %vm795_vm2, %v1133_v17  ;;  %v1300_v19 = vpop.permute.xlu0 %1299  ;;  %v1484_v17 = vld [vmem:[%s5406_s7 + $0x8] sm:$0xff] }
 0x180   : > { %4278 = vmatpush3.xpose.msk.msra.mxu0 %vm795_vm2, %v1302_v18  ;;  %4279 = vmatprep.mubr.msk.f32.mxu0 %vm4703_vm0, %v4704_v6  ;;  %v4478_v18 = vpack.c.bf16 %v1484_v17, %v1483_v16 }
 0x181   : > { %4477 = vmatprep.subr.bf16.mxu0 %v4702_v3 }
 0x183   : > { %4280 = vmatmul.mubr.msk.f32.vlgmr.msra.gmra.mrb[6].mxu0 %vm795_vm2, %v1300_v19 }
 0x184   : > { %4295 = vmatprep.mubr.msk.f32.mxu0 %vm4703_vm0, %v4704_v6  ;;  %4479 = vmatpush3.bf16.msra.mxu0 %v4478_v18 }
 0x185   : > { %4480 = vmatprep.subr.bf16.mxu0 %v4702_v3 }
 0x24a   : > { %v866_v21 = vpop.f32.mrb[0].mxu1 }
 0x24b   : > { %v870_v22 = vmul.f32 0.35355338, %v866_v21  ;;  %v4251_v23 = vpop.f32.mrb[1].mxu1 }
 0x24d   : > { %v877_v24 = vadd.f32 %v4929_v20, %v870_v22 }
 0x24e   : > { %v1039_v25 = vpop.f32.mrb[2].mxu0 }
 0x24f   : > { %v1043_v26 = vmul.f32 0.35355338, %v1039_v25  ;;  %v4261_v27 = vpop.f32.mrb[3].mxu0  ;;  %v878_v28 = vsel %vm795_vm2, %v877_v24, -inf  ;;  %v1486_v25 = vld [vmem:[%s5406_s7 + $0x18] sm:$0xff] }
 0x250   : > { %879 = vmax.xlane.f32.xlu1 %v878_v28 }
 0x251   : > { %v1044_v29 = vadd.f32 %v4929_v20, %v1043_v26 }
 0x252   : > { %v1206_v30 = vpop.f32.mrb[4].mxu0 }
 0x253   : > { %v1210_v31 = vmul.f32 0.35355338, %v1206_v30  ;;  %v4271_v32 = vpop.f32.mrb[5].mxu0  ;;  %v1045_v33 = vsel %vm795_vm2, %v1044_v29, -inf }
 0x254   : > { %1046 = vmax.xlane.f32.xlu0 %v1045_v33 }
 0x255   : > { %v1211_v34 = vadd.f32 %v4929_v20, %v1210_v31 }
 0x256   : > { %v1373_v35 = vpop.f32.mrb[6].mxu0 }
 0x257   : > { %v1377_v36 = vmul.f32 0.35355338, %v1373_v35  ;;  %v4281_v37 = vpop.f32.mrb[7].mxu0  ;;  %v1212_v38 = vsel %vm795_vm2, %v1211_v34, -inf }
 0x258   : > { %1213 = vmax.xlane.f32.xlu0 %v1212_v38  ;;  %v4042_v37 = vld [vmem:[%s5407_s8] ss:$0 sm:$0xff] }
 0x259   : > { %v1378_v39 = vadd.f32 %v4929_v20, %v1377_v36 }
 0x25b   : > { %v1379_v40 = vsel %vm795_vm2, %v1378_v39, -inf }
 0x25c   : > { %1380 = vmax.xlane.f32.xlu1 %v1379_v40 }
 0x26d   : > { %1056 = vrot.lane.b32.xlu1 %v4888_v11, %s5429_s29  ;;  %s5434_s29 = smov 16  }
 0x2dd   : > { %v880_v41 = vpop.xlane.xlu1 %879 }
 0x2de   : > { %v881_v42 = vsub.f32 %v877_v24, %v880_v41  ;;  %v1485_v24 = vld [vmem:[%s5406_s7 + $0x10] sm:$0xff] }
 0x2df   : > { %v4481_v26 = vpack.c.bf16 %v1486_v25, %v1485_v24 }
 0x2e0   : > { %v882_v43 = vmul.f32 1.442695, %v881_v42 }
 0x2e1   : > { %v1047_v44 = vpop.xlane.xlu0 %1046  ;;  %4482 = vmatpush3.bf16.msra.mxu0 %v4481_v26 }
 0x2e2   : > { %4601 = vpow2.f32 %v882_v43  ;;  %v1048_v45 = vsub.f32 %v1044_v29, %v1047_v44  ;;  %4489 = vmatprep.subr.bf16.mxu0 %v4702_v3 }
 0x2e4   : > { %v1049_v46 = vmul.f32 1.442695, %v1048_v45 }
 0x2e5   : > { %v1214_v56 = vpop.xlane.xlu0 %1213 }
 0x2e6   : > { %4603 = vpow2.f32 %v1049_v46  ;;  %v1215_v57 = vsub.f32 %v1211_v34, %v1214_v56 }
 0x2e8   : > { %v1216_v58 = vmul.f32 1.442695, %v1215_v57  ;;  %v4044_v57 = vld [vmem:[%s5408_s9] ss:$0 sm:$0xff] }
 0x2e9   : > { %v1381_v47 = vpop.xlane.xlu1 %1380 }
 0x2ea   : > { %v1382_v48 = vsub.f32 %v1378_v39, %v1381_v47 }
 0x2ec   : > { %v4602_v49 = vpop.eup %4601  ;;  %v1383_v50 = vmul.f32 1.442695, %v1382_v48  ;;  %v1598_v48 = vld [vmem:[%s5410_s11] sm:$0xff] }
 0x2ed   : > { %v884_v51 = vsel %vm795_vm2, %v4602_v49, 0.0  ;;  %v1057_v61 = vpop.permute.xlu1 %1056 }
 0x2ee   : > { %4605 = vpow2.f32 %v1383_v50  ;;  %885 = vadd.xlane.f32.xlu0 %v884_v51  ;;  %v1601_v51 = vld [vmem:[%s5410_s11 + $0x18] sm:$0xff] }
 0x2ef   : > { %4607 = vpow2.f32 %v1216_v58 }
 0x2f0   : > { %v4604_v52 = vpop.eup %4603 }
 0x2f1   : > { %v1051_v53 = vsel %vm795_vm2, %v4604_v52, 0.0 }
 0x2f2   : > { %1052 = vadd.xlane.f32.xlu1 %v1051_v53 }
 0x2f8   : > { %v4606_v54 = vpop.eup %4605 }
 0x2f9   : > { %v1385_v55 = vsel %vm795_vm2, %v4606_v54, 0.0  ;;  %v4608_v59 = vpop.eup %4607 }
 0x2fa   : > { %1386 = vadd.xlane.f32.xlu1 %v1385_v55  ;;  %v1218_v60 = vsel %vm795_vm2, %v4608_v59, 0.0 }
 0x304   : > { %889 = vrot.lane.b32.xlu0 %v4888_v11, %s5428_s16  ;;  %s5433_s16 = smov 24  }
 0x30b   : > { %1223 = vrot.lane.b32.xlu1 %v4888_v11, %s5427_s1  ;;  %s5452_s1 = smov 120  }
 0x323   : > { %1219 = vadd.xlane.f32.xlu0 %v1218_v60 }
 0x339   : > { %1390 = vrot.lane.b32.xlu0 %v4888_v11, %s5426_s24  ;;  %s5453_s24 = smov 104  }
 0x37b   : > { %v886_v62 = vpop.xlane.xlu0 %885 }
 0x37c   : > { %4609 = vrcp.f32 %v886_v62  ;;  %v1691_v62 = vld [vmem:[%s5412_s13] sm:$0xff] }
 0x37f   : > { %v890_v63 = vpop.permute.xlu0 %889  ;;  %v1053_v0 = vpop.xlane.xlu1 %1052 }
 0x380   : > { %4611 = vrcp.f32 %v1053_v0  ;;  %4253 = vmatpush3.msra.mxu1 %v890_v63  ;;  %v1692_v63 = vld [vmem:[%s5412_s13 + $0x8] sm:$0xff] }
 0x381   : > { %4262 = vmatprep.subr.mxu1 %v4704_v6  ;;  %v4490_v0 = vpack.c.bf16 %v1692_v63, %v1691_v62 }
 0x386   : > { %v4610_v1 = vpop.eup %4609 }
 0x387   : > { %v888_v2 = vmul.f32 %v4610_v1, %v4602_v49  ;;  %v1387_v4 = vpop.xlane.xlu1 %1386  ;;  %v1599_v49 = vld [vmem:[%s5410_s11 + $0x8] sm:$0xff]  ;;  %v1693_v1 = vld [vmem:[%s5412_s13 + $0x10] sm:$0xff] }
 0x388   : > { %v4484_v50 = vpack.c.bf16 %v1599_v49, %v1598_v48  ;;  %v4050_v48 = vld [vmem:[%s5414_s15] ss:$0 sm:$0xff] }
 0x389   : > { %4255 = vmatmul.mubr.msk.f32.vlgmr.msra.gmra.mrb[2].mxu1 %vm795_vm2, %v888_v2  ;;  %v1694_v2 = vld [vmem:[%s5412_s13 + $0x18] sm:$0xff] }
 0x38a   : > { %v4612_v5 = vpop.eup %4611  ;;  %4263 = vmatpush3.msra.mxu1 %v1057_v61  ;;  %4264 = vmatprep.mubr.msk.f32.mxu1 %vm4703_vm0, %v4704_v6 }
 0x38b   : > { %v1055_v7 = vmul.f32 %v4612_v5, %v4604_v52  ;;  %v1224_v9 = vpop.permute.xlu1 %1223  ;;  %4272 = vmatprep.subr.mxu1 %v4704_v6  ;;  %v1695_v5 = vld [vmem:[%s5412_s13 + $0x20] sm:$0xff] }
 0x38d   : > { %4265 = vmatmul.mubr.msk.f32.vlgmr.msra.gmra.mrb[4].mxu1 %vm795_vm2, %v1055_v7  ;;  %v1696_v7 = vld [vmem:[%s5412_s13 + $0x28] sm:$0xff] }
 0x38e   : > { %4273 = vmatpush3.msra.mxu1 %v1224_v9  ;;  %4274 = vmatprep.mubr.msk.f32.mxu1 %vm4703_vm0, %v4704_v6  ;;  %v4496_v9 = vpack.c.bf16 %v1696_v7, %v1695_v5 }
 0x38f   : > { %4282 = vmatprep.subr.mxu1 %v4704_v6 }
 0x3b0   : > { %v1220_v10 = vpop.xlane.xlu0 %1219 }
 0x3b1   : > { %4613 = vrcp.f32 %v1220_v10  ;;  %v1697_v10 = vld [vmem:[%s5412_s13 + $0x30] sm:$0xff] }
 0x3b2   : > { %4615 = vrcp.f32 %v1387_v4  ;;  %v4493_v4 = vpack.c.bf16 %v1694_v2, %v1693_v1 }
 0x3b4   : > { %v1391_v14 = vpop.permute.xlu0 %1390 }
 0x3bb   : > { %v4614_v11 = vpop.eup %4613 }
 0x3bc   : > { %v1222_v12 = vmul.f32 %v4614_v11, %v4608_v59  ;;  %v4616_v13 = vpop.eup %4615  ;;  %v4045_v59 = vld [vmem:[%s5409_s10] ss:$0 sm:$0xff]  ;;  %v1698_v11 = vld [vmem:[%s5412_s13 + $0x38] sm:$0xff] }
 0x3bd   : > { %v1389_v15 = vmul.f32 %v4616_v13, %v4606_v54  ;;  %v4046_v13 = vld [vmem:[%s5411_s12] ss:$0 sm:$0xff] }
 0x3be   : > { %4275 = vmatmul.mubr.msk.f32.vlgmr.msra.gmra.mrb[6].mxu1 %vm795_vm2, %v1222_v12  ;;  %v4499_v12 = vpack.c.bf16 %v1698_v11, %v1697_v10 }
 0x3bf   : > { %4283 = vmatpush3.msra.mxu1 %v1391_v14  ;;  %4284 = vmatprep.mubr.msk.f32.mxu1 %vm4703_vm0, %v4704_v6 }
 0x3c0   : > { %4483 = vmatprep.subr.bf16.mxu1 %v4702_v3 }
 0x3c2   : > { %4285 = vmatmul.mubr.msk.f32.vlgmr.msra.gmra.mrb[8].mxu1 %vm795_vm2, %v1389_v15 }
 0x3c3   : > { %4306 = vmatprep.mubr.msk.f32.mxu1 %vm4703_vm0, %v4704_v6  ;;  %4485 = vmatpush3.bf16.msra.mxu1 %v4484_v50 }
 0x3c4   : > { %4486 = vmatprep.subr.bf16.mxu1 %v4702_v3 }
 0x45c   : > { %v961_v19 = vpop.f32.mrb[2].mxu1 }
 0x45d   : > { %v4256_v21 = vpop.f32.mrb[3].mxu1 }
 0x460   : > { %v1128_v22 = vpop.f32.mrb[4].mxu1 }
 0x461   : > { %1467 = vrot.lane.b32.xlu1 %v1128_v22, %s5435_s2  ;;  %v4266_v23 = vpop.f32.mrb[5].mxu1  ;;  %s5450_s2 = sld [smem:[#allocation13_spill]] }
 0x467   : > { %v4051_v50 = vld [vmem:[%s5450_s2] ss:$0 sm:$0xff] }
 0x491   : > { %v1295_v27 = vpop.f32.mrb[6].mxu1 }
 0x492   : > { %1471 = vrot.lane.b32.xlu0 %v1295_v27, %s5434_s29  ;;  %v4276_v28 = vpop.f32.mrb[7].mxu1  ;;  %v4048_v27 = vld [vmem:[%s5413_s14] ss:$0 sm:$0xff]  ;;  %s5454_s29 = smov 80  }
 0x495   : > { %v1462_v29 = vpop.f32.mrb[8].mxu1 }
 0x496   : > { %1475 = vrot.lane.b32.xlu1 %v1462_v29, %s5433_s16  ;;  %v4286_v30 = vpop.f32.mrb[9].mxu1  ;;  %s5455_s16 = smov 72  }
 0x4d3   : > { %v1468_v31 = vpop.permute.xlu1 %1467 }
 0x4d4   : > { %v1478_v33 = vsel %vm795_vm2, %v961_v19, %v1468_v31 }
 0x504   : > { %v1472_v32 = vpop.permute.xlu0 %1471 }
 0x505   : > { %v1480_v34 = vsel %vm1479_vm3, %v1478_v33, %v1472_v32 }
 0x508   : > { %v1476_v35 = vpop.permute.xlu1 %1475 }
 0x509   : > { %v1482_v36 = vsel %vm1481_vm4, %v1480_v34, %v1476_v35 }
 0x50a   : > { %4296 = vmatmul.mubr.msk.f32.vlgmr.msra.gmra.mrb[8].mxu0 %vm718_vm1, %v1482_v36 }
 0x50b   : > { %4325 = vmatprep.mubr.msk.f32.mxu0 %vm4703_vm0, %v4704_v6  ;;  %4491 = vmatpush3.bf16.msra.mxu0 %v4490_v0 }
 0x50c   : > { %4492 = vmatprep.subr.bf16.mxu0 %v4702_v3 }
 0x50f   : > { %4494 = vmatpush3.bf16.msra.mxu0 %v4493_v4 }
 0x510   : > { %4495 = vmatprep.subr.bf16.mxu0 %v4702_v3 }
 0x513   : > { %4497 = vmatpush3.bf16.msra.mxu0 %v4496_v9 }
 0x514   : > { %4498 = vmatprep.subr.bf16.mxu0 %v4702_v3 }
 0x517   : > { %4500 = vmatpush3.bf16.msra.mxu0 %v4499_v12 }
 0x518   : > { %4349 = vmatprep.subr.mxu0 %v4704_v6 }
 0x5dd   : > { %v1563_v38 = vpop.f32.mrb[8].mxu0 }
 0x5de   : > { %v1564_v39 = vadd.f32 %v4042_v37, %v1563_v38  ;;  %v4297_v40 = vpop.f32.mrb[9].mxu0  ;;  %v4052_v38 = vld [vmem:[%s5446_s5 + $0x20] sm:$0xff] }
 0x5e0   : > { %v1567_v41 = vadd.f32 %v1564_v39, %v4878_v8  ;;  %v1600_v8 = vld [vmem:[%s5410_s11 + $0x10] sm:$0xff]  ;;  %v4053_v39 = vld [vmem:[%s5446_s5 + $0x28] sm:$0xff] }
 0x5e1   : > { %v4487_v52 = vpack.c.bf16 %v1601_v51, %v1600_v8  ;;  %v4502_v40 = vpack.c.bf16 %v4053_v39, %v4052_v38 }
 0x5e2   : > { %v1570_v42 = vsel %vm718_vm1, %v1567_v41, 0.0 }
 0x5e3   : > { %1571 = vadd.xlane.f32.xlu0 %v1570_v42  ;;  %4488 = vmatpush3.bf16.msra.mxu1 %v4487_v52  ;;  %v4055_v42 = vld [vmem:[%s5446_s5 + $0x38] sm:$0xff]  ;;  %v4057_v52 = vld [vmem:[%s5448_s6 + $0x1] ss:$0 sm:$0xff] }
 0x5e4   : > { %4501 = vmatprep.subr.bf16.mxu1 %v4702_v3 }
 0x670   : > { %v1572_v43 = vpop.xlane.xlu0 %1571 }
 0x671   : > { %v1574_v44 = vmul.f32 0.03125, %v1572_v43 }
 0x673   : > { %v1575_v45 = vsub.f32 %v1567_v41, %v1574_v44  ;;  %v4054_v41 = vld [vmem:[%s5446_s5 + $0x30] sm:$0xff] }
 0x674   : > { %v4505_v43 = vpack.c.bf16 %v4055_v42, %v4054_v41 }
 0x675   : > { %v1576_v46 = vmul.f32 %v1575_v45, %v1575_v45 }
 0x677   : > { %v1577_v47 = vsel %vm718_vm1, %v1576_v46, 0.0 }
 0x678   : > { %1578 = vadd.xlane.f32.xlu1 %v1577_v47 }
 0x705   : > { %v1579_v53 = vpop.xlane.xlu1 %1578 }
 0x706   : > { %v1580_v54 = vmul.f32 0.03125, %v1579_v53 }
 0x708   : > { %v1581_v55 = vadd.f32 1e-12, %v1580_v54 }
 0x70a   : > { %4617 = vrsqrt.f32 %v1581_v55 }
 0x714   : > { %v4618_v56 = vpop.eup %4617 }
 0x715   : > { %v1583_v58 = vmul.f32 %v4618_v56, %v1575_v45 }
 0x717   : > { %v1590_v60 = vmul.f32 %v4044_v57, %v1583_v58 }
 0x719   : > { %v1597_v61 = vadd.f32 %v4045_v59, %v1590_v60 }
 0x71b   : > { %4307 = vmatmul.mubr.msk.f32.vlgmr.msra.gmra.mrb[10].mxu1 %vm718_vm1, %v1597_v61 }
 0x71c   : > { %4336 = vmatprep.mubr.msk.f32.mxu1 %vm4703_vm0, %v4704_v6  ;;  %4503 = vmatpush3.bf16.msra.mxu1 %v4502_v40 }
 0x71d   : > { %4504 = vmatprep.subr.bf16.mxu1 %v4702_v3 }
 0x720   : > { %4506 = vmatpush3.bf16.msra.mxu1 %v4505_v43 }
 0x721   : > { %4339 = vmatprep.subr.mxu1 %v4704_v6 }
 0x7ee   : > { %v1678_v14 = vpop.f32.mrb[10].mxu1 }
 0x7ef   : > { %v1679_v15 = vadd.f32 %v4046_v13, %v1678_v14  ;;  %v4308_v16 = vpop.f32.mrb[11].mxu1 }
 0x7f1   : > { %v1682_v17 = vmul.f32 %v1679_v15, %v1679_v15 }
 0x7f3   : > { %v1683_v18 = vmul.f32 %v1682_v17, %v1679_v15 }
 0x7f5   : > { %v1684_v19 = vmul.f32 0.044715, %v1683_v18 }
 0x7f7   : > { %v1685_v21 = vadd.f32 %v1684_v19, %v1679_v15 }
 0x7f9   : > { %v1686_v22 = vmul.f32 0.7978846, %v1685_v21 }
 0x7fb   : > { %4619 = vtanh.f32 %v1686_v22 }
 0x805   : > { %v4620_v23 = vpop.eup %4619 }
 0x806   : > { %v1688_v24 = vadd.f32 1.0, %v4620_v23 }
 0x808   : > { %v1689_v25 = vmul.f32 0.5, %v1688_v24 }
 0x80a   : > { %v1690_v26 = vmul.f32 %v1689_v25, %v1679_v15 }
 0x80c   : > { %4326 = vmatmul.mubr.msk.f32.vlgmr.msra.gmra.mrb[10].mxu0 %vm1706_vm5, %v1690_v26 }
 0x80d   : > { %4351 = vmatprep.mubr.msk.f32.mxu0 %vm4703_vm0, %v4704_v6 }
 0x8df   : > { %v1776_v28 = vpop.f32.mrb[10].mxu0 }
 0x8e0   : > { %v1777_v29 = vadd.f32 %v4048_v27, %v1776_v28  ;;  %v4327_v30 = vpop.f32.mrb[11].mxu0 }
 0x8e2   : > { %v1780_v31 = vadd.f32 %v1777_v29, %v1597_v61 }
 0x8e4   : > { %v1783_v32 = vsel %vm718_vm1, %v1780_v31, 0.0 }
 0x8e5   : > { %1784 = vadd.xlane.f32.xlu0 %v1783_v32 }
 0x972   : > { %v1785_v33 = vpop.xlane.xlu0 %1784 }
 0x973   : > { %v1786_v34 = vmul.f32 0.03125, %v1785_v33 }
 0x975   : > { %v1787_v35 = vsub.f32 %v1780_v31, %v1786_v34 }
 0x977   : > { %v1788_v36 = vmul.f32 %v1787_v35, %v1787_v35 }
 0x979   : > { %v1789_v37 = vsel %vm718_vm1, %v1788_v36, 0.0 }
 0x97a   : > { %1790 = vadd.xlane.f32.xlu0 %v1789_v37 }
 0xa07   : > { %v1791_v44 = vpop.xlane.xlu0 %1790 }
 0xa08   : > { %v1792_v45 = vmul.f32 0.03125, %v1791_v44 }
 0xa0a   : > { %v1793_v46 = vadd.f32 1e-12, %v1792_v45 }
 0xa0c   : > { %4621 = vrsqrt.f32 %v1793_v46 }
 0xa16   : > { %v4622_v47 = vpop.eup %4621 }
 0xa17   : > { %v1795_v49 = vmul.f32 %v4622_v47, %v1787_v35 }
 0xa19   : > { %v1802_v8 = vmul.f32 %v4050_v48, %v1795_v49 }
 0xa1b   : > { %v5078_v51 = vadd.f32 %v4051_v50, %v1802_v8 }
 0xa1d   : > { %4337 = vmatmul.mubr.msk.f32.vlgmr.msra.gmra.mrb[12].mxu1 %vm718_vm1, %v5078_v51 }
 0xa1e   : > { %4341 = vmatprep.mubr.msk.f32.mxu1 %vm4703_vm0, %v4704_v6 }
 0xaf0   : > { %v1892_v53 = vpop.f32.mrb[12].mxu1 }
 0xaf1   : > { %v5087_v54 = vadd.f32 %v4057_v52, %v1892_v53  ;;  %v4338_v55 = vpop.f32.mrb[13].mxu1 }
 0xaf3   : > { %2064 = vrot.lane.b32.xlu0 %v5087_v54, %s4708_s27  ;;  %1897 = vrot.lane.b32.xlu1 %v5087_v54, %s4706_s26  ;;  %s5456_s26 = smov 56   ;;  %s5457_s27 = smov 64  }
 0xaf7   : > { %2229 = vrot.lane.b32.xlu0 %v5087_v54, %s5451_s4  ;;  %2062 = vrot.lane.b32.xlu1 %v5087_v54, %s5452_s1  ;;  %s5461_s4 = smov 16   ;;  %s5462_s1 = smov 24  }
 0xafb   : > { %2396 = vrot.lane.b32.xlu0 %v5087_v54, %s5453_s24  ;;  %2231 = vrot.lane.b32.xlu1 %v5087_v54, %s5454_s29  ;;  %s5463_s24 = sld [smem:[#allocation9_spill]] }
 0xaff   : > { %2398 = vrot.lane.b32.xlu1 %v5087_v54, %s5455_s16  ;;  %s5460_s16 = smov 8  }
 0xb01   : > { %s697_s29 = scalar_lea.vmem %s5463_s24, %s4872_s28 }
 0xb65   : > { %v2065_v56 = vpop.permute.xlu0 %2064  ;;  %v1898_v57 = vpop.permute.xlu1 %1897 }
 0xb66   : > { %4340 = vmatpush3.xpose.msk.msra.mxu1 %vm795_vm2, %v1898_v57  ;;  %4350 = vmatpush3.xpose.msk.msra.mxu0 %vm795_vm2, %v2065_v56 }
 0xb67   : > { %4359 = vmatprep.subr.mxu0 %v4704_v6  ;;  %4344 = vmatprep.subr.mxu1 %v4704_v6 }
 0xb69   : > { %4342 = vmatmul.mubr.msk.f32.vlgmr.msra.gmra.mrb[14].mxu1 %vm795_vm2, %v5087_v54  ;;  %v2063_v58 = vpop.permute.xlu1 %2062  ;;  %v2230_v60 = vpop.permute.xlu0 %2229 }
 0xb6a   : > { %4352 = vmatmul.mubr.msk.f32.vlgmr.msra.gmra.mrb[12].mxu0 %vm795_vm2, %v2063_v58  ;;  %4346 = vmatprep.mubr.msk.f32.mxu1 %vm4703_vm0, %v4704_v6  ;;  %v4071_v58 = vld [vmem:[%s5406_s7 + $0x20] sm:$0xff] }
 0xb6b   : > { %4361 = vmatprep.mubr.msk.f32.mxu0 %vm4703_vm0, %v4704_v6 }
 0xb6d   : > { %v2232_v59 = vpop.permute.xlu1 %2231  ;;  %v2397_v62 = vpop.permute.xlu0 %2396 }
 0xb6e   : > { %4360 = vmatpush3.xpose.msk.msra.mxu0 %vm795_vm2, %v2232_v59  ;;  %v4072_v59 = vld [vmem:[%s5406_s7 + $0x28] sm:$0xff] }
 0xb6f   : > { %4369 = vmatprep.subr.mxu0 %v4704_v6 }
 0xb71   : > { %4362 = vmatmul.mubr.msk.f32.vlgmr.msra.gmra.mrb[14].mxu0 %vm795_vm2, %v2230_v60  ;;  %v2399_v61 = vpop.permute.xlu1 %2398  ;;  %v4508_v60 = vpack.c.bf16 %v4072_v59, %v4071_v58 }
 0xb72   : > { %4370 = vmatpush3.xpose.msk.msra.mxu0 %vm795_vm2, %v2399_v61  ;;  %4371 = vmatprep.mubr.msk.f32.mxu0 %vm4703_vm0, %v4704_v6 }
 0xb73   : > { %4507 = vmatprep.subr.bf16.mxu0 %v4702_v3 }
 0xb75   : > { %4372 = vmatmul.mubr.msk.f32.vlgmr.msra.gmra.mrb[16].mxu0 %vm795_vm2, %v2397_v62 }
 0xb76   : > { %4387 = vmatprep.mubr.msk.f32.mxu0 %vm4703_vm0, %v4704_v6  ;;  %4509 = vmatpush3.bf16.msra.mxu0 %v4508_v60 }
 0xb77   : > { %4510 = vmatprep.subr.bf16.mxu0 %v4702_v3 }
 0xc3c   : > { %v1969_v63 = vpop.f32.mrb[14].mxu1 }
 0xc3d   : > { %v1973_v0 = vmul.f32 0.35355338, %v1969_v63  ;;  %v4343_v1 = vpop.f32.mrb[15].mxu1  ;;  %v2136_v2 = vpop.f32.mrb[12].mxu0 }
 0xc3e   : > { %v2140_v4 = vmul.f32 0.35355338, %v2136_v2  ;;  %v4353_v5 = vpop.f32.mrb[13].mxu0  ;;  %v4073_v1 = vld [vmem:[%s5406_s7 + $0x30] sm:$0xff]  ;;  %v4074_v2 = vld [vmem:[%s5406_s7 + $0x38] sm:$0xff] }
 0xc3f   : > { %v1974_v7 = vadd.f32 %v4929_v20, %v1973_v0 }
 0xc40   : > { %v2141_v9 = vadd.f32 %v4929_v20, %v2140_v4  ;;  %v4511_v4 = vpack.c.bf16 %v4074_v2, %v4073_v1 }
 0xc41   : > { %v1975_v10 = vsel %vm795_vm2, %v1974_v7, -inf }
 0xc42   : > { %1976 = vmax.xlane.f32.xlu1 %v1975_v10  ;;  %v2142_v11 = vsel %vm795_vm2, %v2141_v9, -inf  ;;  %4512 = vmatpush3.bf16.msra.mxu0 %v4511_v4  ;;  %v4098_v4 = vld [vmem:[%s5413_s14 + $0x1] ss:$0 sm:$0xff] }
 0xc43   : > { %2143 = vmax.xlane.f32.xlu0 %v2142_v11  ;;  %4519 = vmatprep.subr.bf16.mxu0 %v4702_v3 }
 0xc44   : > { %v2303_v12 = vpop.f32.mrb[14].mxu0 }
 0xc45   : > { %v2307_v13 = vmul.f32 0.35355338, %v2303_v12  ;;  %v4363_v14 = vpop.f32.mrb[15].mxu0 }
 0xc47   : > { %v2308_v15 = vadd.f32 %v4929_v20, %v2307_v13 }
 0xc48   : > { %v2470_v16 = vpop.f32.mrb[16].mxu0 }
 0xc49   : > { %v2474_v17 = vmul.f32 0.35355338, %v2470_v16  ;;  %v4373_v18 = vpop.f32.mrb[17].mxu0  ;;  %v2309_v19 = vsel %vm795_vm2, %v2308_v15, -inf }
 0xc4a   : > { %2310 = vmax.xlane.f32.xlu0 %v2309_v19 }
 0xc4b   : > { %v2475_v21 = vadd.f32 %v4929_v20, %v2474_v17  ;;  %v4076_v17 = vld [vmem:[%s5407_s8 + $0x1] ss:$0 sm:$0xff] }
 0xc4d   : > { %v2476_v22 = vsel %vm795_vm2, %v2475_v21, -inf }
 0xc4e   : > { %2477 = vmax.xlane.f32.xlu1 %v2476_v22 }
 0xc5f   : > { %2153 = vrot.lane.b32.xlu1 %v5087_v54, %s5456_s26 }
 0xccf   : > { %v1977_v23 = vpop.xlane.xlu1 %1976 }
 0xcd0   : > { %v1978_v24 = vsub.f32 %v1974_v7, %v1977_v23  ;;  %v2144_v25 = vpop.xlane.xlu0 %2143 }
 0xcd1   : > { %v2145_v26 = vsub.f32 %v2141_v9, %v2144_v25 }
 0xcd2   : > { %v1979_v27 = vmul.f32 1.442695, %v1978_v24 }
 0xcd3   : > { %v2146_v28 = vmul.f32 1.442695, %v2145_v26 }
 0xcd4   : > { %4623 = vpow2.f32 %v1979_v27 }
 0xcd5   : > { %4625 = vpow2.f32 %v2146_v28 }
 0xcd7   : > { %v2311_v37 = vpop.xlane.xlu0 %2310 }
 0xcd8   : > { %v2312_v38 = vsub.f32 %v2308_v15, %v2311_v37  ;;  %v4080_v37 = vld [vmem:[%s5408_s9 + $0x1] ss:$0 sm:$0xff] }
 0xcda   : > { %v2313_v39 = vmul.f32 1.442695, %v2312_v38 }
 0xcdb   : > { %v2478_v29 = vpop.xlane.xlu1 %2477 }
 0xcdc   : > { %v2479_v30 = vsub.f32 %v2475_v21, %v2478_v29  ;;  %v4082_v29 = vld [vmem:[%s5410_s11 + $0x20] sm:$0xff] }
 0xcde   : > { %v4624_v31 = vpop.eup %4623  ;;  %v2480_v32 = vmul.f32 1.442695, %v2479_v30  ;;  %v4083_v30 = vld [vmem:[%s5410_s11 + $0x28] sm:$0xff] }
 0xcdf   : > { %v4626_v33 = vpop.eup %4625  ;;  %v1981_v20 = vsel %vm795_vm2, %v4624_v31, 0.0  ;;  %v2154_v42 = vpop.permute.xlu1 %2153 }
 0xce0   : > { %4627 = vpow2.f32 %v2480_v32  ;;  %1982 = vadd.xlane.f32.xlu0 %v1981_v20  ;;  %v2148_v34 = vsel %vm795_vm2, %v4626_v33, 0.0  ;;  %v4085_v32 = vld [vmem:[%s5410_s11 + $0x38] sm:$0xff] }
 0xce1   : > { %2149 = vadd.xlane.f32.xlu1 %v2148_v34  ;;  %4629 = vpow2.f32 %v2313_v39  ;;  %v4081_v39 = vld [vmem:[%s5409_s10 + $0x1] ss:$0 sm:$0xff] }
 0xcea   : > { %v4628_v35 = vpop.eup %4627 }
 0xceb   : > { %v2482_v36 = vsel %vm795_vm2, %v4628_v35, 0.0  ;;  %v4630_v40 = vpop.eup %4629 }
 0xcec   : > { %2483 = vadd.xlane.f32.xlu1 %v2482_v36  ;;  %v2315_v41 = vsel %vm795_vm2, %v4630_v40, 0.0 }
 0xcf6   : > { %1986 = vrot.lane.b32.xlu0 %v5087_v54, %s5457_s27 }
 0xcfd   : > { %2320 = vrot.lane.b32.xlu1 %v5087_v54, %s5458_s30  ;;  %s5464_s30 = sld [smem:[#allocation10_spill]] }
 0xd15   : > { %2316 = vadd.xlane.f32.xlu0 %v2315_v41 }
 0xd2b   : > { %2487 = vrot.lane.b32.xlu0 %v5087_v54, %s5459_s25  ;;  %s701_s25 = scalar_lea.vmem %s5464_s30, %s4872_s28 }
 0xd6d   : > { %v1983_v43 = vpop.xlane.xlu0 %1982 }
 0xd6e   : > { %4631 = vrcp.f32 %v1983_v43  ;;  %v2150_v44 = vpop.xlane.xlu1 %2149  ;;  %v4090_v43 = vld [vmem:[%s5412_s13 + $0x48] sm:$0xff] }
 0xd6f   : > { %4633 = vrcp.f32 %v2150_v44 }
 0xd71   : > { %v1987_v45 = vpop.permute.xlu0 %1986 }
 0xd72   : > { %4345 = vmatpush3.msra.mxu1 %v1987_v45  ;;  %v4091_v45 = vld [vmem:[%s5412_s13 + $0x50] sm:$0xff] }
 0xd73   : > { %4354 = vmatprep.subr.mxu1 %v4704_v6 }
 0xd78   : > { %v4632_v46 = vpop.eup %4631 }
 0xd79   : > { %v1985_v47 = vmul.f32 %v4632_v46, %v4624_v31  ;;  %v2484_v48 = vpop.xlane.xlu1 %2483  ;;  %v4634_v49 = vpop.eup %4633  ;;  %v4514_v31 = vpack.c.bf16 %v4083_v30, %v4082_v29  ;;  %v4092_v46 = vld [vmem:[%s5412_s13 + $0x58] sm:$0xff] }
 0xd7a   : > { %v2152_v50 = vmul.f32 %v4634_v49, %v4626_v33  ;;  %v4094_v49 = vld [vmem:[%s5412_s13 + $0x68] sm:$0xff] }
 0xd7b   : > { %4347 = vmatmul.mubr.msk.f32.vlgmr.msra.gmra.mrb[16].mxu1 %vm795_vm2, %v1985_v47  ;;  %v4523_v47 = vpack.c.bf16 %v4092_v46, %v4091_v45 }
 0xd7c   : > { %4355 = vmatpush3.msra.mxu1 %v2154_v42  ;;  %4356 = vmatprep.mubr.msk.f32.mxu1 %vm4703_vm0, %v4704_v6  ;;  %v4089_v42 = vld [vmem:[%s5412_s13 + $0x40] sm:$0xff] }
 0xd7d   : > { %v2321_v8 = vpop.permute.xlu1 %2320  ;;  %4364 = vmatprep.subr.mxu1 %v4704_v6  ;;  %v4520_v44 = vpack.c.bf16 %v4090_v43, %v4089_v42 }
 0xd7f   : > { %4357 = vmatmul.mubr.msk.f32.vlgmr.msra.gmra.mrb[18].mxu1 %vm795_vm2, %v2152_v50 }
 0xd80   : > { %4365 = vmatpush3.msra.mxu1 %v2321_v8  ;;  %4366 = vmatprep.mubr.msk.f32.mxu1 %vm4703_vm0, %v4704_v6  ;;  %v4095_v8 = vld [vmem:[%s5412_s13 + $0x70] sm:$0xff] }
 0xd81   : > { %4374 = vmatprep.subr.mxu1 %v4704_v6 }
 0xda2   : > { %v2317_v52 = vpop.xlane.xlu0 %2316 }
 0xda3   : > { %4635 = vrcp.f32 %v2317_v52  ;;  %v4096_v52 = vld [vmem:[%s5412_s13 + $0x78] sm:$0xff] }
 0xda4   : > { %4637 = vrcp.f32 %v2484_v48  ;;  %v4093_v48 = vld [vmem:[%s5412_s13 + $0x60] sm:$0xff] }
 0xda5   : > { %v4526_v50 = vpack.c.bf16 %v4094_v49, %v4093_v48 }
 0xda6   : > { %v2488_v56 = vpop.permute.xlu0 %2487 }
 0xdad   : > { %v4636_v53 = vpop.eup %4635 }
 0xdae   : > { %v2319_v54 = vmul.f32 %v4636_v53, %v4630_v40  ;;  %v4638_v55 = vpop.eup %4637  ;;  %v4529_v53 = vpack.c.bf16 %v4096_v52, %v4095_v8 }
 0xdaf   : > { %v2486_v57 = vmul.f32 %v4638_v55, %v4628_v35 }
 0xdb0   : > { %4367 = vmatmul.mubr.msk.f32.vlgmr.msra.gmra.mrb[20].mxu1 %vm795_vm2, %v2319_v54  ;;  %v4087_v54 = vld [vmem:[%s5411_s12 + $0x1] ss:$0 sm:$0xff] }
 0xdb1   : > { %4375 = vmatpush3.msra.mxu1 %v2488_v56  ;;  %4376 = vmatprep.mubr.msk.f32.mxu1 %vm4703_vm0, %v4704_v6 }
 0xdb2   : > { %4513 = vmatprep.subr.bf16.mxu1 %v4702_v3 }
 0xdb4   : > { %4377 = vmatmul.mubr.msk.f32.vlgmr.msra.gmra.mrb[22].mxu1 %vm795_vm2, %v2486_v57 }
 0xdb5   : > { %4398 = vmatprep.mubr.msk.f32.mxu1 %vm4703_vm0, %v4704_v6  ;;  %4515 = vmatpush3.bf16.msra.mxu1 %v4514_v31 }
 0xdb6   : > { %4516 = vmatprep.subr.bf16.mxu1 %v4702_v3 }
 0xe4e   : > { %v2058_v61 = vpop.f32.mrb[16].mxu1 }
 0xe4f   : > { %v4348_v62 = vpop.f32.mrb[17].mxu1 }
 0xe52   : > { %v2225_v63 = vpop.f32.mrb[18].mxu1 }
 0xe53   : > { %2564 = vrot.lane.b32.xlu1 %v2225_v63, %s5460_s16  ;;  %v4358_v0 = vpop.f32.mrb[19].mxu1 }
 0xe83   : > { %v2392_v5 = vpop.f32.mrb[20].mxu1 }
 0xe84   : > { %2568 = vrot.lane.b32.xlu0 %v2392_v5, %s5461_s4  ;;  %v4368_v7 = vpop.f32.mrb[21].mxu1 }
 0xe87   : > { %v2559_v9 = vpop.f32.mrb[22].mxu1 }
 0xe88   : > { %2572 = vrot.lane.b32.xlu1 %v2559_v9, %s5462_s1  ;;  %v4378_v10 = vpop.f32.mrb[23].mxu1 }
 0xec5   : > { %v2565_v11 = vpop.permute.xlu1 %2564 }
 0xec6   : > { %v2575_v13 = vsel %vm795_vm2, %v2058_v61, %v2565_v11 }
 0xef6   : > { %v2569_v12 = vpop.permute.xlu0 %2568 }
 0xef7   : > { %v2576_v14 = vsel %vm1479_vm3, %v2575_v13, %v2569_v12  ;;  %v4719_v12 = vmov 0   ;;  %v3002_v13 = vld [vmem:[%s697_s29] sm:$0xff] }
 0xef8   : > { %4599 = vset.pattern.permute.xlu1 %v4719_v12  ;;  %4600 = vset.pattern.permute.xlu0 %v4719_v12 }
 0xefa   : > { %v2573_v15 = vpop.permute.xlu1 %2572 }
 0xefb   : > { %v2577_v16 = vsel %vm1481_vm4, %v2576_v14, %v2573_v15  ;;  %vm3937_vm4 = vcmask 0  }
 0xefc   : > { %4388 = vmatmul.mubr.msk.f32.vlgmr.msra.gmra.mrb[18].mxu0 %vm718_vm1, %v2577_v16 }
 0xefd   : > { %4417 = vmatprep.mubr.msk.f32.mxu0 %vm4703_vm0, %v4704_v6  ;;  %4521 = vmatpush3.bf16.msra.mxu0 %v4520_v44 }
 0xefe   : > { %4522 = vmatprep.subr.bf16.mxu0 %v4702_v3 }
 0xf01   : > { %4524 = vmatpush3.bf16.msra.mxu0 %v4523_v47  ;;  %v2999_v47 = vld [vmem:[%s5418_s19] sm:$0x1] }
 0xf02   : > { %4525 = vmatprep.subr.bf16.mxu0 %v4702_v3 }
 0xf05   : > { %4527 = vmatpush3.bf16.msra.mxu0 %v4526_v50 }
 0xf06   : > { %4528 = vmatprep.subr.bf16.mxu0 %v4702_v3 }
 0xf09   : > { %4530 = vmatpush3.bf16.msra.mxu0 %v4529_v53 }
 0xf0a   : > { %4441 = vmatprep.subr.mxu0 %v4704_v6 }
 0xfcf   : > { %v2660_v18 = vpop.f32.mrb[18].mxu0 }
 0xfd0   : > { %v2661_v19 = vadd.f32 %v4076_v17, %v2660_v18  ;;  %v4389_v21 = vpop.f32.mrb[19].mxu0 }
 0xfd1   : > { %v2914_v21 = vld [vmem:[%s5416_s17 + $0x8] sm:$0xff] }
 0xfd2   : > { %v2664_v22 = vadd.f32 %v2661_v19, %v5078_v51  ;;  %v4084_v51 = vld [vmem:[%s5410_s11 + $0x30] sm:$0xff]  ;;  %v2913_v19 = vld [vmem:[%s5416_s17] sm:$0xff] }
 0xfd3   : > { %v4517_v33 = vpack.c.bf16 %v4085_v32, %v4084_v51  ;;  %v3004_v51 = vlaneseq }
 0xfd4   : > { %v2669_v23 = vsel %vm718_vm1, %v2664_v22, 0.0 }
 0xfd5   : > { %2670 = vadd.xlane.f32.xlu0 %v2669_v23  ;;  %4518 = vmatpush3.bf16.msra.mxu1 %v4517_v33  ;;  %v2915_v23 = vld [vmem:[%s5416_s17 + $0x10] sm:$0xff]  ;;  %v4102_v33 = vld [vmem:[%s5414_s15 + $0x1] ss:$0 sm:$0xff] }
 0xfd6   : > { %4531 = vmatprep.subr.bf16.mxu1 %v4702_v3 }
0x1062   : > { %v2671_v24 = vpop.xlane.xlu0 %2670 }
0x1063   : > { %v2672_v25 = vmul.f32 0.03125, %v2671_v24  ;;  %v2916_v24 = vld [vmem:[%s5416_s17 + $0x18] sm:$0xff] }
0x1065   : > { %v2673_v26 = vsub.f32 %v2664_v22, %v2672_v25  ;;  %v4532_v22 = vpack.c.bf16 %v2914_v21, %v2913_v19  ;;  %v4535_v25 = vpack.c.bf16 %v2916_v24, %v2915_v23 }
0x1067   : > { %v2674_v27 = vmul.f32 %v2673_v26, %v2673_v26 }
0x1069   : > { %v2675_v28 = vsel %vm718_vm1, %v2674_v27, 0.0 }
0x106a   : > { %2676 = vadd.xlane.f32.xlu1 %v2675_v28  ;;  %v3003_v28 = vld [vmem:[%s701_s25] sm:$0xff] }
0x107b   : > { %3007 = vperm.xlu1 %4599, %v3002_v13  }
0x10f7   : > { %v2677_v20 = vpop.xlane.xlu1 %2676 }
0x10f8   : > { %v2678_v34 = vmul.f32 0.03125, %v2677_v20 }
0x10fa   : > { %v2679_v35 = vadd.f32 1e-12, %v2678_v34  ;;  %v3005_v34 = vand.u32 127, %v3004_v51 }
0x10fc   : > { %4639 = vrsqrt.f32 %v2679_v35  ;;  %v4103_v35 = vld [vmem:[%s5450_s2 + $0x1] ss:$0 sm:$0xff] }
0x1106   : > { %v4640_v36 = vpop.eup %4639 }
0x1107   : > { %v2681_v38 = vmul.f32 %v4640_v36, %v2673_v26  ;;  %v3001_v26 = vld [vmem:[%s5420_s21] sm:$0x1f]  ;;  %v3008_v36 = vpop.permute.xlu1 %3007 }
0x1108   : > { %v3176_v27 = vmul.f32 1.442695, %v3001_v26  ;;  %vm3009_vm7 = vcmp.eq.s32.totalorder %v3005_v34, %v3008_v36 }
0x1109   : > { %v2688_v40 = vmul.f32 %v4080_v37, %v2681_v38 }
0x110b   : > { %v2695_v41 = vadd.f32 %v4081_v39, %v2688_v40  ;;  %v5289_v39 = vsel %vm3009_vm7, 1.0, %v4704_v6  ;;  %v5302_v40 = vshrl.u32 %v3004_v51, 7 }
0x110c   : > { %v3106_v48 = vrot.slane %v5289_v39, 1 }
0x110d   : > { %4399 = vmatmul.mubr.msk.f32.vlgmr.msra.gmra.mrb[24].mxu1 %vm718_vm1, %v2695_v41  ;;  %v3182_v46 = vsub.s32 0, %v5302_v40 }
0x110e   : > { %4428 = vmatprep.mubr.msk.f32.mxu1 %vm4703_vm0, %v4704_v6  ;;  %4533 = vmatpush3.bf16.msra.mxu1 %v4532_v22 }
0x110f   : > { %4534 = vmatprep.subr.bf16.mxu1 %v4702_v3 }
0x1112   : > { %4536 = vmatpush3.bf16.msra.mxu1 %v4535_v25 }
0x1113   : > { %4431 = vmatprep.subr.mxu1 %v4704_v6 }
0x11e0   : > { %v2778_v55 = vpop.f32.mrb[24].mxu1 }
0x11e1   : > { %v2779_v56 = vadd.f32 %v4087_v54, %v2778_v55  ;;  %v4400_v57 = vpop.f32.mrb[25].mxu1 }
0x11e3   : > { %v2782_v58 = vmul.f32 %v2779_v56, %v2779_v56 }
0x11e5   : > { %v2783_v59 = vmul.f32 %v2782_v58, %v2779_v56 }
0x11e7   : > { %v2784_v60 = vmul.f32 0.044715, %v2783_v59  ;;  %v3123_v59 = vmul.f32 %v5289_v39, %v2999_v47 }
0x11e9   : > { %v2785_v61 = vadd.f32 %v2784_v60, %v2779_v56 }
0x11eb   : > { %v2786_v62 = vmul.f32 0.7978846, %v2785_v61  ;;  %v3125_v61 = vsel %vm3124_vm10, %v3123_v59, 0.0 }
0x11ed   : > { %4641 = vtanh.f32 %v2786_v62  ;;  %v3138_v62 = vsel %vm3137_vm11, %v3003_v28, 0.0 }
0x11ee   : > { %4643 = vpow2.f32 %v3176_v27 }
0x11f7   : > { %v4642_v63 = vpop.eup %4641 }
0x11f8   : > { %v2788_v0 = vadd.f32 1.0, %v4642_v63  ;;  %v5276_v29 = vpop.eup %4643 }
0x11fa   : > { %v2789_v1 = vmul.f32 0.5, %v2788_v0 }
0x11fc   : > { %v2790_v2 = vmul.f32 %v2789_v1, %v2779_v56 }
0x11fe   : > { %4418 = vmatmul.mubr.msk.f32.vlgmr.msra.gmra.mrb[20].mxu0 %vm1706_vm5, %v2790_v2 }
0x11ff   : > { %4443 = vmatprep.mubr.msk.f32.mxu0 %vm4703_vm0, %v4704_v6  ;;  %4442 = vmatpush3.msk.msra.mxu0 %vm3032_vm6, %v5276_v29 }
0x1200   : > { %4451 = vmatprep.subr.mxu0 %v4704_v6 }
0x12d1   : > { %v2877_v5 = vpop.f32.mrb[20].mxu0 }
0x12d2   : > { %v2878_v7 = vadd.f32 %v4098_v4, %v2877_v5  ;;  %v4419_v9 = vpop.f32.mrb[21].mxu0 }
0x12d4   : > { %v2881_v10 = vadd.f32 %v2878_v7, %v2695_v41  ;;  %v4104_v41 = vld [vmem:[%s5417_s18] ss:$0 sm:$0xff] }
0x12d6   : > { %v2886_v11 = vsel %vm718_vm1, %v2881_v10, 0.0 }
0x12d7   : > { %2887 = vadd.xlane.f32.xlu0 %v2886_v11 }
0x1364   : > { %v2888_v14 = vpop.xlane.xlu0 %2887 }
0x1365   : > { %v2889_v15 = vmul.f32 0.03125, %v2888_v14 }
0x1367   : > { %v2890_v16 = vsub.f32 %v2881_v10, %v2889_v15 }
0x1369   : > { %v2891_v17 = vmul.f32 %v2890_v16, %v2890_v16 }
0x136b   : > { %v2892_v18 = vsel %vm718_vm1, %v2891_v17, 0.0 }
0x136c   : > { %2893 = vadd.xlane.f32.xlu0 %v2892_v18 }
0x1382   : > { %3015 = vperm.xlu0 %4600, %v3003_v28  }
0x13f9   : > { %v2894_v3 = vpop.xlane.xlu0 %2893 }
0x13fa   : > { %v2895_v30 = vmul.f32 0.03125, %v2894_v3 }
0x13fc   : > { %v2896_v31 = vadd.f32 1e-12, %v2895_v30 }
0x13fe   : > { %4645 = vrsqrt.f32 %v2896_v31 }
0x1401   : > { %v3016_v43 = vpop.permute.xlu0 %3015 }
0x1402   : > { %v3109_v50 = vrot.slane %v3016_v43, 1 }
0x1408   : > { %v4646_v32 = vpop.eup %4645 }
0x1409   : > { %v2898_v20 = vmul.f32 %v4646_v32, %v2890_v16 }
0x140b   : > { %v2905_v37 = vmul.f32 %v4102_v33, %v2898_v20 }
0x140d   : > { %v2912_v38 = vadd.f32 %v4103_v35, %v2905_v37 }
0x140f   : > { %4429 = vmatmul.mubr.msk.f32.vlgmr.msra.gmra.mrb[26].mxu1 %vm718_vm1, %v2912_v38  ;;  %v5328_v38 = vld [vmem:[%s5419_s20] sm:$0x1] }
0x1410   : > { %4432 = vmatpush3.msk.msra.mxu1 %vm3032_vm6, %v3001_v26  ;;  %4433 = vmatprep.mubr.msk.f32.mxu1 %vm4703_vm0, %v4704_v6 }
0x1411   : > { %4436 = vmatprep.subr.mxu1 %v4704_v6 }
0x1413   : > { %4434 = vmatmul.mubr.msk.f32.vlgmr.msra.gmra.mrb[28].mxu1 %vm2997_vm8, %v5289_v39 }
0x1414   : > { %4437 = vmatpush3.msk.msra.mxu1 %vm3032_vm6, %v5276_v29  ;;  %4438 = vmatprep.mubr.msk.f32.mxu1 %vm4703_vm0, %v4704_v6 }
0x1415   : > { %4446 = vmatprep.subr.mxu1 %v4704_v6 }
0x14e2   : > { %v2993_v42 = vpop.f32.mrb[26].mxu1 }
0x14e3   : > { %v2994_v44 = vadd.f32 %v4104_v41, %v2993_v42  ;;  %v4430_v45 = vpop.f32.mrb[27].mxu1 }
0x14e5   : > { %2998 = vst.msk [vmem:[#allocation2] sm:$0xff] %vm2997_vm8, %v2994_v44  ;;  %v3012_v49 = vmul.f32 %v5289_v39, %v2994_v44  ;;  %v3178_v8 = vadd.f32 %v2999_v47, %v2994_v44 }
0x14e6   : > { %v3102_v52 = vpop.f32.mrb[28].mxu1 }
0x14e7   : > { %v3108_v53 = vmul.f32 %v3106_v48, %v3102_v52  ;;  %v3018_v54 = vmul.f32 %v3016_v43, %v3012_v49  ;;  %v4435_v55 = vpop.f32.mrb[29].mxu1  ;;  %v5314_v56 = vrot.slane %v3178_v8, %v3182_v46 }
0x14e9   : > { %v3019_v57 = vsel %vm2997_vm8, %v3018_v54, 0.0  ;;  %v3111_v58 = vmul.f32 %v3109_v50, %v3108_v53 }
0x14ea   : > { %3020 = vadd.xlane.f32.xlu1 %v3019_v57 }
0x14eb   : > { %v3113_v60 = vsel %vm3112_vm9, %v3111_v58, 0.0 }
0x14ec   : > { %3114 = vadd.xlane.f32.xlu0 %v3113_v60 }
0x14ee   : > { %3126 = vadd.xlane.f32.xlu1 %v3125_v61 }
0x14f2   : > { %3139 = vadd.xlane.f32.xlu1 %v3138_v62  ;;  %v4114_v62 = vld [vmem:[#allocation2 + $0x1] ss:$0 sm:$0xff] }
0x1577   : > { %v3021_v63 = vpop.xlane.xlu1 %3020 }
0x1578   : > { %v3022_v0 = vrot.slane %v3021_v63, 4 }
0x1579   : > { %v3115_v1 = vpop.xlane.xlu0 %3114 }
0x157a   : > { %v3023_v2 = vadd.f32 %v3022_v0, %v3021_v63  ;;  %v3116_v4 = vrot.slane %v3115_v1, 4 }
0x157b   : > { %v3127_v5 = vpop.xlane.xlu1 %3126 }
0x157c   : > { %v3024_v7 = vrot.slane %v3023_v2, 2  ;;  %v3117_v9 = vadd.f32 %v3116_v4, %v3115_v1  ;;  %v3128_v10 = vrot.slane %v3127_v5, 4 }
0x157e   : > { %v3118_v11 = vrot.slane %v3117_v9, 2  ;;  %v3129_v12 = vadd.f32 %v3128_v10, %v3127_v5  ;;  %v3025_v13 = vadd.f32 %v3024_v7, %v3023_v2 }
0x157f   : > { %v3140_v14 = vpop.xlane.xlu1 %3139 }
0x1580   : > { %v3130_v15 = vrot.slane %v3129_v12, 2  ;;  %v3141_v16 = vrot.slane %v3140_v14, 4  ;;  %v3026_v17 = vrot.slane %v3025_v13, 1  ;;  %v3119_v18 = vadd.f32 %v3118_v11, %v3117_v9 }
0x1582   : > { %v3142_v19 = vadd.f32 %v3141_v16, %v3140_v14  ;;  %v3027_v21 = vadd.f32 %v3026_v17, %v3025_v13  ;;  %v3120_v22 = vrot.slane %v3119_v18, 1  ;;  %v3131_v23 = vadd.f32 %v3130_v15, %v3129_v12 }
0x1584   : > { %v3143_v24 = vrot.slane %v3142_v19, 2  ;;  %4537 = vpush %v3027_v21  ;;  %v3121_v25 = vadd.f32 %v3120_v22, %v3119_v18  ;;  %v3132_v26 = vrot.slane %v3131_v23, 1  ;;  %v4117_v22 = vld [vmem:[#allocation2 + $0x2] ss:$0 sm:$0xff] }
0x1586   : > { %4539 = vpush %v3121_v25  ;;  %v3133_v27 = vadd.f32 %v3132_v26, %v3131_v23  ;;  %v3144_v28 = vadd.f32 %v3143_v24, %v3142_v19 }
0x1588   : > { %4541 = vpush %v3133_v27  ;;  %v3145_v3 = vrot.slane %v3144_v28, 1 }
0x158a   : > { %v3146_v30 = vadd.f32 %v3145_v3, %v3144_v28 }
0x158c   : > { %4543 = vpush %v3146_v30 }
0x15b5   : > { %s4538_s30 = spop %4537 }
0x15b7   : > { %s4540_s25 = spop %4539 }
0x15b9   : > { %s4542_s4 = spop %4541 }
0x15ba   : > { %s3173_s1 = sadd.f32 %s4542_s4, %s4538_s30 }
0x15bc   : > { %s5319_s28 = sadd.f32 %s4540_s25, %s3173_s1 }
0x15bd   : > { %s4544_s24 = spop %4543 }
0x15be   : > { %p4545_p9 = scmp.lt.s32.totalorder %s4544_s24, 0  ;;  %s4546_s29 = sceil.f32 %s4544_s24 }
0x15bf   : > { %s4547_s16 = sfloor.f32 %s4544_s24 }
0x15c0   : > { %s5466_s29 = smov (!%p4545_p9, %s4546_s29), %s4547_s16 }
0x15c1   : > { %s4549_s26 = scvt.f32.s32 %s5466_s29  ;;  %s5346_s29 = sshll.u32 %s4844_s23, 7 }
0x15c2   : > { %s3187_s16 = sadd.s32 1, %s5346_s29  ;;  %s3287_s30 = sadd.s32 2, %s5346_s29 }
0x15c3   : > { %s4109_s27 = sadd.s32 4294967295, %s4549_s26  ;;  %s3188_s26 = sld [smem:[#allocation4 + %s3187_s16]] }
0x15c4   : > { %v3150_v31 = vstv %s4109_s27  ;;  %s3288_s25 = sld [smem:[#allocation4 + %s3287_s30]] }
0x15c5   : > { %vm3151_vm12 = vcmp.eq.s32.totalorder %v5302_v40, %v3150_v31 }
0x15c6   : > { %v4110_v51 = vsel %vm3151_vm12, 1.0, %v4704_v6 }
0x15c7   : > { %v3154_v32 = vmul.f32 %v4110_v51, %v5289_v39  ;;  %v3191_v39 = vsel %vm2997_vm8, %v5314_v56, -inf }
0x15c9   : > { %v3155_v33 = vsel %vm2997_vm8, %v3154_v32, 0.0  ;;  %p3189_p10 = scmp.gt.s32.totalorder %s3188_s26, 0  ;;  %s3390_s26 = sadd.s32 3, %s5346_s29 }
0x15ca   : > { %v3156_v20 = vrot.slane %v3155_v33, 4  ;;  %p3289_p11 = scmp.gt.s32.totalorder %s3288_s25, 0  ;;  %s3493_s25 = sadd.s32 4, %s5346_s29 }
0x15cb   : > { %s3283_s27 = scalar_select %p3189_p10, 1, 0 }
0x15cc   : > { %v3157_v34 = vadd.f32 %v3156_v20, %v3155_v33 }
0x15cd   : > { %v3284_v60 = vstv %s3283_s27  ;;  %s3391_s27 = sld [smem:[#allocation4 + %s3390_s26]] }
0x15ce   : > { %v3158_v35 = vrot.slane %v3157_v34, 2  ;;  %vm3285_vm13 = vcmp.eq.s32.totalorder %v3284_v60, 1 }
0x15d0   : > { %v3159_v36 = vadd.f32 %v3158_v35, %v3157_v34 }
0x15d2   : > { %v3160_v37 = vrot.slane %v3159_v36, 1 }
0x15d3   : > { %p3392_p12 = scmp.gt.s32.totalorder %s3391_s27, 0  ;;  %s3596_s27 = sadd.s32 5, %s5346_s29 }
0x15d4   : > { %v3161_v41 = vadd.f32 %v3160_v37, %v3159_v36 }
0x15d6   : > { %v3162_v42 = vmul.f32 %v3161_v41, %v5328_v38 }
0x15d8   : > { %v3163_v40 = vsel %vm3124_vm10, %v3162_v42, 0.0 }
0x15d9   : > { %3164 = vadd.xlane.f32.xlu1 %v3163_v40 }
0x15dd   : > { %3192 = vmax.xlane.f32.xlu1 %v3191_v39  ;;  %v4120_v39 = vld [vmem:[#allocation2 + $0x3] ss:$0 sm:$0xff] }
0x1666   : > { %v3165_v43 = vpop.xlane.xlu1 %3164 }
0x1667   : > { %v3166_v44 = vrot.slane %v3165_v43, 4 }
0x1669   : > { %v3167_v45 = vadd.f32 %v3166_v44, %v3165_v43 }
0x166a   : > { %v3193_v50 = vpop.xlane.xlu1 %3192 }
0x166b   : > { %v3168_v46 = vrot.slane %v3167_v45, 2 }
0x166d   : > { %v3169_v47 = vadd.f32 %v3168_v46, %v3167_v45 }
0x166f   : > { %v3170_v48 = vrot.slane %v3169_v47, 1 }
0x1671   : > { %v3171_v49 = vadd.f32 %v3170_v48, %v3169_v47 }
0x1673   : > { %4550 = vpush %v3171_v49 }
0x1674   : > { %4552 = vpush %v3193_v50 }
0x16a4   : > { %s5334_s4 = spop %4550 }
0x16a5   : > { %s3175_s1 = sadd.f32 %s5334_s4, %s5319_s28  ;;  %s4553_s24 = spop %4552 }
0x16a6   : > { %v3195_v8 = vstv %s4553_s24  ;;  %s3386_s24 = scalar_select %p3289_p11, 1, 0 }
0x16a7   : > { %v3196_v52 = vsub.f32 %v5314_v56, %v3195_v8 }
0x16a8   : > { %v3387_v19 = vstv %s3386_s24  ;;  %s3494_s24 = sld [smem:[#allocation4 + %s3493_s25]] }
0x16a9   : > { %v3197_v53 = vmul.f32 1.442695, %v3196_v52  ;;  %vm3388_vm14 = vcmp.eq.s32.totalorder %v3387_v19, 1 }
0x16ab   : > { %4647 = vpow2.f32 %v3197_v53 }
0x16ae   : > { %p3495_p13 = scmp.gt.s32.totalorder %s3494_s24, 0  ;;  %s3699_s24 = sadd.s32 6, %s5346_s29 }
0x16b5   : > { %v4648_v54 = vpop.eup %4647 }
0x16b6   : > { %4439 = vmatmul.mubr.msk.f32.vlgmr.msra.gmra.mrb[30].mxu1 %vm2997_vm8, %v4648_v54 }
0x16b7   : > { %4447 = vmatpush3.msk.msra.mxu1 %vm3032_vm6, %v5276_v29  ;;  %4448 = vmatprep.mubr.msk.f32.mxu1 %vm4703_vm0, %v4704_v6 }
0x16b8   : > { %4456 = vmatprep.subr.mxu1 %v4704_v6 }
0x1789   : > { %v3271_v55 = vpop.f32.mrb[30].mxu1 }
0x178a   : > { %4649 = vlog2.f32 %v3271_v55  ;;  %v4440_v57 = vpop.f32.mrb[31].mxu1 }
0x1794   : > { %v4650_v58 = vpop.eup %4649 }
0x1795   : > { %v3276_v59 = vmul.f32 0.6931472, %v4650_v58 }
0x1797   : > { %v3277_v61 = vadd.f32 %v3276_v59, %v3195_v8 }
0x1799   : > { %v3282_v63 = vadd.f32 %v4114_v62, %v3277_v61 }
0x179b   : > { %v3286_v0 = vsel %vm3285_vm13, %v3282_v63, %v5314_v56 }
0x179c   : > { %v3291_v1 = vsel %vm2997_vm8, %v3286_v0, -inf }
0x179d   : > { %3292 = vmax.xlane.f32.xlu1 %v3291_v1 }
0x182a   : > { %v3293_v2 = vpop.xlane.xlu1 %3292 }
0x182b   : > { %v3294_v4 = vrot.slane %v3293_v2, 4 }
0x182d   : > { %v3295_v5 = vmax.f32 %v3293_v2, %v3294_v4 }
0x182f   : > { %v3296_v7 = vrot.slane %v3295_v5, 2 }
0x1831   : > { %v3297_v9 = vmax.f32 %v3295_v5, %v3296_v7 }
0x1833   : > { %v3298_v10 = vrot.slane %v3297_v9, 1 }
0x1835   : > { %v3299_v11 = vmax.f32 %v3297_v9, %v3298_v10 }
0x1837   : > { %4554 = vpush %v3299_v11 }
0x1868   : > { %s4555_s23 = spop %4554 }
0x1869   : > { %v3301_v12 = vstv %s4555_s23  ;;  %s3489_s23 = scalar_select %p3392_p12, 1, 0 }
0x186a   : > { %v3302_v13 = vsub.f32 %v3286_v0, %v3301_v12 }
0x186b   : > { %v3490_v42 = vstv %s3489_s23  ;;  %s3597_s23 = sld [smem:[#allocation4 + %s3596_s27]] }
0x186c   : > { %v3303_v14 = vmul.f32 1.442695, %v3302_v13  ;;  %vm3491_vm15 = vcmp.eq.s32.totalorder %v3490_v42, 1 }
0x186e   : > { %4651 = vpow2.f32 %v3303_v14 }
0x1871   : > { %p3598_p0 = scmp.gt.s32.totalorder %s3597_s23, 0  ;;  %s3802_s23 = sadd.s32 7, %s5346_s29 }
0x1878   : > { %v4652_v15 = vpop.eup %4651 }
0x1879   : > { %4444 = vmatmul.mubr.msk.f32.vlgmr.msra.gmra.mrb[22].mxu0 %vm2997_vm8, %v4652_v15 }
0x187a   : > { %4452 = vmatpush3.msk.msra.mxu0 %vm3032_vm6, %v5276_v29  ;;  %4453 = vmatprep.mubr.msk.f32.mxu0 %vm4703_vm0, %v4704_v6 }
0x187b   : > { %4461 = vmatprep.subr.mxu0 %v4704_v6 }
0x194c   : > { %v3374_v56 = vpop.f32.mrb[22].mxu0 }
0x194d   : > { %4653 = vlog2.f32 %v3374_v56  ;;  %v4445_v16 = vpop.f32.mrb[23].mxu0 }
0x1957   : > { %v4654_v17 = vpop.eup %4653 }
0x1958   : > { %v3379_v18 = vmul.f32 0.6931472, %v4654_v17 }
0x195a   : > { %v3380_v21 = vadd.f32 %v3379_v18, %v3301_v12 }
0x195c   : > { %v3385_v23 = vadd.f32 %v4117_v22, %v3380_v21 }
0x195e   : > { %v3389_v24 = vsel %vm3388_vm14, %v3385_v23, %v3286_v0  ;;  %v4123_v0 = vld [vmem:[#allocation2 + $0x4] ss:$0 sm:$0xff] }
0x195f   : > { %v3394_v25 = vsel %vm2997_vm8, %v3389_v24, -inf }
0x1960   : > { %3395 = vmax.xlane.f32.xlu1 %v3394_v25 }
0x19ed   : > { %v3396_v26 = vpop.xlane.xlu1 %3395 }
0x19ee   : > { %v3397_v27 = vrot.slane %v3396_v26, 4 }
0x19f0   : > { %v3398_v28 = vmax.f32 %v3396_v26, %v3397_v27 }
0x19f2   : > { %v3399_v3 = vrot.slane %v3398_v28, 2 }
0x19f4   : > { %v3400_v30 = vmax.f32 %v3398_v28, %v3399_v3 }
0x19f6   : > { %v3401_v31 = vrot.slane %v3400_v30, 1 }
0x19f8   : > { %v3402_v51 = vmax.f32 %v3400_v30, %v3401_v31 }
0x19fa   : > { %4556 = vpush %v3402_v51 }
0x1a2b   : > { %s4557_s16 = spop %4556 }
0x1a2c   : > { %v3404_v32 = vstv %s4557_s16  ;;  %s3592_s16 = scalar_select %p3495_p13, 1, 0 }
0x1a2d   : > { %v3405_v33 = vsub.f32 %v3389_v24, %v3404_v32 }
0x1a2e   : > { %v3593_v62 = vstv %s3592_s16  ;;  %s3700_s16 = sld [smem:[#allocation4 + %s3699_s24]] }
0x1a2f   : > { %v3406_v20 = vmul.f32 1.442695, %v3405_v33  ;;  %vm3594_vm1 = vcmp.eq.s32.totalorder %v3593_v62, 1 }
0x1a31   : > { %4655 = vpow2.f32 %v3406_v20 }
0x1a34   : > { %p3701_p1 = scmp.gt.s32.totalorder %s3700_s16, 0 }
0x1a3b   : > { %v4656_v34 = vpop.eup %4655 }
0x1a3c   : > { %4449 = vmatmul.mubr.msk.f32.vlgmr.msra.gmra.mrb[32].mxu1 %vm2997_vm8, %v4656_v34 }
0x1a3d   : > { %4457 = vmatpush3.msk.msra.mxu1 %vm3032_vm6, %v5276_v29  ;;  %4458 = vmatprep.mubr.msk.f32.mxu1 %vm4703_vm0, %v4704_v6 }
0x1a3e   : > { %4466 = vmatprep.subr.mxu1 %v4704_v6 }
0x1b0f   : > { %v3477_v35 = vpop.f32.mrb[32].mxu1 }
0x1b10   : > { %4657 = vlog2.f32 %v3477_v35  ;;  %v4450_v36 = vpop.f32.mrb[33].mxu1 }
0x1b1a   : > { %v4658_v37 = vpop.eup %4657 }
0x1b1b   : > { %v3482_v41 = vmul.f32 0.6931472, %v4658_v37 }
0x1b1d   : > { %v3483_v40 = vadd.f32 %v3482_v41, %v3404_v32 }
0x1b1f   : > { %v3488_v43 = vadd.f32 %v4120_v39, %v3483_v40  ;;  %v4129_v39 = vld [vmem:[#allocation2 + $0x6] ss:$0 sm:$0xff] }
0x1b21   : > { %v3492_v44 = vsel %vm3491_vm15, %v3488_v43, %v3389_v24  ;;  %v4126_v24 = vld [vmem:[#allocation2 + $0x5] ss:$0 sm:$0xff] }
0x1b22   : > { %v3497_v45 = vsel %vm2997_vm8, %v3492_v44, -inf }
0x1b23   : > { %3498 = vmax.xlane.f32.xlu1 %v3497_v45 }
0x1bb0   : > { %v3499_v46 = vpop.xlane.xlu1 %3498 }
0x1bb1   : > { %v3500_v47 = vrot.slane %v3499_v46, 4 }
0x1bb3   : > { %v3501_v48 = vmax.f32 %v3499_v46, %v3500_v47 }
0x1bb5   : > { %v3502_v49 = vrot.slane %v3501_v48, 2 }
0x1bb7   : > { %v3503_v50 = vmax.f32 %v3501_v48, %v3502_v49 }
0x1bb9   : > { %v3504_v8 = vrot.slane %v3503_v50, 1 }
0x1bbb   : > { %v3505_v52 = vmax.f32 %v3503_v50, %v3504_v8 }
0x1bbd   : > { %4558 = vpush %v3505_v52 }
0x1bee   : > { %s4559_s30 = spop %4558 }
0x1bef   : > { %v3507_v53 = vstv %s4559_s30  ;;  %s3695_s30 = scalar_select %p3598_p0, 1, 0 }
0x1bf0   : > { %v3508_v54 = vsub.f32 %v3492_v44, %v3507_v53 }
0x1bf1   : > { %v3696_v22 = vstv %s3695_s30  ;;  %s3803_s30 = sld [smem:[#allocation4 + %s3802_s23]] }
0x1bf2   : > { %v3509_v55 = vmul.f32 1.442695, %v3508_v54  ;;  %vm3697_vm2 = vcmp.eq.s32.totalorder %v3696_v22, 1 }
0x1bf4   : > { %4659 = vpow2.f32 %v3509_v55 }
0x1bf7   : > { %p3804_p2 = scmp.gt.s32.totalorder %s3803_s30, 0  ;;  %s704_s30 = scalar_lea.vmem %s5421_s22, %s4868_s3 }
0x1bfe   : > { %v4660_v57 = vpop.eup %4659 }
0x1bff   : > { %4454 = vmatmul.mubr.msk.f32.vlgmr.msra.gmra.mrb[24].mxu0 %vm2997_vm8, %v4660_v57 }
0x1c00   : > { %4462 = vmatpush3.msk.msra.mxu0 %vm3032_vm6, %v5276_v29  ;;  %4463 = vmatprep.mubr.msk.f32.mxu0 %vm4703_vm0, %v4704_v6 }
0x1cd2   : > { %v3580_v58 = vpop.f32.mrb[24].mxu0 }
0x1cd3   : > { %4661 = vlog2.f32 %v3580_v58  ;;  %v4455_v59 = vpop.f32.mrb[25].mxu0 }
0x1cdd   : > { %v4662_v60 = vpop.eup %4661 }
0x1cde   : > { %v3585_v61 = vmul.f32 0.6931472, %v4662_v60 }
0x1ce0   : > { %v3586_v63 = vadd.f32 %v3585_v61, %v3507_v53 }
0x1ce2   : > { %v3591_v1 = vadd.f32 %v4123_v0, %v3586_v63  ;;  %v4132_v0 = vld [vmem:[#allocation2 + $0x7] ss:$0 sm:$0xff] }
0x1ce4   : > { %v3595_v2 = vsel %vm3594_vm1, %v3591_v1, %v3492_v44 }
0x1ce5   : > { %v3600_v4 = vsel %vm2997_vm8, %v3595_v2, -inf }
0x1ce6   : > { %3601 = vmax.xlane.f32.xlu0 %v3600_v4 }
0x1d73   : > { %v3602_v5 = vpop.xlane.xlu0 %3601 }
0x1d74   : > { %v3603_v7 = vrot.slane %v3602_v5, 4 }
0x1d76   : > { %v3604_v9 = vmax.f32 %v3602_v5, %v3603_v7 }
0x1d78   : > { %v3605_v10 = vrot.slane %v3604_v9, 2 }
0x1d7a   : > { %v3606_v11 = vmax.f32 %v3604_v9, %v3605_v10 }
0x1d7c   : > { %v3607_v12 = vrot.slane %v3606_v11, 1 }
0x1d7e   : > { %v3608_v13 = vmax.f32 %v3606_v11, %v3607_v12 }
0x1d80   : > { %4560 = vpush %v3608_v13 }
0x1db1   : > { %s4561_s26 = spop %4560 }
0x1db2   : > { %v3610_v14 = vstv %s4561_s26  ;;  %s3798_s26 = scalar_select %p3701_p1, 1, 0 }
0x1db3   : > { %v3611_v15 = vsub.f32 %v3595_v2, %v3610_v14 }
0x1db4   : > { %v3799_v42 = vstv %s3798_s26 }
0x1db5   : > { %v3612_v56 = vmul.f32 1.442695, %v3611_v15 }
0x1db7   : > { %4663 = vpow2.f32 %v3612_v56 }
0x1dc1   : > { %v4664_v16 = vpop.eup %4663 }
0x1dc2   : > { %4459 = vmatmul.mubr.msk.f32.vlgmr.msra.gmra.mrb[34].mxu1 %vm2997_vm8, %v4664_v16 }
0x1dc3   : > { %4467 = vmatpush3.msk.msra.mxu1 %vm3032_vm6, %v5276_v29  ;;  %4468 = vmatprep.mubr.msk.f32.mxu1 %vm4703_vm0, %v4704_v6  ;;  %vm3800_vm0 = vcmp.eq.s32.totalorder %v3799_v42, 1 }
0x1e95   : > { %v3683_v17 = vpop.f32.mrb[34].mxu1 }
0x1e96   : > { %4665 = vlog2.f32 %v3683_v17  ;;  %v4460_v18 = vpop.f32.mrb[35].mxu1 }
0x1ea0   : > { %v4666_v19 = vpop.eup %4665 }
0x1ea1   : > { %v3688_v21 = vmul.f32 0.6931472, %v4666_v19 }
0x1ea3   : > { %v3689_v23 = vadd.f32 %v3688_v21, %v3610_v14 }
0x1ea5   : > { %v3694_v25 = vadd.f32 %v4126_v24, %v3689_v23 }
0x1ea7   : > { %v3698_v26 = vsel %vm3697_vm2, %v3694_v25, %v3595_v2 }
0x1ea8   : > { %v3703_v29 = vsel %vm2997_vm8, %v3698_v26, -inf }
0x1ea9   : > { %3704 = vmax.xlane.f32.xlu1 %v3703_v29 }
0x1f36   : > { %v3705_v6 = vpop.xlane.xlu1 %3704 }
0x1f37   : > { %v3706_v27 = vrot.slane %v3705_v6, 4 }
0x1f39   : > { %v3707_v28 = vmax.f32 %v3705_v6, %v3706_v27 }
0x1f3b   : > { %v3708_v3 = vrot.slane %v3707_v28, 2 }
0x1f3d   : > { %v3709_v30 = vmax.f32 %v3707_v28, %v3708_v3 }
0x1f3f   : > { %v3710_v31 = vrot.slane %v3709_v30, 1 }
0x1f41   : > { %v3711_v51 = vmax.f32 %v3709_v30, %v3710_v31 }
0x1f43   : > { %4562 = vpush %v3711_v51 }
0x1f74   : > { %s4563_s25 = spop %4562 }
0x1f75   : > { %v3713_v32 = vstv %s4563_s25  ;;  %s3901_s25 = scalar_select %p3804_p2, 1, 0 }
0x1f76   : > { %v3714_v33 = vsub.f32 %v3698_v26, %v3713_v32 }
0x1f77   : > { %v3902_v62 = vstv %s3901_s25 }
0x1f78   : > { %v3715_v20 = vmul.f32 1.442695, %v3714_v33  ;;  %vm3903_vm3 = vcmp.eq.s32.totalorder %v3902_v62, 1 }
0x1f7a   : > { %4667 = vpow2.f32 %v3715_v20 }
0x1f84   : > { %v4668_v34 = vpop.eup %4667 }
0x1f85   : > { %4464 = vmatmul.mubr.msk.f32.vlgmr.msra.gmra.mrb[26].mxu0 %vm2997_vm8, %v4668_v34 }
0x2058   : > { %v3786_v35 = vpop.f32.mrb[26].mxu0 }
0x2059   : > { %4669 = vlog2.f32 %v3786_v35  ;;  %v4465_v36 = vpop.f32.mrb[27].mxu0 }
0x2063   : > { %v4670_v37 = vpop.eup %4669 }
0x2064   : > { %v3791_v41 = vmul.f32 0.6931472, %v4670_v37 }
0x2066   : > { %v3792_v40 = vadd.f32 %v3791_v41, %v3713_v32 }
0x2068   : > { %v3797_v43 = vadd.f32 %v4129_v39, %v3792_v40 }
0x206a   : > { %v3801_v44 = vsel %vm3800_vm0, %v3797_v43, %v3698_v26 }
0x206b   : > { %v3806_v45 = vsel %vm2997_vm8, %v3801_v44, -inf }
0x206c   : > { %3807 = vmax.xlane.f32.xlu0 %v3806_v45 }
0x20f9   : > { %v3808_v46 = vpop.xlane.xlu0 %3807 }
0x20fa   : > { %v3809_v47 = vrot.slane %v3808_v46, 4 }
0x20fc   : > { %v3810_v48 = vmax.f32 %v3808_v46, %v3809_v47 }
0x20fe   : > { %v3811_v49 = vrot.slane %v3810_v48, 2 }
0x2100   : > { %v3812_v50 = vmax.f32 %v3810_v48, %v3811_v49 }
0x2102   : > { %v3813_v8 = vrot.slane %v3812_v50, 1 }
0x2104   : > { %v3814_v52 = vmax.f32 %v3812_v50, %v3813_v8 }
0x2106   : > { %4564 = vpush %v3814_v52 }
0x2137   : > { %s4565_s27 = spop %4564 }
0x2138   : > { %v3816_v53 = vstv %s4565_s27 }
0x2139   : > { %v3817_v54 = vsub.f32 %v3801_v44, %v3816_v53 }
0x213b   : > { %v3818_v55 = vmul.f32 1.442695, %v3817_v54 }
0x213d   : > { %4671 = vpow2.f32 %v3818_v55 }
0x2147   : > { %v4672_v57 = vpop.eup %4671 }
0x2148   : > { %4469 = vmatmul.mubr.msk.f32.vlgmr.msra.gmra.mrb[36].mxu1 %vm2997_vm8, %v4672_v57 }
0x221b   : > { %v3889_v58 = vpop.f32.mrb[36].mxu1 }
0x221c   : > { %4673 = vlog2.f32 %v3889_v58  ;;  %v4470_v59 = vpop.f32.mrb[37].mxu1 }
0x2226   : > { %v4674_v60 = vpop.eup %4673 }
0x2227   : > { %v3894_v61 = vmul.f32 0.6931472, %v4674_v60 }
0x2229   : > { %v3895_v63 = vadd.f32 %v3894_v61, %v3816_v53 }
0x222b   : > { %v3900_v1 = vadd.f32 %v4132_v0, %v3895_v63 }
0x222d   : > { %v3904_v2 = vsel %vm3903_vm3, %v3900_v1, %v3801_v44 }
0x222e   : > { %v3905_v4 = vadd.f32 %v3904_v2, %v5328_v38 }
0x2230   : > { %v3906_v5 = vsel %vm3124_vm10, %v3905_v4, -inf }
0x2231   : > { %3907 = vmax.xlane.f32.xlu1 %v3906_v5 }
0x22be   : > { %v3908_v7 = vpop.xlane.xlu1 %3907 }
0x22bf   : > { %v3909_v9 = vrot.slane %v3908_v7, 4 }
0x22c1   : > { %v3910_v10 = vmax.f32 %v3908_v7, %v3909_v9 }
0x22c3   : > { %v3911_v11 = vrot.slane %v3910_v10, 2 }
0x22c5   : > { %v3912_v12 = vmax.f32 %v3910_v10, %v3911_v11 }
0x22c7   : > { %v3913_v13 = vrot.slane %v3912_v12, 1 }
0x22c9   : > { %v3914_v14 = vmax.f32 %v3912_v12, %v3913_v13 }
0x22cb   : > { %4566 = vpush %v3914_v14 }
0x22fc   : > { %s4567_s29 = spop %4566 }
0x22fd   : > { %v3916_v15 = vstv %s4567_s29 }
0x22fe   : > { %v3917_v56 = vsub.f32 %v3905_v4, %v3916_v15 }
0x2300   : > { %v3918_v16 = vmul.f32 1.442695, %v3917_v56 }
0x2302   : > { %4675 = vpow2.f32 %v3918_v16 }
0x230c   : > { %v4676_v17 = vpop.eup %4675 }
0x230d   : > { %v3920_v18 = vsel %vm3124_vm10, %v4676_v17, 0.0 }
0x230e   : > { %3921 = vadd.xlane.f32.xlu0 %v3920_v18 }
0x239b   : > { %v3922_v38 = vpop.xlane.xlu0 %3921 }
0x239c   : > { %v3923_v19 = vrot.slane %v3922_v38, 4 }
0x239e   : > { %v3924_v21 = vadd.f32 %v3923_v19, %v3922_v38 }
0x23a0   : > { %v3925_v22 = vrot.slane %v3924_v21, 2 }
0x23a2   : > { %v3926_v23 = vadd.f32 %v3925_v22, %v3924_v21 }
0x23a4   : > { %v3927_v24 = vrot.slane %v3926_v23, 1 }
0x23a6   : > { %v3928_v25 = vadd.f32 %v3927_v24, %v3926_v23 }
0x23a8   : > { %4568 = vpush %v3928_v25 }
0x23d9   : > { %s4569_s24 = spop %4568 }
0x23da   : > { %v3930_v26 = vstv %s4569_s24 }
0x23db   : > { %4677 = vlog2.f32 %v3930_v26 }
0x23e5   : > { %v4678_v29 = vpop.eup %4677 }
0x23e6   : > { %v3932_v6 = vmul.f32 0.6931472, %v4678_v29 }
0x23e8   : > { %4570 = vpush %v3932_v6 }
0x2419   : > { %s4571_s16 = spop %4570 }
0x241a   : > { %s3934_s26 = sadd.f32 %s4571_s16, %s4567_s29 }
0x241c   : > { %s3935_s25 = ssub.f32 %s3934_s26, %s3175_s1 }
0x241e   : > { %v3936_v27 = vstv %s3935_s25 }
0x241f   : > { %3938 = vst.msk [vmem:[%s704_s30] sm:$0x1] %vm3937_vm4, %v3936_v27 }
0x2420 PF: > { %s38_s0 = sadd.s32 1, %s4699_s0  }
0x2421   : > { %p35_p3 = scmp.ge.s32.totalorder %s38_s0, 4  }
0x2423   :  { %37 = sbr.rel (!%p35_p3) target bundleno = 23 (0x17), region = 155 }

</bundles_post_ra>
